<compile_context>
chip_gen: v6e
topology: v6e:2x2x1
jax: 0.10.0
libtpu: 0.0.40
codegen_flags: <defaults>
</compile_context>

<pallas_src>
import functools

import jax
import jax.numpy as jnp
from jax.experimental import pallas as pl
from jax.experimental.pallas import tpu as pltpu


def _round_up(x, m):
    return (x + m - 1) // m * m


def _block_kernel(x_ref, wdw_ref, b1_ref, wpw_ref, b2_ref, o_ref,
                  slab_ref, y_ref, *, stride, h, w, h_tile, w_out, chunk):
    """One (image, output-row-tile) per grid step.

    x_ref   : (1, H, W, Cin_p)        bf16 channel-padded input (no spatial halo)
    wdw_ref : (3, 3, Cin_p)           bf16 depthwise weights, BN1 scale pre-folded
    b1_ref  : (1, Cin_p)              f32 folded BN1 bias
    wpw_ref : (Cin_p, Cout_p)         bf16 pointwise weights, BN2 scale pre-folded
    b2_ref  : (1, Cout_p)             f32 folded BN2 bias
    o_ref   : (1, h_tile, Wout, Cout_p) bf16
    slab_ref: (slab_h, W+4, Cin_p)    bf16 zero-halo image slab (persistent scratch)
    y_ref   : (h_tile, Wout, Cin_p)   bf16 depthwise output staging for the MXU
    """
    r = pl.program_id(1)
    cin_p = wdw_ref.shape[-1]
    cout_p = wpw_ref.shape[-1]

    # New image (the x block index only changes with the batch axis): rebuild the
    # zero-halo slab in VMEM.  Whole-slab zero, then interior store at W offset 2 so
    # the bf16 store stays sublane-pair aligned (cheap, well-supported relayout);
    # halo border and tail rows stay exactly zero.  Row axis must therefore be
    # "arbitrary" (slab state carried across r).
    @pl.when(r == 0)
    def _():
        slab_ref[...] = jnp.zeros_like(slab_ref)
        slab_ref[pl.ds(1, h), pl.ds(2, w), :] = x_ref[0]

    # Hoist per-tap weights / bias out of the chunk loop (broadcasts are not CSE'd).
    wk = [[wdw_ref[kh, kw, :] for kw in range(3)] for kh in range(3)]
    b1 = b1_ref[0, :]

    row0 = pl.multiple_of(r * (h_tile * stride), h_tile * stride)
    nchunks = h_tile // chunk

    def dw_chunk(c, carry):
        r0 = row0 + c * (chunk * stride)

        def tap(kh, kw):
            # slab W axis carries a 2-column left halo -> padded col kw == slab col kw+1
            if stride == 1:
                return slab_ref[pl.ds(r0 + kh, chunk), pl.ds(kw + 1, w_out), :]
            # TODO(synk): stride>1 path unvalidated (strided sublane window may lower
            #             slowly); restructure to dense-W + subsample before relying on it.
            return slab_ref[pl.ds(r0 + kh, chunk, stride),
                            pl.ds(kw + 1, w_out, stride), :]

        # ---- depthwise 3x3: bf16 multiplies, f32 accumulation (<= ~16 live vregs) ----
        acc = (tap(0, 0) * wk[0][0]).astype(jnp.float32)
        for kh in range(3):
            for kw in range(3):
                if kh == 0 and kw == 0:
                    continue
                acc = acc + (tap(kh, kw) * wk[kh][kw]).astype(jnp.float32)

        # ---- folded BN1 bias + ReLU, staged as bf16 for the MXU ----
        y_ref[pl.ds(c * chunk, chunk), :, :] = (
            jnp.maximum(acc + b1, 0.0).astype(jnp.bfloat16))
        return carry

    jax.lax.fori_loop(0, nchunks, dw_chunk, 0)

    # ---- pointwise 1x1 conv == (h_tile*Wout, Cin_p) @ (Cin_p, Cout_p) bf16 MXU matmul ----
    y2 = jnp.dot(y_ref[...].reshape(h_tile * w_out, cin_p), wpw_ref[...],
                 preferred_element_type=jnp.float32)

    # ---- folded BN2 bias + ReLU, bf16 writeback ----
    y2 = jnp.maximum(y2 + b2_ref[0, :], 0.0)
    o_ref[0] = y2.reshape(h_tile, w_out, cout_p).astype(o_ref.dtype)


def _layout_bytes(shape, dtype_bytes):
    """Rough VMEM footprint including (sublane, lane) layout padding of minor dims."""
    s = list(shape)
    s[-1] = _round_up(s[-1], 128)
    if len(s) >= 2:
        s[-2] = _round_up(s[-2], (32 // dtype_bytes) * 8 // 4)  # 8 rows f32 / 16 rows bf16
    n = 1
    for d in s:
        n *= int(d)
    return n * dtype_bytes


def fold_bn_params(w_dw, bn1, w_pw, bn2, eps=1e-5):
    """Fold BN scales into the conv weights, pad channels to lane-dense 128 multiples."""
    cin = w_dw.shape[0]
    cout = w_pw.shape[0]
    cin_p = _round_up(cin, 128)
    cout_p = _round_up(cout, 128)

    g1, be1, m1, v1 = bn1
    g2, be2, m2, v2 = bn2
    inv1 = g1 / jnp.sqrt(v1 + eps)                     # (Cin,)
    inv2 = g2 / jnp.sqrt(v2 + eps)                     # (Cout,)
    b1 = be1 - m1 * inv1
    b2 = be2 - m2 * inv2

    wdw = jnp.transpose(w_dw[:, 0, :, :], (1, 2, 0)) * inv1            # (3,3,Cin)
    wpw = jnp.transpose(w_pw[:, :, 0, 0], (1, 0)) * inv2[None, :]      # (Cin,Cout)

    # Padded channels are inert: zero dw weight + zero bias -> ReLU(0)=0 feeding zero
    # pointwise rows/cols (and zero dw weight also neutralizes garbage padded input lanes).
    wdw = jnp.pad(wdw, ((0, 0), (0, 0), (0, cin_p - cin))).astype(jnp.bfloat16)
    b1 = jnp.pad(b1, (0, cin_p - cin)).reshape(1, cin_p).astype(jnp.float32)
    wpw = jnp.pad(wpw, ((0, cin_p - cin), (0, cout_p - cout))).astype(jnp.bfloat16)
    b2 = jnp.pad(b2, (0, cout_p - cout)).reshape(1, cout_p).astype(jnp.float32)
    return wdw, b1, wpw, b2


def mobilenet_block_nhwc(x, wdw, b1, wpw, b2, *, stride=1):
    """Canonical inter-block API.

    x: (N, H, W, Cin_p) bf16, channels already padded to a multiple of 128 (no
    spatial halo).  Returns (N, Hout, Wout, Cout_p) bf16 in the same layout, so
    consecutive blocks chain with zero extra HBM round trips.
    """
    n, h, w, cin_p = x.shape
    cout_p = wpw.shape[1]
    h_out = (h + 2 - 3) // stride + 1
    w_out = (w + 2 - 3) // stride + 1

    # Row-tile the output: target MXU M ~= 256 (v6e/v7x 256x256 MXU; fine on v5e too).
    # cdiv grid => no degenerate divisor fallback for prime h_out.
    h_tile = int(max(1, min(h_out, pl.cdiv(256, w_out))))
    n_rt = int(pl.cdiv(h_out, h_tile))
    h_pad = n_rt * h_tile

    # Depthwise row chunk: keep the live f32 accumulator <= ~16 vregs (64 KiB).
    chunk = int(min(h_tile, max(1, 16384 // (w_out * cin_p))))
    while h_tile % chunk:
        chunk -= 1
    # TODO(synk): very wide layers (w_out >= 56 with large Cin_p) also need a W tile
    #             before a single row fits the vreg budget.

    slab_h = max((h_pad - 1) * stride + 3, h + 2)

    # Explicit VMEM budget (v5e scoped default is 16 MiB; v7x physical is 64 MiB).
    est = 2 * (_layout_bytes((1, h, w, cin_p), 2)               # x block, double-buffered
               + _layout_bytes((1, h_tile, w_out, cout_p), 2)   # out block
               + _layout_bytes((3, 3, cin_p), 2)
               + _layout_bytes((1, cin_p), 4)
               + _layout_bytes((cin_p, cout_p), 2)
               + _layout_bytes((1, cout_p), 4))
    est += _layout_bytes((slab_h, w + 4, cin_p), 2)             # halo slab scratch
    est += _layout_bytes((h_tile, w_out, cin_p), 2)             # y staging scratch
    vmem_limit = int(min(max(2 * est, 16 << 20), 64 << 20))

    kernel = functools.partial(_block_kernel, stride=stride, h=h, w=w,
                               h_tile=h_tile, w_out=w_out, chunk=chunk)

    return pl.pallas_call(
        kernel,
        out_shape=jax.ShapeDtypeStruct((n, h_out, w_out, cout_p), jnp.bfloat16),
        grid_spec=pltpu.PrefetchScalarGridSpec(
            num_scalar_prefetch=0,
            grid=(n, n_rt),
            in_specs=[
                # whole image; block index constant across the row axis -> one DMA/image
                pl.BlockSpec((1, h, w, cin_p), lambda b, r: (b, 0, 0, 0)),
                pl.BlockSpec((3, 3, cin_p), lambda b, r: (0, 0, 0)),
                pl.BlockSpec((1, cin_p), lambda b, r: (0, 0)),
                pl.BlockSpec((cin_p, cout_p), lambda b, r: (0, 0)),
                pl.BlockSpec((1, cout_p), lambda b, r: (0, 0)),
            ],
            out_specs=pl.BlockSpec((1, h_tile, w_out, cout_p),
                                   lambda b, r: (b, r, 0, 0)),
            scratch_shapes=[
                pltpu.VMEM((slab_h, w + 4, cin_p), jnp.bfloat16),   # zero-halo slab
                pltpu.VMEM((h_tile, w_out, cin_p), jnp.bfloat16),   # depthwise staging
            ],
        ),
        compiler_params=pltpu.CompilerParams(
            # row axis carries slab state across iterations -> "arbitrary";
            # batch axis shards across TensorCores on v7x.
            dimension_semantics=("parallel", "arbitrary"),
            vmem_limit_bytes=vmem_limit),
    )(x, wdw, b1, wpw, b2)


def mobilenet_block(x_nchw, w_dw, bn1, w_pw, bn2, *, stride=1, eps=1e-5):
    """NCHW f32 convenience wrapper (network boundary / testing only).

    The transpose + channel pad here and the slice + transpose on the way out are
    one-off boundary costs: inside a network, chain blocks with
    `mobilenet_block_nhwc` on the channel-padded NHWC bf16 tensors directly.
    """
    cout = w_pw.shape[0]
    cin = x_nchw.shape[1]
    cin_p = _round_up(cin, 128)
    # TODO(synk): for very narrow layers (Cin << 128) the 128-lane padding amplifies
    #             traffic/compute; fold batch/blocks into lanes to reclaim it.

    wdw, b1, wpw, b2 = fold_bn_params(w_dw, bn1, w_pw, bn2, eps=eps)
    x = jnp.transpose(x_nchw, (0, 2, 3, 1)).astype(jnp.bfloat16)
    x = jnp.pad(x, ((0, 0), (0, 0), (0, 0), (0, cin_p - cin)))

    out = mobilenet_block_nhwc(x, wdw, b1, wpw, b2, stride=stride)
    return jnp.transpose(out[..., :cout], (0, 3, 1, 2)).astype(jnp.float32)


def _reference(x_nchw, w_dw, bn1, w_pw, bn2, *, stride=1, eps=1e-5):
    """Pure-JAX f32 reference (mirrors the PyTorch forward in inference mode)."""
    cin = x_nchw.shape[1]
    g1, be1, m1, v1 = bn1
    g2, be2, m2, v2 = bn2
    dw = jax.lax.conv_general_dilated(
        x_nchw, w_dw, window_strides=(stride, stride), padding=((1, 1), (1, 1)),
        feature_group_count=cin, dimension_numbers=("NCHW", "OIHW", "NCHW"))
    dw = (dw - m1[None, :, None, None]) / jnp.sqrt(v1 + eps)[None, :, None, None]
    dw = dw * g1[None, :, None, None] + be1[None, :, None, None]
    dw = jnp.maximum(dw, 0.0)
    pw = jax.lax.conv_general_dilated(
        dw, w_pw, window_strides=(1, 1), padding="VALID",
        dimension_numbers=("NCHW", "OIHW", "NCHW"))
    pw = (pw - m2[None, :, None, None]) / jnp.sqrt(v2 + eps)[None, :, None, None]
    pw = pw * g2[None, :, None, None] + be2[None, :, None, None]
    return jnp.maximum(pw, 0.0)


if __name__ == "__main__":
    N, CIN, COUT, H, W, STRIDE = 2, 4, 8, 16, 16, 1

    key = jax.random.PRNGKey(0)
    k1, k2, k3 = jax.random.split(key, 3)

    x = jax.random.normal(k1, (N, CIN, H, W), jnp.float32)
    w_dw = jax.random.normal(k2, (CIN, 1, 3, 3), jnp.float32) * 0.2
    w_pw = jax.random.normal(k3, (COUT, CIN, 1, 1), jnp.float32) * 0.2

    # Deterministic (non-trivial) BatchNorm parameters / running stats.
    bn1 = (1.0 + 0.1 * jnp.arange(CIN, dtype=jnp.float32),     # gamma
           0.05 * jnp.arange(CIN, dtype=jnp.float32),          # beta
           0.02 * jnp.arange(CIN, dtype=jnp.float32),          # running mean
           1.0 + 0.05 * jnp.arange(CIN, dtype=jnp.float32))    # running var
    bn2 = (1.0 + 0.1 * jnp.arange(COUT, dtype=jnp.float32),
           0.05 * jnp.arange(COUT, dtype=jnp.float32),
           0.02 * jnp.arange(COUT, dtype=jnp.float32),
           1.0 + 0.05 * jnp.arange(COUT, dtype=jnp.float32))

    out = mobilenet_block(x, w_dw, bn1, w_pw, bn2, stride=STRIDE)
    out = jax.block_until_ready(out)

    ref = jax.block_until_ready(_reference(x, w_dw, bn1, w_pw, bn2, stride=STRIDE))
    assert out.shape == ref.shape == (N, COUT, H, W)
    # bf16 input / bf16 depthwise multiplies / bf16 MXU / bf16 output -> bf16-level tolerance.
    max_err = float(jnp.abs(out - ref).max())
    assert jnp.allclose(out, ref, atol=7.5e-2, rtol=5e-2), max_err

    print("KERNEL_OK")
</pallas_src>

<mosaic_0001>
module attributes {stable_mosaic.version = 11 : i64} {
  func.func @_block_kernel(%arg0: i32, %arg1: i32, %arg2: memref<1x16x16x128xbf16, #tpu.memory_space<vmem>>, %arg3: memref<3x3x128xbf16, #tpu.memory_space<vmem>>, %arg4: memref<1x128xf32, #tpu.memory_space<vmem>>, %arg5: memref<128x128xbf16, #tpu.memory_space<vmem>>, %arg6: memref<1x128xf32, #tpu.memory_space<vmem>>, %arg7: memref<1x16x16x128xbf16, #tpu.memory_space<vmem>>, %arg8: memref<18x20x128xbf16, #tpu.memory_space<vmem>>, %arg9: memref<16x16x128xbf16, #tpu.memory_space<vmem>>) attributes {dimension_semantics = [#tpu.dimension_semantics<parallel>, #tpu.dimension_semantics<arbitrary>], iteration_bounds = array<i64: 2, 1>, scalar_prefetch = 0 : i64, scratch_operands = 2 : i64, tpu.core_type = #tpu.core_type<tc>, window_params = [{transform_indices = @transform_0, window_bounds = array<i64: 1, 16, 16, 128>}, {pipeline_mode = #tpu.pipeline_mode<synchronous>, transform_indices = @transform_1, window_bounds = array<i64: 3, 3, 128>}, {pipeline_mode = #tpu.pipeline_mode<synchronous>, transform_indices = @transform_2, window_bounds = array<i64: 1, 128>}, {pipeline_mode = #tpu.pipeline_mode<synchronous>, transform_indices = @transform_3, window_bounds = array<i64: 128, 128>}, {pipeline_mode = #tpu.pipeline_mode<synchronous>, transform_indices = @transform_4, window_bounds = array<i64: 1, 128>}, {transform_indices = @transform_5, window_bounds = array<i64: 1, 16, 16, 128>}]} {
    %c0_i32 = arith.constant 0 : i32
    %0 = arith.cmpi eq, %arg1, %c0_i32 : i32
    %1 = arith.extui %0 : i1 to i32
    %c0_i32_0 = arith.constant 0 : i32
    %2 = arith.cmpi ne, %1, %c0_i32_0 : i32
    scf.if %2 {
      %cst_41 = arith.constant 0.000000e+00 : bf16
      %42 = vector.broadcast %cst_41 : bf16 to vector<18x20x128xbf16>
      %c0_42 = arith.constant 0 : index
      %c0_43 = arith.constant 0 : index
      %c0_44 = arith.constant 0 : index
      %43 = vector.load %arg8[%c0_42, %c0_43, %c0_44] : memref<18x20x128xbf16, #tpu.memory_space<vmem>>, vector<18x20x128xbf16>
      tpu.vector_store %arg8[%c0_42, %c0_43, %c0_44], %42 {strides = array<i32>} : memref<18x20x128xbf16, #tpu.memory_space<vmem>>, vector<18x20x128xbf16>,
      %c0_45 = arith.constant 0 : index
      %c0_46 = arith.constant 0 : index
      %c0_47 = arith.constant 0 : index
      %c0_48 = arith.constant 0 : index
      %44 = vector.load %arg2[%c0_45, %c0_46, %c0_47, %c0_48] : memref<1x16x16x128xbf16, #tpu.memory_space<vmem>>, vector<1x16x16x128xbf16>
      %45 = vector.shape_cast %44 : vector<1x16x16x128xbf16> to vector<16x16x128xbf16>
      %c1_49 = arith.constant 1 : index
      %c2_50 = arith.constant 2 : index
      %c0_51 = arith.constant 0 : index
      %46 = vector.load %arg8[%c1_49, %c2_50, %c0_51] : memref<18x20x128xbf16, #tpu.memory_space<vmem>>, vector<16x16x128xbf16>
      tpu.vector_store %arg8[%c1_49, %c2_50, %c0_51], %45 {strides = array<i32>} : memref<18x20x128xbf16, #tpu.memory_space<vmem>>, vector<16x16x128xbf16>,
    } else {
    }
    %c0 = arith.constant 0 : index
    %c0_1 = arith.constant 0 : index
    %c0_2 = arith.constant 0 : index
    %3 = vector.load %arg3[%c0, %c0_1, %c0_2] : memref<3x3x128xbf16, #tpu.memory_space<vmem>>, vector<1x1x128xbf16>
    %4 = vector.shape_cast %3 : vector<1x1x128xbf16> to vector<128xbf16>
    %c0_3 = arith.constant 0 : index
    %c1 = arith.constant 1 : index
    %c0_4 = arith.constant 0 : index
    %5 = vector.load %arg3[%c0_3, %c1, %c0_4] : memref<3x3x128xbf16, #tpu.memory_space<vmem>>, vector<1x1x128xbf16>
    %6 = vector.shape_cast %5 : vector<1x1x128xbf16> to vector<128xbf16>
    %c0_5 = arith.constant 0 : index
    %c2 = arith.constant 2 : index
    %c0_6 = arith.constant 0 : index
    %7 = vector.load %arg3[%c0_5, %c2, %c0_6] : memref<3x3x128xbf16, #tpu.memory_space<vmem>>, vector<1x1x128xbf16>
    %8 = vector.shape_cast %7 : vector<1x1x128xbf16> to vector<128xbf16>
    %c1_7 = arith.constant 1 : index
    %c0_8 = arith.constant 0 : index
    %c0_9 = arith.constant 0 : index
    %9 = vector.load %arg3[%c1_7, %c0_8, %c0_9] : memref<3x3x128xbf16, #tpu.memory_space<vmem>>, vector<1x1x128xbf16>
    %10 = vector.shape_cast %9 : vector<1x1x128xbf16> to vector<128xbf16>
    %c1_10 = arith.constant 1 : index
    %c1_11 = arith.constant 1 : index
    %c0_12 = arith.constant 0 : index
    %11 = vector.load %arg3[%c1_10, %c1_11, %c0_12] : memref<3x3x128xbf16, #tpu.memory_space<vmem>>, vector<1x1x128xbf16>
    %12 = vector.shape_cast %11 : vector<1x1x128xbf16> to vector<128xbf16>
    %c1_13 = arith.constant 1 : index
    %c2_14 = arith.constant 2 : index
    %c0_15 = arith.constant 0 : index
    %13 = vector.load %arg3[%c1_13, %c2_14, %c0_15] : memref<3x3x128xbf16, #tpu.memory_space<vmem>>, vector<1x1x128xbf16>
    %14 = vector.shape_cast %13 : vector<1x1x128xbf16> to vector<128xbf16>
    %c2_16 = arith.constant 2 : index
    %c0_17 = arith.constant 0 : index
    %c0_18 = arith.constant 0 : index
    %15 = vector.load %arg3[%c2_16, %c0_17, %c0_18] : memref<3x3x128xbf16, #tpu.memory_space<vmem>>, vector<1x1x128xbf16>
    %16 = vector.shape_cast %15 : vector<1x1x128xbf16> to vector<128xbf16>
    %c2_19 = arith.constant 2 : index
    %c1_20 = arith.constant 1 : index
    %c0_21 = arith.constant 0 : index
    %17 = vector.load %arg3[%c2_19, %c1_20, %c0_21] : memref<3x3x128xbf16, #tpu.memory_space<vmem>>, vector<1x1x128xbf16>
    %18 = vector.shape_cast %17 : vector<1x1x128xbf16> to vector<128xbf16>
    %c2_22 = arith.constant 2 : index
    %c2_23 = arith.constant 2 : index
    %c0_24 = arith.constant 0 : index
    %19 = vector.load %arg3[%c2_22, %c2_23, %c0_24] : memref<3x3x128xbf16, #tpu.memory_space<vmem>>, vector<1x1x128xbf16>
    %20 = vector.shape_cast %19 : vector<1x1x128xbf16> to vector<128xbf16>
    %c0_25 = arith.constant 0 : index
    %c0_26 = arith.constant 0 : index
    %21 = vector.load %arg4[%c0_25, %c0_26] : memref<1x128xf32, #tpu.memory_space<vmem>>, vector<1x128xf32>
    %22 = vector.shape_cast %21 : vector<1x128xf32> to vector<128xf32>
    %c16_i32 = arith.constant 16 : i32
    %23 = arith.muli %arg1, %c16_i32 : i32
    %24 = tpu.assume_multiple %23, 16 : i32
    %c0_i32_27 = arith.constant 0 : i32
    %c2_i32 = arith.constant 2 : i32
    %25 = arith.addi %c0_i32_27, %c2_i32 : i32
    %c1_i32 = arith.constant 1 : i32
    scf.for %arg10 = %c0_i32_27 to %25 step %c1_i32  : i32 {
      %c8_i32 = arith.constant 8 : i32
      %42 = arith.muli %arg10, %c8_i32 : i32
      %43 = arith.addi %24, %42 : i32
      %c0_i32_41 = arith.constant 0 : i32
      %44 = arith.addi %43, %c0_i32_41 : i32
      %45 = arith.index_cast %44 : i32 to index
      %c1_42 = arith.constant 1 : index
      %c0_43 = arith.constant 0 : index
      %46 = vector.load %arg8[%45, %c1_42, %c0_43] : memref<18x20x128xbf16, #tpu.memory_space<vmem>>, vector<8x16x128xbf16>
      %47 = vector.shape_cast %4 : vector<128xbf16> to vector<1x1x128xbf16>
      %48 = vector.broadcast %47 : vector<1x1x128xbf16> to vector<8x16x128xbf16>
      %49 = arith.mulf %46, %48 : vector<8x16x128xbf16>
      %50 = arith.extf %49 : vector<8x16x128xbf16> to vector<8x16x128xf32>
      %c0_i32_44 = arith.constant 0 : i32
      %51 = arith.addi %43, %c0_i32_44 : i32
      %52 = arith.index_cast %51 : i32 to index
      %c2_45 = arith.constant 2 : index
      %c0_46 = arith.constant 0 : index
      %53 = vector.load %arg8[%52, %c2_45, %c0_46] : memref<18x20x128xbf16, #tpu.memory_space<vmem>>, vector<8x16x128xbf16>
      %54 = vector.shape_cast %6 : vector<128xbf16> to vector<1x1x128xbf16>
      %55 = vector.broadcast %54 : vector<1x1x128xbf16> to vector<8x16x128xbf16>
      %56 = arith.mulf %53, %55 : vector<8x16x128xbf16>
      %57 = arith.extf %56 : vector<8x16x128xbf16> to vector<8x16x128xf32>
      %58 = arith.addf %50, %57 : vector<8x16x128xf32>
      %c0_i32_47 = arith.constant 0 : i32
      %59 = arith.addi %43, %c0_i32_47 : i32
      %60 = arith.index_cast %59 : i32 to index
      %c3 = arith.constant 3 : index
      %c0_48 = arith.constant 0 : index
      %61 = vector.load %arg8[%60, %c3, %c0_48] : memref<18x20x128xbf16, #tpu.memory_space<vmem>>, vector<8x16x128xbf16>
      %62 = vector.shape_cast %8 : vector<128xbf16> to vector<1x1x128xbf16>
      %63 = vector.broadcast %62 : vector<1x1x128xbf16> to vector<8x16x128xbf16>
      %64 = arith.mulf %61, %63 : vector<8x16x128xbf16>
      %65 = arith.extf %64 : vector<8x16x128xbf16> to vector<8x16x128xf32>
      %66 = arith.addf %58, %65 : vector<8x16x128xf32>
      %c1_i32_49 = arith.constant 1 : i32
      %67 = arith.addi %43, %c1_i32_49 : i32
      %68 = arith.index_cast %67 : i32 to index
      %c1_50 = arith.constant 1 : index
      %c0_51 = arith.constant 0 : index
      %69 = vector.load %arg8[%68, %c1_50, %c0_51] : memref<18x20x128xbf16, #tpu.memory_space<vmem>>, vector<8x16x128xbf16>
      %70 = vector.shape_cast %10 : vector<128xbf16> to vector<1x1x128xbf16>
      %71 = vector.broadcast %70 : vector<1x1x128xbf16> to vector<8x16x128xbf16>
      %72 = arith.mulf %69, %71 : vector<8x16x128xbf16>
      %73 = arith.extf %72 : vector<8x16x128xbf16> to vector<8x16x128xf32>
      %74 = arith.addf %66, %73 : vector<8x16x128xf32>
      %c1_i32_52 = arith.constant 1 : i32
      %75 = arith.addi %43, %c1_i32_52 : i32
      %76 = arith.index_cast %75 : i32 to index
      %c2_53 = arith.constant 2 : index
      %c0_54 = arith.constant 0 : index
      %77 = vector.load %arg8[%76, %c2_53, %c0_54] : memref<18x20x128xbf16, #tpu.memory_space<vmem>>, vector<8x16x128xbf16>
      %78 = vector.shape_cast %12 : vector<128xbf16> to vector<1x1x128xbf16>
      %79 = vector.broadcast %78 : vector<1x1x128xbf16> to vector<8x16x128xbf16>
      %80 = arith.mulf %77, %79 : vector<8x16x128xbf16>
      %81 = arith.extf %80 : vector<8x16x128xbf16> to vector<8x16x128xf32>
      %82 = arith.addf %74, %81 : vector<8x16x128xf32>
      %c1_i32_55 = arith.constant 1 : i32
      %83 = arith.addi %43, %c1_i32_55 : i32
      %84 = arith.index_cast %83 : i32 to index
      %c3_56 = arith.constant 3 : index
      %c0_57 = arith.constant 0 : index
      %85 = vector.load %arg8[%84, %c3_56, %c0_57] : memref<18x20x128xbf16, #tpu.memory_space<vmem>>, vector<8x16x128xbf16>
      %86 = vector.shape_cast %14 : vector<128xbf16> to vector<1x1x128xbf16>
      %87 = vector.broadcast %86 : vector<1x1x128xbf16> to vector<8x16x128xbf16>
      %88 = arith.mulf %85, %87 : vector<8x16x128xbf16>
      %89 = arith.extf %88 : vector<8x16x128xbf16> to vector<8x16x128xf32>
      %90 = arith.addf %82, %89 : vector<8x16x128xf32>
      %c2_i32_58 = arith.constant 2 : i32
      %91 = arith.addi %43, %c2_i32_58 : i32
      %92 = arith.index_cast %91 : i32 to index
      %c1_59 = arith.constant 1 : index
      %c0_60 = arith.constant 0 : index
      %93 = vector.load %arg8[%92, %c1_59, %c0_60] : memref<18x20x128xbf16, #tpu.memory_space<vmem>>, vector<8x16x128xbf16>
      %94 = vector.shape_cast %16 : vector<128xbf16> to vector<1x1x128xbf16>
      %95 = vector.broadcast %94 : vector<1x1x128xbf16> to vector<8x16x128xbf16>
      %96 = arith.mulf %93, %95 : vector<8x16x128xbf16>
      %97 = arith.extf %96 : vector<8x16x128xbf16> to vector<8x16x128xf32>
      %98 = arith.addf %90, %97 : vector<8x16x128xf32>
      %c2_i32_61 = arith.constant 2 : i32
      %99 = arith.addi %43, %c2_i32_61 : i32
      %100 = arith.index_cast %99 : i32 to index
      %c2_62 = arith.constant 2 : index
      %c0_63 = arith.constant 0 : index
      %101 = vector.load %arg8[%100, %c2_62, %c0_63] : memref<18x20x128xbf16, #tpu.memory_space<vmem>>, vector<8x16x128xbf16>
      %102 = vector.shape_cast %18 : vector<128xbf16> to vector<1x1x128xbf16>
      %103 = vector.broadcast %102 : vector<1x1x128xbf16> to vector<8x16x128xbf16>
      %104 = arith.mulf %101, %103 : vector<8x16x128xbf16>
      %105 = arith.extf %104 : vector<8x16x128xbf16> to vector<8x16x128xf32>
      %106 = arith.addf %98, %105 : vector<8x16x128xf32>
      %c2_i32_64 = arith.constant 2 : i32
      %107 = arith.addi %43, %c2_i32_64 : i32
      %108 = arith.index_cast %107 : i32 to index
      %c3_65 = arith.constant 3 : index
      %c0_66 = arith.constant 0 : index
      %109 = vector.load %arg8[%108, %c3_65, %c0_66] : memref<18x20x128xbf16, #tpu.memory_space<vmem>>, vector<8x16x128xbf16>
      %110 = vector.shape_cast %20 : vector<128xbf16> to vector<1x1x128xbf16>
      %111 = vector.broadcast %110 : vector<1x1x128xbf16> to vector<8x16x128xbf16>
      %112 = arith.mulf %109, %111 : vector<8x16x128xbf16>
      %113 = arith.extf %112 : vector<8x16x128xbf16> to vector<8x16x128xf32>
      %114 = arith.addf %106, %113 : vector<8x16x128xf32>
      %115 = vector.shape_cast %22 : vector<128xf32> to vector<1x1x128xf32>
      %116 = vector.broadcast %115 : vector<1x1x128xf32> to vector<8x16x128xf32>
      %117 = arith.addf %114, %116 : vector<8x16x128xf32>
      %cst_67 = arith.constant 0.000000e+00 : f32
      %118 = vector.broadcast %cst_67 : f32 to vector<8x16x128xf32>
      %119 = arith.maximumf %117, %118 : vector<8x16x128xf32>
      %120 = arith.truncf %119 : vector<8x16x128xf32> to vector<8x16x128xbf16>
      %c8_i32_68 = arith.constant 8 : i32
      %121 = arith.muli %arg10, %c8_i32_68 : i32
      %122 = arith.index_cast %121 : i32 to index
      %c0_69 = arith.constant 0 : index
      %c0_70 = arith.constant 0 : index
      %123 = vector.load %arg9[%122, %c0_69, %c0_70] : memref<16x16x128xbf16, #tpu.memory_space<vmem>>, vector<8x16x128xbf16>
      tpu.vector_store %arg9[%122, %c0_69, %c0_70], %120 {strides = array<i32>} : memref<16x16x128xbf16, #tpu.memory_space<vmem>>, vector<8x16x128xbf16>,
    }
    %c2_i32_28 = arith.constant 2 : i32
    %c0_29 = arith.constant 0 : index
    %c0_30 = arith.constant 0 : index
    %c0_31 = arith.constant 0 : index
    %26 = vector.load %arg9[%c0_29, %c0_30, %c0_31] : memref<16x16x128xbf16, #tpu.memory_space<vmem>>, vector<16x16x128xbf16>
    %27 = vector.shape_cast %26 : vector<16x16x128xbf16> to vector<256x128xbf16>
    %c0_32 = arith.constant 0 : index
    %c0_33 = arith.constant 0 : index
    %28 = vector.load %arg5[%c0_32, %c0_33] : memref<128x128xbf16, #tpu.memory_space<vmem>>, vector<128x128xbf16>
    %cst = arith.constant dense<0.000000e+00> : vector<256x128xf32>
    %29 = tpu.matmul %27, %28, %cst {dimension_numbers = #tpu.dot_dimension_numbers<[1], [0], [0], [1], [0, 0, 1, 1], [], []>} : vector<256x128xbf16>, vector<128x128xbf16>, vector<256x128xf32> -> vector<256x128xf32>
    %c0_34 = arith.constant 0 : index
    %c0_35 = arith.constant 0 : index
    %30 = vector.load %arg6[%c0_34, %c0_35] : memref<1x128xf32, #tpu.memory_space<vmem>>, vector<1x128xf32>
    %31 = vector.shape_cast %30 : vector<1x128xf32> to vector<128xf32>
    %32 = vector.shape_cast %31 : vector<128xf32> to vector<1x128xf32>
    %33 = vector.broadcast %32 : vector<1x128xf32> to vector<256x128xf32>
    %34 = arith.addf %29, %33 : vector<256x128xf32>
    %cst_36 = arith.constant 0.000000e+00 : f32
    %35 = vector.broadcast %cst_36 : f32 to vector<256x128xf32>
    %36 = arith.maximumf %34, %35 : vector<256x128xf32>
    %37 = vector.shape_cast %36 : vector<256x128xf32> to vector<16x16x128xf32>
    %38 = arith.truncf %37 : vector<16x16x128xf32> to vector<16x16x128xbf16>
    %c0_37 = arith.constant 0 : index
    %c0_38 = arith.constant 0 : index
    %c0_39 = arith.constant 0 : index
    %c0_40 = arith.constant 0 : index
    %39 = vector.load %arg7[%c0_37, %c0_38, %c0_39, %c0_40] : memref<1x16x16x128xbf16, #tpu.memory_space<vmem>>, vector<1x16x16x128xbf16>
    %40 = vector.shape_cast %39 : vector<1x16x16x128xbf16> to vector<16x16x128xbf16>
    %41 = vector.shape_cast %38 : vector<16x16x128xbf16> to vector<1x16x16x128xbf16>
    tpu.vector_store %arg7[%c0_37, %c0_38, %c0_39, %c0_40], %41 {strides = array<i32>} : memref<1x16x16x128xbf16, #tpu.memory_space<vmem>>, vector<1x16x16x128xbf16>,
    return
  }
  func.func @transform_0(%arg0: i32, %arg1: i32) -> (i32, i32, i32, i32) {
    %c0_i32 = arith.constant 0 : i32
    %c0_i32_0 = arith.constant 0 : i32
    %c0_i32_1 = arith.constant 0 : i32
    %c0_i32_2 = arith.constant 0 : i32
    return %arg0, %c0_i32, %c0_i32_0, %c0_i32_1 : i32, i32, i32, i32
  }
  func.func @transform_1(%arg0: i32, %arg1: i32) -> (i32, i32, i32) {
    %c0_i32 = arith.constant 0 : i32
    %c0_i32_0 = arith.constant 0 : i32
    %c0_i32_1 = arith.constant 0 : i32
    %c0_i32_2 = arith.constant 0 : i32
    return %c0_i32, %c0_i32_0, %c0_i32_1 : i32, i32, i32
  }
  func.func @transform_2(%arg0: i32, %arg1: i32) -> (i32, i32) {
    %c0_i32 = arith.constant 0 : i32
    %c0_i32_0 = arith.constant 0 : i32
    %c0_i32_1 = arith.constant 0 : i32
    return %c0_i32, %c0_i32_0 : i32, i32
  }
  func.func @transform_3(%arg0: i32, %arg1: i32) -> (i32, i32) {
    %c0_i32 = arith.constant 0 : i32
    %c0_i32_0 = arith.constant 0 : i32
    %c0_i32_1 = arith.constant 0 : i32
    return %c0_i32, %c0_i32_0 : i32, i32
  }
  func.func @transform_4(%arg0: i32, %arg1: i32) -> (i32, i32) {
    %c0_i32 = arith.constant 0 : i32
    %c0_i32_0 = arith.constant 0 : i32
    %c0_i32_1 = arith.constant 0 : i32
    return %c0_i32, %c0_i32_0 : i32, i32
  }
  func.func @transform_5(%arg0: i32, %arg1: i32) -> (i32, i32, i32, i32) {
    %c0_i32 = arith.constant 0 : i32
    %c0_i32_0 = arith.constant 0 : i32
    %c0_i32_1 = arith.constant 0 : i32
    return %arg0, %arg1, %c0_i32, %c0_i32_0 : i32, i32, i32, i32
  }
}

</mosaic_0001>

<bundles_post_ra>
// kernel: tpu_custom_call.1
= control target key start
LH: loop header
LB: loop body
LE: loop exit
PB: predicated region body
PF: predicated region fallthrough
CT: control target
= control target key end

     0   :  { %s5842_s0 = inlined_call_operand.hbm [shape: bf16[2,16,16,128], index: 0, kind: input, shape index: {}]   ;;  %s5843_s1 = inlined_call_operand.hbm [shape: bf16[3,3,128], index: 1, kind: input, shape index: {}]   ;;  %s5844_s2 = inlined_call_operand.vmem [shape: f32[1,128], index: 2, kind: input, shape index: {}]   ;;  %s5845_s3 = inlined_call_operand.hbm [shape: bf16[128,128], index: 3, kind: input, shape index: {}]   ;;  %s5846_s4 = inlined_call_operand.vmem [shape: f32[1,128], index: 4, kind: input, shape index: {}]   ;;  %s5847_s5 = inlined_call_operand.hbm [shape: bf16[2,16,16,128], index: 5, kind: output, shape index: {}]  }
   0x1   :  { %5949 = sst [smem:[#allocation47_spill]] %s5843_s1 }
   0x2   :  { %10 = vsyncpa [#allocation5], 0 }
   0x3   :  { %12 = vsyncpa [#allocation5 + $0x1], 0 }
   0x4   :  { %13 = vsyncpa [#allocation8], 0 }
   0x5   :  { %14 = vsyncpa [#allocation6], 0 }
   0x6   :  { %16 = vsyncpa [#allocation6 + $0x1], 0  ;;  %s3832_s18 = smov 0   ;;  %s3834_s19 = smov 0  }
   0x7   :  { %s3836_s20 = smov 0   ;;  %s3838_s21 = smov 0  }
   0x8   :  { %s3840_s22 = smov 0   ;;  %s3842_s23 = smov 0  }
   0x9 LB: > { %s3052_s24 = sadd.s32 4294967295, %s3785_s23   ;;  %s3053_s25 = sadd.s32 4294967294, %s3785_s23   ;;  %s3785_s23 = sphi %s3842_s23, %s22_s23   ;;  %s3781_s22 = sphi %s3840_s22, %s6179_s22   ;;  %s3777_s21 = sphi %s3838_s21, %s6178_s21   ;;  %s3773_s20 = sphi %s3836_s20, %s6177_s20   ;;  %s3769_s19 = sphi %s3834_s19, %s6176_s19   ;;  %s3765_s18 = sphi %s3832_s18, %s6175_s18  }
   0xa   : > { %p54_p0 = scmp.ne.s32.totalorder %s3769_s19, %s3765_s18  ;;  %p3866_p1 = scmp.eq.s32.totalorder %s3052_s24, 0 }
   0xb   : > { %p3870_p2 = scmp.eq.s32.totalorder %s3052_s24, 1  ;;  %p170_p3 = scmp.eq.s32.totalorder %s3053_s25, 1 }
   0xc   : > { %s5950_s26 = scalar_select %p3866_p1, 1, 0 }
   0xd   : > { %p3876_p4 = por %p3866_p1, %p54_p0  ;;  %p3054_p5 = scmp.ge.s32.totalorder %s3785_s23, 1 }
   0xe   : > { %p3881_p6 = por %p170_p3, %p54_p0  ;;  %p177_p7 = scmp.lt.s32.totalorder %s3785_s23, 3 }
   0xf   : > { %s5952_s28 = scalar_select %p3876_p4, 1, 0 }
  0x10   : > { %s5953_s29 = scalar_select %p3881_p6, 1, 0 }
  0x11   : > { %p3886_p8 = pnand %p3054_p5, %p177_p7  ;;  %s3791_s6 = smov [#allocation7]  }
  0x12   : > { %s189_s7 = sshll.u32 %s3791_s6, 4  ;;  %s3792_s9 = smov [#allocation9]   ;;  %s190_s7 = int_to_ptr.vmem [resolvable:$true] %s189_s7 }
  0x13   : > { %p3507_p9 = pneg %p3886_p8  ;;  %s205_s10 = sshll.u32 %s3792_s9, 4  ;;  %s206_s10 = int_to_ptr.vmem [resolvable:$true] %s205_s10 }
  0x14   : > { %s3628_s11 = scalar_lea.vmem %s190_s7, 96  ;;  %p3636_p5 = scmp.lt.s32.totalorder %s190_s7, %s190_s7 }
  0x15   : > { %p3895_p11 = pnand %p3507_p9, %p3866_p1  ;;  %p3629_p13 = scmp.ne.s32.totalorder %s190_s7, %s3628_s11 }
  0x16   : > { %p3637_p7 = scmp.lt.s32.totalorder %s3628_s11, %s3628_s11 }
  0x17   : > { %p3619_p12 = pneg %p3895_p11 }
  0x18   : > { %p3638_p10 = por %p3637_p7, %p3636_p5 }
  0x19   : > { %p3631_p0 = pnand %p3629_p13, %p3619_p12 }
  0x1b   : > { %p3632_p3 = pneg %p3631_p0 }
  0x1d   : > { %p3639_p9 = pnand %p3638_p10, %p3632_p3 }
  0x1f   : > { %3642 = shalt.err (!%p3639_p9)
}
  0x20   : > { %s3793_s12 = smov 32   ;;  %s3794_s13 = smov 2  }
  0x21   : > { %s5956_s1 = sld [smem:[#allocation47_spill]]  ;;  %s3654_s16 = scalar_lea.vmem %s206_s10, 1024 }
  0x22   : > { %p3655_p6 = scmp.ne.s32.totalorder %s206_s10, %s3654_s16  ;;  %p3662_p1 = scmp.lt.s32.totalorder %s206_s10, %s206_s10 }
  0x23   : > { %p3663_p4 = scmp.lt.s32.totalorder %s3654_s16, %s3654_s16 }
  0x24   : > { %p3657_p13 = pnand %p3655_p6, %p3619_p12 }
  0x25   : > { %p3664_p5 = por %p3663_p4, %p3662_p1 }
  0x26   : > { %p3658_p0 = pneg %p3657_p13 }
  0x27   : > { %3510 = dma.hbm_to_vmem [thread:$0]  (!%p3895_p11), %s5956_s1, 96, %s190_s7, [#allocation8], %s3793_s12, %s3793_s12, %s3794_s13  }
  0x28   : > { %p3665_p10 = pnand %p3664_p5, %p3658_p0 }
  0x2a   : > { %3668 = shalt.err (!%p3665_p10)
}
  0x2b   : > { %s5851_s17 = smov 64   ;;  %s5852_s24 = smov 4  }
  0x2c   : > { %3513 = dma.hbm_to_vmem [thread:$0]  (!%p3895_p11), %s5845_s3, 1024, %s206_s10, [#allocation8], %s5851_s17, %s5851_s17, %s5852_s24  }
  0x2d   : > { %s34_s7 = sadd.s32 1, %s3781_s22  ;;  %s41_s9 = sadd.s32 1, %s3773_s20 }
  0x2e   : > { %p36_p1 = scmp.ge.s32.totalorder %s34_s7, 2  ;;  %p48_p4 = scmp.ne.s32.totalorder %s3773_s20, %s3769_s19 }
  0x2f   : > { %p49_p6 = scmp.eq.s32.totalorder %s3785_s23, 0  ;;  %p3524_p12 = scmp.lt.s32.totalorder %s3785_s23, 2 }
  0x30   : > { %s6181_s7 = smov (%p36_p1, %s34_s7), 0  ;;  %p3930_p7 = por %p3870_p2, %p48_p4 }
  0x31   : > { %p50_p3 = por %p49_p6, %p48_p4  ;;  %s38_s11 = ssub.s32 %s3781_s22, %s6181_s7 }
  0x32   : > { %s222_s12 = sand.u32 1, %s3773_s20   ;;  %p39_p9 = scmp.eq.s32.totalorder %s38_s11, 0 }
  0x33   : > { %s3058_s10 = sshll.u32 %s222_s12, 7  ;;  %s3251_s13 = sshll.u32 %s3781_s22, 11 }
  0x34   : > { %s3939_s14 = scalar_select %p39_p9, %s3773_s20, %s41_s9  }
  0x35   : > { %s232_s25 = scalar_lea.hbm %s5842_s0, %s3251_s13  ;;  %s226_s6 = scalar_lea.vmem [#allocation4], %s3058_s10 }
  0x36   : > { %s233_s17 = sshll.u32 %s226_s6, 4  ;;  %p3946_p11 = pnand %p3524_p12, %p50_p3  ;;  %s234_s17 = int_to_ptr.vmem [resolvable:$true] %s233_s17 }
  0x37   : > { %s223_s24 = scalar_lea.sflag [#allocation5], %s222_s12  ;;  %s3682_s11 = scalar_lea.vmem %s234_s17, 2048 }
  0x38   : > { %p3671_p2 = pneg %p3946_p11  ;;  %p3683_p13 = scmp.ne.s32.totalorder %s234_s17, %s3682_s11 }
  0x39   : > { %s3797_s9 = smov [#allocation4]  }
  0x3a   : > { %p3685_p0 = pnand %p3683_p13, %p3671_p2  ;;  %s3687_s1 = sshll.u32 %s3797_s9, 4  ;;  %s3688_s1 = int_to_ptr.vmem [resolvable:$false] %s3687_s1 }
  0x3b   : > { %s3689_s13 = scalar_lea.vmem %s3688_s1, 4096  ;;  %p3690_p10 = scmp.lt.s32.totalorder %s234_s17, %s3688_s1 }
  0x3c   : > { %p3686_p5 = pneg %p3685_p0  ;;  %p3691_p1 = scmp.lt.s32.totalorder %s3689_s13, %s3682_s11 }
  0x3e   : > { %p3692_p4 = por %p3691_p1, %p3690_p10 }
  0x40   : > { %p3693_p6 = pnand %p3692_p4, %p3686_p5 }
  0x42   : > { %3696 = shalt.err (!%p3693_p6)
}
  0x43   : > { %s5959_s10 = smov 4   ;;  %s5960_s15 = smov 64  }
  0x44   : > { %3517 = dma.hbm_to_vmem [thread:$0]  (!%p3946_p11), %s232_s25, 2048, %s234_s17, %s223_s24, %s5960_s15, %s5960_s15, %s5959_s10  }
  0x45   : > { %245 = sbr.rel (%p3886_p8) target bundleno = 688 (0x2b0), region = 40 }
  0x4a   : > { %s3960_s12 = sand.u32 1, %s3769_s19   ;;  %p5961_p12 = scmp.ne.s32.totalorder %s5952_s28, 0 }
  0x4b   : > { %s3062_s1 = sshll.u32 %s3960_s12, 7  ;;  %s248_s16 = scalar_lea.sflag [#allocation5], %s3960_s12 }
  0x4c   : > { %s3966_s6 = scalar_lea.vmem [#allocation4], %s3062_s1 }
  0x4d   : > { %3752 = dma.done.wait (%p5961_p12), %s248_s16, 2048  }
  0x4e   : > { %3754 = vsyncadd (%p5961_p12), %s248_s16, 4294965248  ;;  %p5962_p3 = scmp.ne.s32.totalorder %s5950_s26, 0 }
  0x50   : > { %3756 = dma.done.wait (%p5962_p3), [#allocation8], 1120  }
  0x51   : > { %3758 = vsyncadd (%p5962_p3), [#allocation8], 4294966176  ;;  %v3798_v0 = vmov 0   ;;  %vm410_vm0 = vcmask 1040384   ;;  %vm411_vm1 = vcmask 1044484   ;;  %s4064_s30 = scalar_lea.vmem [#allocation10], %s3062_s1 }
  0x52   : > { %295 = vst [vmem:[#allocation2 + $0xc] sm:$0xf] %v3798_v0  ;;  %292 = vst [vmem:[#allocation2] sm:$0xf] %v3798_v0  ;;  %v3976_v1 = vld [vmem:[#allocation7] sm:$0x1] }
  0x53   : > { %293 = vst [vmem:[#allocation2 + $0x4] sm:$0xf] %v3798_v0  ;;  %294 = vst [vmem:[#allocation2 + $0x8] sm:$0x3] %v3798_v0  ;;  %v3978_v2 = vld [vmem:[#allocation7] sm:$0x2] }
  0x54   : > { %296 = vst [vmem:[#allocation2 + $0x10] sm:$0xf] %v3798_v0  ;;  %297 = vst [vmem:[#allocation2 + $0x14] sm:$0x3] %v3798_v0  ;;  %v3980_v3 = vld [vmem:[#allocation7 + $0x2] sm:$0x1] }
  0x55   : > { %298 = vst [vmem:[#allocation2 + $0x18] sm:$0xf] %v3798_v0  ;;  %299 = vst [vmem:[#allocation2 + $0x1c] sm:$0xf] %v3798_v0  ;;  %v3982_v4 = vld [vmem:[#allocation7 + $0x2] sm:$0x2] }
  0x56   : > { %300 = vst [vmem:[#allocation2 + $0x20] sm:$0x3] %v3798_v0  ;;  %301 = vst [vmem:[#allocation2 + $0x24] sm:$0xf] %v3798_v0  ;;  %v3984_v5 = vld [vmem:[#allocation7 + $0x4] sm:$0x1] }
  0x57   : > { %302 = vst [vmem:[#allocation2 + $0x28] sm:$0xf] %v3798_v0  ;;  %303 = vst [vmem:[#allocation2 + $0x2c] sm:$0x3] %v3798_v0  ;;  %v3986_v6 = vld [vmem:[#allocation7 + $0x4] sm:$0x2] }
  0x58   : > { %304 = vst [vmem:[#allocation2 + $0x30] sm:$0xf] %v3798_v0  ;;  %305 = vst [vmem:[#allocation2 + $0x34] sm:$0xf] %v3798_v0  ;;  %v3991_v7 = vld [vmem:[%s5844_s2] ss:$0 sm:$0xff] }
  0x59   : > { %306 = vst [vmem:[#allocation2 + $0x38] sm:$0x3] %v3798_v0  ;;  %307 = vst [vmem:[#allocation2 + $0x3c] sm:$0xf] %v3798_v0  ;;  %v346_v8 = vld [vmem:[%s3966_s6] sm:$0xf] }
  0x5a   : > { %308 = vst [vmem:[#allocation2 + $0x40] sm:$0xf] %v3798_v0  ;;  %309 = vst [vmem:[#allocation2 + $0x44] sm:$0x3] %v3798_v0  ;;  %v347_v9 = vld [vmem:[%s3966_s6 + $0x4] sm:$0xf] }
  0x5b   : > { %310 = vst [vmem:[#allocation2 + $0x48] sm:$0xf] %v3798_v0  ;;  %311 = vst [vmem:[#allocation2 + $0x4c] sm:$0xf] %v3798_v0  ;;  %v413_v10 = vrot.slane %v346_v8, 7  ;;  %v415_v11 = vrot.slane %v347_v9, 7 }
  0x5c   : > { %312 = vst [vmem:[#allocation2 + $0x50] sm:$0x3] %v3798_v0  ;;  %313 = vst [vmem:[#allocation2 + $0x54] sm:$0xf] %v3798_v0  ;;  %v348_v12 = vld [vmem:[%s3966_s6 + $0x8] sm:$0xf] }
  0x5d   : > { %314 = vst [vmem:[#allocation2 + $0x58] sm:$0xf] %v3798_v0  ;;  %315 = vst [vmem:[#allocation2 + $0x5c] sm:$0x3] %v3798_v0  ;;  %v349_v13 = vld [vmem:[%s3966_s6 + $0xc] sm:$0xf] }
  0x5e   : > { %316 = vst [vmem:[#allocation2 + $0x60] sm:$0xf] %v3798_v0  ;;  %317 = vst [vmem:[#allocation2 + $0x64] sm:$0xf] %v3798_v0  ;;  %v418_v15 = vrot.slane %v348_v12, 7  ;;  %v420_v16 = vrot.slane %v349_v13, 7 }
  0x5f   : > { %318 = vst [vmem:[#allocation2 + $0x68] sm:$0x3] %v3798_v0  ;;  %319 = vst [vmem:[#allocation2 + $0x6c] sm:$0xf] %v3798_v0  ;;  %v350_v17 = vld [vmem:[%s3966_s6 + $0x10] sm:$0xf] }
  0x60   : > { %320 = vst [vmem:[#allocation2 + $0x70] sm:$0xf] %v3798_v0  ;;  %321 = vst [vmem:[#allocation2 + $0x74] sm:$0x3] %v3798_v0  ;;  %v351_v18 = vld [vmem:[%s3966_s6 + $0x14] sm:$0xf] }
  0x61   : > { %322 = vst [vmem:[#allocation2 + $0x78] sm:$0xf] %v3798_v0  ;;  %323 = vst [vmem:[#allocation2 + $0x7c] sm:$0xf] %v3798_v0  ;;  %v414_v19 = vrot.slane %v413_v10, 4  ;;  %v417_v20 = vrot.slane %v415_v11, 4 }
  0x62   : > { %324 = vst [vmem:[#allocation2 + $0x80] sm:$0x3] %v3798_v0  ;;  %325 = vst [vmem:[#allocation2 + $0x84] sm:$0xf] %v3798_v0  ;;  %v423_v21 = vrot.slane %v350_v17, 7  ;;  %v425_v22 = vrot.slane %v351_v18, 7 }
  0x63   : > { %326 = vst [vmem:[#allocation2 + $0x88] sm:$0xf] %v3798_v0  ;;  %327 = vst [vmem:[#allocation2 + $0x8c] sm:$0x3] %v3798_v0  ;;  %v352_v23 = vld [vmem:[%s3966_s6 + $0x18] sm:$0xf] }
  0x64   : > { %328 = vst [vmem:[#allocation2 + $0x90] sm:$0xf] %v3798_v0  ;;  %329 = vst [vmem:[#allocation2 + $0x94] sm:$0xf] %v3798_v0  ;;  %v419_v24 = vrot.slane %v418_v15, 4  ;;  %v422_v25 = vrot.slane %v420_v16, 4 }
  0x65   : > { %330 = vst [vmem:[#allocation2 + $0x98] sm:$0x3] %v3798_v0  ;;  %331 = vst [vmem:[#allocation2 + $0x9c] sm:$0xf] %v3798_v0  ;;  %v428_v26 = vrot.slane %v352_v23, 7  ;;  %v424_v29 = vrot.slane %v423_v21, 4 }
  0x66   : > { %332 = vst [vmem:[#allocation2 + $0xa0] sm:$0xf] %v3798_v0  ;;  %333 = vst [vmem:[#allocation2 + $0xa4] sm:$0x3] %v3798_v0  ;;  %v353_v27 = vld [vmem:[%s3966_s6 + $0x1c] sm:$0xf] }
  0x67   : > { %334 = vst [vmem:[#allocation2 + $0xa8] sm:$0xf] %v3798_v0  ;;  %335 = vst [vmem:[#allocation2 + $0xac] sm:$0xf] %v3798_v0  ;;  %v427_v30 = vrot.slane %v425_v22, 4  ;;  %v430_v31 = vrot.slane %v353_v27, 7 }
  0x68   : > { %336 = vst [vmem:[#allocation2 + $0xb0] sm:$0x3] %v3798_v0  ;;  %337 = vst [vmem:[#allocation2 + $0xb4] sm:$0xf] %v3798_v0  ;;  %v354_v32 = vld [vmem:[%s3966_s6 + $0x20] sm:$0xf] }
  0x69   : > { %338 = vst [vmem:[#allocation2 + $0xb8] sm:$0xf] %v3798_v0  ;;  %339 = vst [vmem:[#allocation2 + $0xbc] sm:$0x3] %v3798_v0  ;;  %v429_v34 = vrot.slane %v428_v26, 4  ;;  %v433_v35 = vrot.slane %v354_v32, 7 }
  0x6a   : > { %340 = vst [vmem:[#allocation2 + $0xc0] sm:$0xf] %v3798_v0  ;;  %341 = vst [vmem:[#allocation2 + $0xc4] sm:$0xf] %v3798_v0  ;;  %v355_v36 = vld [vmem:[%s3966_s6 + $0x24] sm:$0xf] }
  0x6b   : > { %342 = vst [vmem:[#allocation2 + $0xc8] sm:$0x3] %v3798_v0  ;;  %343 = vst [vmem:[#allocation2 + $0xcc] sm:$0xf] %v3798_v0  ;;  %v356_v37 = vld [vmem:[%s3966_s6 + $0x28] sm:$0xf] }
  0x6c   : > { %344 = vst [vmem:[#allocation2 + $0xd0] sm:$0xf] %v3798_v0  ;;  %345 = vst [vmem:[#allocation2 + $0xd4] sm:$0x3] %v3798_v0  ;;  %v432_v39 = vrot.slane %v430_v31, 4  ;;  %v435_v40 = vrot.slane %v355_v36, 7 }
  0x6d   : > { %5963 = vst [vmem:[#allocation14_spill] sm:$0xff] %v3976_v1  ;;  %5964 = vst [vmem:[#allocation15_spill] sm:$0xff] %v3978_v2  ;;  %v438_v41 = vrot.slane %v356_v37, 7  ;;  %v357_v42 = vld [vmem:[%s3966_s6 + $0x2c] sm:$0xf]  ;;  %v434_v44 = vrot.slane %v433_v35, 4 }
  0x6e   : > { %5965 = vst [vmem:[#allocation16_spill] sm:$0xff] %v3980_v3  ;;  %5966 = vst [vmem:[#allocation17_spill] sm:$0xff] %v3982_v4  ;;  %v440_v45 = vrot.slane %v357_v42, 7  ;;  %v358_v46 = vld [vmem:[%s3966_s6 + $0x30] sm:$0xf]  ;;  %v437_v48 = vrot.slane %v435_v40, 4 }
  0x6f   : > { %5967 = vst [vmem:[#allocation18_spill] sm:$0xff] %v3984_v5  ;;  %5968 = vst [vmem:[#allocation19_spill] sm:$0xff] %v3986_v6  ;;  %v359_v47 = vld [vmem:[%s3966_s6 + $0x34] sm:$0xf]  ;;  %v439_v49 = vrot.slane %v438_v41, 4  ;;  %v443_v50 = vrot.slane %v358_v46, 7 }
  0x70   : > { %5969 = vst [vmem:[#allocation20_spill] sm:$0xff] %v3991_v7  ;;  %vm3998_vm2 = vmor %vm410_vm0, %vm411_vm1  ;;  %v445_v51 = vrot.slane %v359_v47, 7  ;;  %v360_v52 = vld [vmem:[%s3966_s6 + $0x38] sm:$0xf]  ;;  %v442_v54 = vrot.slane %v440_v45, 4  ;;  %s4066_s17 = smov 0  }
  0x71   : > { %542 = vst [vmem:[#allocation2 + $0xc] sm:$0xe] %v413_v10  ;;  %545 = vst [vmem:[#allocation2 + $0x18] sm:$0xe] %v418_v15  ;;  %v416_v28 = vsel %vm3998_vm2, %v414_v19, %v415_v11  ;;  %v421_v33 = vsel %vm3998_vm2, %v419_v24, %v420_v16  ;;  %v426_v38 = vsel %vm3998_vm2, %v424_v29, %v425_v22  ;;  %v448_v55 = vrot.slane %v360_v52, 7 }
  0x72   : > { %544 = vst [vmem:[#allocation2 + $0x14] sm:$0x1] %v417_v20  ;;  %548 = vst [vmem:[#allocation2 + $0x24] sm:$0xe] %v423_v21  ;;  %v431_v43 = vsel %vm3998_vm2, %v429_v34, %v430_v31  ;;  %v436_v53 = vsel %vm3998_vm2, %v434_v44, %v435_v40  ;;  %v361_v56 = vld [vmem:[%s3966_s6 + $0x3c] sm:$0xf]  ;;  %v441_v58 = vsel %vm3998_vm2, %v439_v49, %v440_v45 }
  0x73   : > { %543 = vst [vmem:[#allocation2 + $0x10] sm:$0xf] %v416_v28  ;;  %547 = vst [vmem:[#allocation2 + $0x20] sm:$0x1] %v422_v25  ;;  %v362_v57 = vld [vmem:[%s3966_s6 + $0x40] sm:$0xf] }
  0x74   : > { %551 = vst [vmem:[#allocation2 + $0x30] sm:$0xe] %v428_v26  ;;  %546 = vst [vmem:[#allocation2 + $0x1c] sm:$0xf] %v421_v33  ;;  %v444_v59 = vrot.slane %v443_v50, 4  ;;  %v447_v60 = vrot.slane %v445_v51, 4 }
  0x75   : > { %550 = vst [vmem:[#allocation2 + $0x2c] sm:$0x1] %v427_v30  ;;  %549 = vst [vmem:[#allocation2 + $0x28] sm:$0xf] %v426_v38  ;;  %v450_v61 = vrot.slane %v361_v56, 7  ;;  %v449_v63 = vrot.slane %v448_v55, 4 }
  0x76   : > { %554 = vst [vmem:[#allocation2 + $0x3c] sm:$0xe] %v433_v35  ;;  %552 = vst [vmem:[#allocation2 + $0x34] sm:$0xf] %v431_v43  ;;  %v363_v62 = vld [vmem:[%s3966_s6 + $0x44] sm:$0xf]  ;;  %v446_v10 = vsel %vm3998_vm2, %v444_v59, %v445_v51 }
  0x77   : > { %553 = vst [vmem:[#allocation2 + $0x38] sm:$0x1] %v432_v39  ;;  %557 = vst [vmem:[#allocation2 + $0x48] sm:$0xe] %v438_v41  ;;  %v453_v0 = vrot.slane %v362_v57, 7  ;;  %v455_v8 = vrot.slane %v363_v62, 7  ;;  %v451_v16 = vsel %vm3998_vm2, %v449_v63, %v450_v61 }
  0x78   : > { %555 = vst [vmem:[#allocation2 + $0x40] sm:$0xf] %v436_v53  ;;  %556 = vst [vmem:[#allocation2 + $0x44] sm:$0x1] %v437_v48  ;;  %v364_v9 = vld [vmem:[%s3966_s6 + $0x48] sm:$0xf] }
  0x79   : > { %560 = vst [vmem:[#allocation2 + $0x54] sm:$0xe] %v443_v50  ;;  %558 = vst [vmem:[#allocation2 + $0x4c] sm:$0xf] %v441_v58  ;;  %v452_v11 = vrot.slane %v450_v61, 4  ;;  %v458_v12 = vrot.slane %v364_v9, 7 }
  0x7a   : > { %559 = vst [vmem:[#allocation2 + $0x50] sm:$0x1] %v442_v54  ;;  %563 = vst [vmem:[#allocation2 + $0x60] sm:$0xe] %v448_v55  ;;  %v365_v13 = vld [vmem:[%s3966_s6 + $0x4c] sm:$0xf] }
  0x7b   : > { %562 = vst [vmem:[#allocation2 + $0x5c] sm:$0x1] %v447_v60  ;;  %v366_v15 = vld [vmem:[%s3966_s6 + $0x50] sm:$0xf]  ;;  %561 = vst [vmem:[#allocation2 + $0x58] sm:$0xf] %v446_v10 }
  0x7c   : > { %v454_v17 = vrot.slane %v453_v0, 4  ;;  %566 = vst [vmem:[#allocation2 + $0x6c] sm:$0xe] %v453_v0  ;;  %v457_v18 = vrot.slane %v455_v8, 4  ;;  %v460_v19 = vrot.slane %v365_v13, 7  ;;  %v459_v21 = vrot.slane %v458_v12, 4 }
  0x7d   : > { %v367_v20 = vld [vmem:[%s3966_s6 + $0x54] sm:$0xf]  ;;  %564 = vst [vmem:[#allocation2 + $0x64] sm:$0xf] %v451_v16  ;;  %565 = vst [vmem:[#allocation2 + $0x68] sm:$0x1] %v452_v11 }
  0x7e   : > { %569 = vst [vmem:[#allocation2 + $0x78] sm:$0xe] %v458_v12  ;;  %v463_v22 = vrot.slane %v366_v15, 7  ;;  %v465_v23 = vrot.slane %v367_v20, 7  ;;  %v368_v24 = vld [vmem:[%s3966_s6 + $0x58] sm:$0xf]  ;;  %v456_v25 = vsel %vm3998_vm2, %v454_v17, %v455_v8  ;;  %v461_v30 = vsel %vm3998_vm2, %v459_v21, %v460_v19 }
  0x7f   : > { %568 = vst [vmem:[#allocation2 + $0x74] sm:$0x1] %v457_v18  ;;  %v462_v26 = vrot.slane %v460_v19, 4  ;;  %v468_v27 = vrot.slane %v368_v24, 7  ;;  %v369_v28 = vld [vmem:[%s3966_s6 + $0x5c] sm:$0xf] }
  0x80   : > { %v370_v29 = vld [vmem:[%s3966_s6 + $0x60] sm:$0xf]  ;;  %567 = vst [vmem:[#allocation2 + $0x70] sm:$0xf] %v456_v25  ;;  %v464_v31 = vrot.slane %v463_v22, 4  ;;  %v467_v32 = vrot.slane %v465_v23, 4 }
  0x81   : > { %572 = vst [vmem:[#allocation2 + $0x84] sm:$0xe] %v463_v22  ;;  %v470_v33 = vrot.slane %v369_v28, 7  ;;  %v371_v34 = vld [vmem:[%s3966_s6 + $0x64] sm:$0xf]  ;;  %v469_v35 = vrot.slane %v468_v27, 4 }
  0x82   : > { %570 = vst [vmem:[#allocation2 + $0x7c] sm:$0xf] %v461_v30  ;;  %571 = vst [vmem:[#allocation2 + $0x80] sm:$0x1] %v462_v26  ;;  %v473_v36 = vrot.slane %v370_v29, 7  ;;  %v475_v37 = vrot.slane %v371_v34, 7  ;;  %v466_v39 = vsel %vm3998_vm2, %v464_v31, %v465_v23 }
  0x83   : > { %575 = vst [vmem:[#allocation2 + $0x90] sm:$0xe] %v468_v27  ;;  %v372_v38 = vld [vmem:[%s3966_s6 + $0x68] sm:$0xf]  ;;  %574 = vst [vmem:[#allocation2 + $0x8c] sm:$0x1] %v467_v32  ;;  %v471_v44 = vsel %vm3998_vm2, %v469_v35, %v470_v33 }
  0x84   : > { %v472_v40 = vrot.slane %v470_v33, 4  ;;  %v478_v41 = vrot.slane %v372_v38, 7  ;;  %v373_v42 = vld [vmem:[%s3966_s6 + $0x6c] sm:$0xf]  ;;  %v374_v43 = vld [vmem:[%s3966_s6 + $0x70] sm:$0xf] }
  0x85   : > { %573 = vst [vmem:[#allocation2 + $0x88] sm:$0xf] %v466_v39  ;;  %v474_v45 = vrot.slane %v473_v36, 4  ;;  %578 = vst [vmem:[#allocation2 + $0x9c] sm:$0xe] %v473_v36  ;;  %v477_v46 = vrot.slane %v475_v37, 4 }
  0x86   : > { %v480_v47 = vrot.slane %v373_v42, 7  ;;  %v375_v48 = vld [vmem:[%s3966_s6 + $0x74] sm:$0xf]  ;;  %576 = vst [vmem:[#allocation2 + $0x94] sm:$0xf] %v471_v44  ;;  %v479_v49 = vrot.slane %v478_v41, 4 }
  0x87   : > { %577 = vst [vmem:[#allocation2 + $0x98] sm:$0x1] %v472_v40  ;;  %581 = vst [vmem:[#allocation2 + $0xa8] sm:$0xe] %v478_v41  ;;  %v483_v50 = vrot.slane %v374_v43, 7  ;;  %v485_v51 = vrot.slane %v375_v48, 7  ;;  %v476_v53 = vsel %vm3998_vm2, %v474_v45, %v475_v37 }
  0x88   : > { %v376_v52 = vld [vmem:[%s3966_s6 + $0x78] sm:$0xf]  ;;  %580 = vst [vmem:[#allocation2 + $0xa4] sm:$0x1] %v477_v46  ;;  %v482_v54 = vrot.slane %v480_v47, 4  ;;  %v481_v57 = vsel %vm3998_vm2, %v479_v49, %v480_v47 }
  0x89   : > { %v488_v55 = vrot.slane %v376_v52, 7  ;;  %v377_v56 = vld [vmem:[%s3966_s6 + $0x7c] sm:$0xf]  ;;  %579 = vst [vmem:[#allocation2 + $0xa0] sm:$0xf] %v476_v53  ;;  %v484_v58 = vrot.slane %v483_v50, 4 }
  0x8a   : > { %584 = vst [vmem:[#allocation2 + $0xb4] sm:$0xe] %v483_v50  ;;  %v487_v59 = vrot.slane %v485_v51, 4  ;;  %v490_v60 = vrot.slane %v377_v56, 7  ;;  %582 = vst [vmem:[#allocation2 + $0xac] sm:$0xf] %v481_v57 }
  0x8b   : > { %583 = vst [vmem:[#allocation2 + $0xb0] sm:$0x1] %v482_v54  ;;  %v489_v61 = vrot.slane %v488_v55, 4  ;;  %587 = vst [vmem:[#allocation2 + $0xc0] sm:$0xe] %v488_v55  ;;  %v486_v62 = vsel %vm3998_vm2, %v484_v58, %v485_v51 }
  0x8c   : > { %586 = vst [vmem:[#allocation2 + $0xbc] sm:$0x1] %v487_v59  ;;  %v492_v63 = vrot.slane %v490_v60, 4  ;;  %585 = vst [vmem:[#allocation2 + $0xb8] sm:$0xf] %v486_v62 }
  0x8d   : > { %v491_v0 = vsel %vm3998_vm2, %v489_v61, %v490_v60 }
  0x8e   : > { %588 = vst [vmem:[#allocation2 + $0xc4] sm:$0xf] %v491_v0  ;;  %589 = vst [vmem:[#allocation2 + $0xc8] sm:$0x1] %v492_v63 }
  0x8f LB: >> { %v5972_v3 = vld [vmem:[#allocation16_spill] sm:$0xff]  ;;  %v5973_v1 = vld [vmem:[#allocation14_spill] sm:$0xff]  ;;  %v638_v8 = vlaneseq  ;;  %s3252_s24 = smul.u32 96, %s3789_s17  ;;  %v5975_v2 = vld [vmem:[#allocation15_spill] sm:$0xff]  ;;  %vm785_vm3 = vcmask 1046528   ;;  %vm965_vm4 = vcmask 1045504   ;;  %s3789_s17 = sphi %s4066_s17, %s605_s17  }
  0x90   : >> { %v702_v9 = vshrl.u32 %v5973_v1, 16  ;;  %v1173_v10 = vshrl.u32 %v5972_v3, 16  ;;  %v636_v14 = vpack.i.b16 %v5973_v1, %v5973_v1  ;;  %v883_v15 = vpack.i.b16 %v5975_v2, %v5975_v2  ;;  %v5977_v4 = vld [vmem:[#allocation17_spill] sm:$0xff]  ;;  %s3278_s27 = sshll.u32 %s3789_s17, 6  ;;  %s605_s17 = sadd.s32 1, %s3789_s17  }
  0x91   : >> { %v639_v11 = vshrl.u32 %v638_v8, 7  ;;  %v1083_v17 = vpack.i.b16 %v5972_v3, %v5972_v3  ;;  %v1353_v19 = vpack.i.b16 %v5977_v4, %v5977_v4  ;;  %s4094_s25 = scalar_lea.vmem [#allocation2], %s3252_s24  ;;  %vm2126_vm5 = vsmask.f32 3328  ;;  %s5662_s11 = scalar_lea.vmem [#allocation3], %s3278_s27 }
  0x92   : >> { %v703_v13 = vpack.i.b16 %v702_v9, %v702_v9  ;;  %v1174_v18 = vpack.i.b16 %v1173_v10, %v1173_v10  ;;  %vm2127_vm6 = vsmask.f32 7440  ;;  %p602_p8 = scmp.ge.s32.totalorder %s605_s17, 2  }
  0x93   : >> { %v4076_v12 = vsub.s32 0, %v639_v11  ;;  %v4080_v16 = vsub.s32 1, %v639_v11  ;;  %vm5651_vm7 = vmor %vm2126_vm5, %vm2127_vm6  ;;  %s3311_s10 = sshll.u32 (%p602_p8), %s3777_s21, 11  ;;  %s2925_s15 = sshll.u32 (%p602_p8), %s4064_s30, 4  ;;  %s5790_s15 = int_to_ptr.vmem [resolvable:$true] %s2925_s15 }
  0x94   : > { %s5788_s6 = scalar_lea.hbm (%p602_p8), %s5847_s5, %s3311_s10  ;;  %s2909_s21 = scalar_lea.sflag (%p602_p8), [#allocation6], %s3960_s12 }
  0x95   : >> { %5974 = vst [vmem:[#allocation21_spill] sm:$0xff] %v4076_v12  ;;  %5976 = vst [vmem:[#allocation22_spill] sm:$0xff] %v4080_v16  ;;  %v641_v20 = vrot.slane %v636_v14, %v4076_v12  ;;  %v708_v21 = vrot.slane %v703_v13, %v4076_v12  ;;  %v888_v22 = vrot.slane %v883_v15, %v4080_v16  ;;  %v611_v27 = vld [vmem:[%s4094_s25] sm:$0xf]  ;;  %v4098_v28 = vld [vmem:[%s4094_s25 + $0x4] sm:$0xf] }
  0x96   : >> { %v1088_v24 = vrot.slane %v1083_v17, %v4076_v12  ;;  %v1179_v25 = vrot.slane %v1174_v18, %v4076_v12  ;;  %v1358_v26 = vrot.slane %v1353_v19, %v4080_v16  ;;  %5978 = vst [vmem:[#allocation23_spill] sm:$0xff] %v4098_v28  ;;  %v4101_v29 = vld [vmem:[%s4094_s25 + $0x8] sm:$0x1]  ;;  %v614_v30 = vld [vmem:[%s4094_s25 + $0xc] sm:$0xf]  ;;  %s3697_s26 = scalar_lea.vmem (%p602_p8), %s5790_s15, 2048 }
  0x97   : >> { %v4089_v23 = vcombine.low %v641_v20, %v641_v20  ;;  %v4105_v31 = vld [vmem:[%s4094_s25 + $0x10] sm:$0xf]  ;;  %v4108_v32 = vld [vmem:[%s4094_s25 + $0x14] sm:$0x1]  ;;  %v617_v33 = vld [vmem:[%s4094_s25 + $0x18] sm:$0xf]  ;;  %v4111_v34 = vcombine.low %v708_v21, %v708_v21  ;;  %v4113_v35 = vcombine.low %v888_v22, %v888_v22  ;;  %p3698_p9 = scmp.ne.s32.totalorder (%p602_p8), %s5790_s15, %s3697_s26 }
  0x98   : >> { %5979 = vst [vmem:[#allocation24_spill] sm:$0xff] %v4105_v31  ;;  %v4116_v36 = vld [vmem:[%s4094_s25 + $0x1c] sm:$0xf]  ;;  %v620_v37 = vld [vmem:[%s4094_s25 + $0x24] sm:$0xf]  ;;  %v4121_v40 = vcombine.low %v1088_v24, %v1088_v24  ;;  %v4123_v41 = vcombine.low %v1179_v25, %v1179_v25  ;;  %v4125_v42 = vcombine.low %v1358_v26, %v1358_v26  ;;  %s3799_s28 = smov (%p602_p8), [#allocation10]  }
  0x99   : >> { %5980 = vst [vmem:[#allocation25_spill] sm:$0xff] %v4113_v35  ;;  %5981 = vst [vmem:[#allocation26_spill] sm:$0xff] %v4116_v36  ;;  %v623_v38 = vld [vmem:[%s4094_s25 + $0x30] sm:$0xf]  ;;  %v646_v39 = vmul.bf16 %v4089_v23, %v611_v27  ;;  %v4128_v43 = vld [vmem:[%s4094_s25 + $0x20] sm:$0x1]  ;;  %v647_v46 = vmul.bf16 %v4089_v23, %v4098_v28  ;;  %v648_v47 = vmul.bf16 %v4089_v23, %v4101_v29  ;;  %p3699_p11 = pnand (%p602_p8), %p3698_p9, %p3930_p7 }
  0x9a   : >> { %5982 = vst [vmem:[#allocation27_spill] sm:$0xff] %v4121_v40  ;;  %5983 = vst [vmem:[#allocation28_spill] sm:$0xff] %v4123_v41  ;;  %v4131_v44 = vld [vmem:[%s4094_s25 + $0x28] sm:$0xf]  ;;  %v626_v45 = vld [vmem:[%s4094_s25 + $0x3c] sm:$0xf]  ;;  %v649_v48 = vmul.bf16 %v4089_v23, %v614_v30  ;;  %v650_v49 = vmul.bf16 %v4089_v23, %v4105_v31  ;;  %v651_v53 = vmul.bf16 %v4089_v23, %v4108_v32 }
  0x9b   : >> { %5984 = vst [vmem:[#allocation29_spill] sm:$0xff] %v4125_v42  ;;  %5985 = vst [vmem:[#allocation30_spill] sm:$0xff] %v4131_v44  ;;  %v4142_v50 = vld [vmem:[%s4094_s25 + $0x2c] sm:$0x1]  ;;  %v4145_v51 = vld [vmem:[%s4094_s25 + $0x34] sm:$0xf]  ;;  %v652_v54 = vmul.bf16 %v4089_v23, %v617_v33  ;;  %v653_v55 = vmul.bf16 %v4089_v23, %v4116_v36  ;;  %v654_v56 = vmul.bf16 %v4089_v23, %v4128_v43  ;;  %v4202_v26 = vunpack.c.l.bf16 %v646_v39  ;;  %p3700_p2 = pneg (%p602_p8), %p3699_p11 }
  0x9c   : >> { %5986 = vst [vmem:[#allocation31_spill] sm:$0xff] %v4145_v51  ;;  %v629_v52 = vld [vmem:[%s4094_s25 + $0x48] sm:$0xf]  ;;  %v4156_v57 = vld [vmem:[%s4094_s25 + $0x38] sm:$0x1]  ;;  %v655_v60 = vmul.bf16 %v4089_v23, %v620_v37  ;;  %v656_v61 = vmul.bf16 %v4089_v23, %v4131_v44  ;;  %v657_v62 = vmul.bf16 %v4089_v23, %v4142_v50  ;;  %v658_v63 = vmul.bf16 %v4089_v23, %v623_v38  ;;  %s3701_s17 = sshll.u32 (%p602_p8), %s3799_s28, 4  ;;  %s3702_s17 = int_to_ptr.vmem [resolvable:$false] %s3701_s17 }
  0x9d   : >> { %v4159_v58 = vld [vmem:[%s4094_s25 + $0x40] sm:$0xf]  ;;  %v632_v59 = vld [vmem:[%s4094_s25 + $0x54] sm:$0xf]  ;;  %v4169_v0 = vld [vmem:[%s4094_s25 + $0x44] sm:$0x1]  ;;  %v659_v10 = vmul.bf16 %v4089_v23, %v4145_v51  ;;  %v660_v14 = vmul.bf16 %v4089_v23, %v4156_v57  ;;  %v661_v11 = vmul.bf16 %v4089_v23, %v626_v45  ;;  %v664_v19 = vmul.bf16 %v4089_v23, %v629_v52  ;;  %p3704_p13 = scmp.lt.s32.totalorder (%p602_p8), %s5790_s15, %s3702_s17 }
  0x9e   : >> { %5987 = vst [vmem:[#allocation32_spill] sm:$0xff] %v4159_v58  ;;  %v4172_v8 = vld [vmem:[%s4094_s25 + $0x4c] sm:$0xf]  ;;  %v4175_v9 = vld [vmem:[%s4094_s25 + $0x50] sm:$0x1]  ;;  %v662_v13 = vmul.bf16 %v4089_v23, %v4159_v58  ;;  %v663_v18 = vmul.bf16 %v4089_v23, %v4169_v0  ;;  %v667_v22 = vmul.bf16 %v4089_v23, %v632_v59  ;;  %v4204_v27 = vunpack.c.l.bf16 %v647_v46  ;;  %s3703_s24 = scalar_lea.vmem (%p602_p8), %s3702_s17, 4096 }
  0x9f   : >> { %5988 = vst [vmem:[#allocation33_spill] sm:$0xff] %v4172_v8  ;;  %v4185_v15 = vld [vmem:[%s4094_s25 + $0x58] sm:$0xf]  ;;  %v4188_v17 = vld [vmem:[%s4094_s25 + $0x5c] sm:$0x1]  ;;  %v665_v20 = vmul.bf16 %v4089_v23, %v4172_v8  ;;  %v666_v21 = vmul.bf16 %v4089_v23, %v4175_v9  ;;  %v4206_v30 = vunpack.c.l.bf16 %v648_v47  ;;  %v4208_v33 = vunpack.c.l.bf16 %v649_v48  ;;  %p3705_p0 = scmp.lt.s32.totalorder (%p602_p8), %s3703_s24, %s3697_s26 }
  0xa0   : >> { %5989 = vst [vmem:[#allocation34_spill] sm:$0xff] %v4185_v15  ;;  %v668_v24 = vmul.bf16 %v4089_v23, %v4185_v15  ;;  %v669_v25 = vmul.bf16 %v4089_v23, %v4188_v17  ;;  %v4210_v37 = vunpack.c.l.bf16 %v650_v49  ;;  %v4212_v38 = vunpack.c.l.bf16 %v651_v53  ;;  %v4229_v48 = vld [vmem:[%s4094_s25] sm:$0xe]  ;;  %v4279_v2 = vld [vmem:[%s4094_s25 + $0x48] sm:$0xe] }
  0xa1   : >> { %v4214_v45 = vunpack.c.l.bf16 %v652_v54  ;;  %v4216_v52 = vunpack.c.l.bf16 %v653_v55  ;;  %v4218_v59 = vunpack.c.l.bf16 %v654_v56  ;;  %v4220_v23 = vunpack.c.l.bf16 %v655_v60  ;;  %5990 = vst [vmem:[#allocation35_spill] sm:$0xff] %v4229_v48  ;;  %v4240_v56 = vld [vmem:[%s4094_s25 + $0xc] sm:$0xe]  ;;  %5996 = vst [vmem:[#allocation41_spill] sm:$0xff] %v4279_v2  ;;  %v4290_v16 = vld [vmem:[%s4094_s25 + $0x54] sm:$0xe]  ;;  %p3706_p5 = por (%p602_p8), %p3705_p0, %p3704_p13 }
  0xa2   : >> { %v4222_v39 = vunpack.c.l.bf16 %v656_v61  ;;  %v4224_v46 = vunpack.c.l.bf16 %v657_v62  ;;  %v4226_v47 = vunpack.c.l.bf16 %v658_v63  ;;  %v4231_v49 = vunpack.c.l.bf16 %v659_v10  ;;  %5991 = vst [vmem:[#allocation36_spill] sm:$0xff] %v4240_v56  ;;  %v4251_v10 = vld [vmem:[%s4094_s25 + $0x18] sm:$0xe]  ;;  %5997 = vst [vmem:[#allocation42_spill] sm:$0xff] %v4290_v16 }
  0xa3   : >> { %v4233_v53 = vunpack.c.l.bf16 %v660_v14  ;;  %v4235_v54 = vunpack.c.l.bf16 %v661_v11  ;;  %v4237_v55 = vunpack.c.l.bf16 %v662_v13  ;;  %v4242_v60 = vunpack.c.l.bf16 %v663_v18  ;;  %5992 = vst [vmem:[#allocation37_spill] sm:$0xff] %v4251_v10  ;;  %v4260_v13 = vld [vmem:[%s4094_s25 + $0x24] sm:$0xe]  ;;  %v4263_v18 = vld [vmem:[%s4094_s25 + $0x30] sm:$0xe]  ;;  %p3707_p10 = pnand (%p602_p8), %p3706_p5, %p3700_p2 }
  0xa4   : >> { %v4244_v61 = vunpack.c.l.bf16 %v664_v19  ;;  %v4246_v62 = vunpack.c.l.bf16 %v665_v20  ;;  %v4248_v63 = vunpack.c.l.bf16 %v666_v21  ;;  %v4253_v1 = vunpack.c.l.bf16 %v667_v22  ;;  %5993 = vst [vmem:[#allocation38_spill] sm:$0xff] %v4260_v13  ;;  %5994 = vst [vmem:[#allocation39_spill] sm:$0xff] %v4263_v18  ;;  %v4268_v20 = vld [vmem:[%s4094_s25 + $0x3c] sm:$0xe] }
  0xa5   : >> { %v4255_v14 = vunpack.c.l.bf16 %v668_v24  ;;  %v4257_v11 = vunpack.c.l.bf16 %v669_v25  ;;  %v713_v19 = vmul.bf16 %v4111_v34, %v4229_v48  ;;  %5995 = vst [vmem:[#allocation40_spill] sm:$0xff] %v4268_v20  ;;  %v714_v21 = vmul.bf16 %v4111_v34, %v4098_v28 }
  0xa6   : >> { %v715_v22 = vmul.bf16 %v4111_v34, %v4101_v29  ;;  %v716_v24 = vmul.bf16 %v4111_v34, %v4240_v56  ;;  %v717_v25 = vmul.bf16 %v4111_v34, %v4105_v31  ;;  %v718_v3 = vmul.bf16 %v4111_v34, %v4108_v32 }
  0xa7   : >> { %v719_v4 = vmul.bf16 %v4111_v34, %v4251_v10  ;;  %v720_v7 = vmul.bf16 %v4111_v34, %v4116_v36  ;;  %v721_v29 = vmul.bf16 %v4111_v34, %v4128_v43  ;;  %v722_v12 = vmul.bf16 %v4111_v34, %v4260_v13 }
  0xa8   : >> { %v723_v6 = vmul.bf16 %v4111_v34, %v4131_v44  ;;  %v724_v32 = vmul.bf16 %v4111_v34, %v4142_v50  ;;  %v725_v5 = vmul.bf16 %v4111_v34, %v4263_v18  ;;  %v726_v42 = vmul.bf16 %v4111_v34, %v4145_v51 }
  0xa9   : >> { %v727_v43 = vmul.bf16 %v4111_v34, %v4156_v57  ;;  %v728_v41 = vmul.bf16 %v4111_v34, %v4268_v20  ;;  %v729_v40 = vmul.bf16 %v4111_v34, %v4159_v58  ;;  %v730_v44 = vmul.bf16 %v4111_v34, %v4169_v0 }
  0xaa   : >> { %v731_v50 = vmul.bf16 %v4111_v34, %v4279_v2  ;;  %v732_v18 = vmul.bf16 %v4111_v34, %v4172_v8  ;;  %v733_v51 = vmul.bf16 %v4111_v34, %v4175_v9  ;;  %v734_v57 = vmul.bf16 %v4111_v34, %v4290_v16 }
  0xab   : >> { %v735_v20 = vmul.bf16 %v4111_v34, %v4185_v15  ;;  %v737_v13 = vunpack.c.l.bf16 %v713_v19  ;;  %v738_v58 = vunpack.c.l.bf16 %v714_v21  ;;  %v736_v0 = vmul.bf16 %v4111_v34, %v4188_v17 }
  0xac   : >> { %v4322_v36 = vunpack.c.l.bf16 %v715_v22  ;;  %v740_v2 = vunpack.c.l.bf16 %v716_v24  ;;  %v741_v10 = vunpack.c.l.bf16 %v717_v25  ;;  %v4324_v31 = vunpack.c.l.bf16 %v718_v3 }
  0xad   : >> { %v743_v8 = vunpack.c.l.bf16 %v719_v4  ;;  %v744_v56 = vunpack.c.l.bf16 %v720_v7  ;;  %v4326_v9 = vunpack.c.l.bf16 %v721_v29  ;;  %v746_v28 = vunpack.c.l.bf16 %v722_v12 }
  0xae   : >> { %v747_v16 = vunpack.c.l.bf16 %v723_v6  ;;  %v4328_v35 = vunpack.c.l.bf16 %v724_v32  ;;  %v749_v15 = vunpack.c.l.bf16 %v725_v5  ;;  %v750_v19 = vunpack.c.l.bf16 %v726_v42 }
  0xaf   : >> { %v4330_v21 = vunpack.c.l.bf16 %v727_v43  ;;  %v786_v48 = vrot.slane %v737_v13, 1  ;;  %v787_v34 = vrot.slane %v738_v58, 1  ;;  %v752_v17 = vunpack.c.l.bf16 %v728_v41 }
  0xb0   : >> { %v753_v22 = vunpack.c.l.bf16 %v729_v40  ;;  %v4332_v24 = vunpack.c.l.bf16 %v730_v44  ;;  %v755_v3 = vunpack.c.l.bf16 %v731_v50  ;;  %v756_v25 = vunpack.c.l.bf16 %v732_v18 }
  0xb1   : >> { %v4334_v4 = vunpack.c.l.bf16 %v733_v51  ;;  %v758_v7 = vunpack.c.l.bf16 %v734_v57  ;;  %v759_v29 = vunpack.c.l.bf16 %v735_v20  ;;  %v4336_v12 = vunpack.c.l.bf16 %v736_v0 }
  0xb2   : >> { %v789_v6 = vrot.slane %v4322_v36, 1  ;;  %v791_v5 = vrot.slane %v740_v2, 1  ;;  %v792_v42 = vrot.slane %v741_v10, 1  ;;  %v788_v32 = vsel %vm785_vm3, %v786_v48, %v787_v34 }
  0xb3   : >> { %v794_v58 = vrot.slane %v4324_v31, 1  ;;  %v796_v41 = vrot.slane %v743_v8, 1  ;;  %v797_v40 = vrot.slane %v744_v56, 1  ;;  %v799_v44 = vrot.slane %v4326_v9, 1 }
  0xb4   : >> { %v801_v13 = vrot.slane %v746_v28, 1  ;;  %v802_v18 = vrot.slane %v747_v16, 1  ;;  %v804_v51 = vrot.slane %v4328_v35, 1  ;;  %v806_v43 = vrot.slane %v749_v15, 1 }
  0xb5   : >> { %v807_v20 = vrot.slane %v750_v19, 1  ;;  %v809_v50 = vrot.slane %v4330_v21, 1  ;;  %v811_v57 = vrot.slane %v752_v17, 1  ;;  %v812_v36 = vrot.slane %v753_v22, 1 }
  0xb6   : >> { %v814_v2 = vrot.slane %v4332_v24, 1  ;;  %v816_v10 = vrot.slane %v755_v3, 1  ;;  %v817_v48 = vrot.slane %v756_v25, 1  ;;  %v790_v31 = vsel %vm785_vm3, %v787_v34, %v789_v6 }
  0xb7   : >> { %v819_v8 = vrot.slane %v4334_v4, 1  ;;  %v821_v56 = vrot.slane %v758_v7, 1  ;;  %v822_v0 = vrot.slane %v759_v29, 1  ;;  %v793_v16 = vsel %vm785_vm3, %v791_v5, %v792_v42 }
  0xb8   : >> { %v795_v28 = vsel %vm785_vm3, %v792_v42, %v794_v58  ;;  %v798_v35 = vsel %vm785_vm3, %v796_v41, %v797_v40  ;;  %v824_v15 = vrot.slane %v4336_v12, 1  ;;  %v800_v9 = vsel %vm785_vm3, %v797_v40, %v799_v44 }
  0xb9   : >> { %v803_v19 = vsel %vm785_vm3, %v801_v13, %v802_v18  ;;  %v805_v21 = vsel %vm785_vm3, %v802_v18, %v804_v51  ;;  %v808_v34 = vsel %vm785_vm3, %v806_v43, %v807_v20  ;;  %v810_v17 = vsel %vm785_vm3, %v807_v20, %v809_v50  ;;  %v5999_v13 = vld [vmem:[#allocation25_spill] sm:$0xff]  ;;  %v6001_v20 = vld [vmem:[#allocation36_spill] sm:$0xff] }
  0xba   : >> { %v813_v22 = vsel %vm785_vm3, %v811_v57, %v812_v36  ;;  %v815_v24 = vsel %vm785_vm3, %v812_v36, %v814_v2  ;;  %v818_v3 = vsel %vm785_vm3, %v816_v10, %v817_v48  ;;  %v820_v25 = vsel %vm785_vm3, %v817_v48, %v819_v8  ;;  %v879_v57 = vld [vmem:[%s4094_s25 + $0x44] sm:$0x3] }
  0xbb   : >> { %v823_v4 = vsel %vm785_vm3, %v821_v56, %v822_v0  ;;  %v4362_v7 = vadd.f32 %v788_v32, %v4202_v26  ;;  %v4365_v29 = vadd.f32 %v790_v31, %v4204_v27  ;;  %v825_v12 = vsel %vm785_vm3, %v822_v0, %v824_v15  ;;  %v876_v32 = vld [vmem:[%s4094_s25 + $0x20] sm:$0x3] }
  0xbc   : >> { %v4369_v5 = vadd.f32 %v789_v6, %v4206_v30  ;;  %v4372_v42 = vadd.f32 %v793_v16, %v4208_v33  ;;  %v4375_v41 = vadd.f32 %v795_v28, %v4210_v37  ;;  %v4378_v40 = vadd.f32 %v794_v58, %v4212_v38  ;;  %v874_v6 = vld [vmem:[%s4094_s25 + $0x8] sm:$0x3]  ;;  %v6004_v48 = vld [vmem:[#allocation26_spill] sm:$0xff] }
  0xbd   : >> { %v4381_v26 = vadd.f32 %v798_v35, %v4214_v45  ;;  %v4384_v27 = vadd.f32 %v800_v9, %v4216_v52  ;;  %v4387_v30 = vadd.f32 %v799_v44, %v4218_v59  ;;  %v4390_v33 = vadd.f32 %v803_v19, %v4220_v23  ;;  %v5998_v44 = vld [vmem:[#allocation35_spill] sm:$0xff]  ;;  %v6005_v56 = vld [vmem:[#allocation38_spill] sm:$0xff]  ;;  %v881_v19 = vld [vmem:[%s4094_s25 + $0x5c] sm:$0x3] }
  0xbe   : >> { %v4393_v37 = vadd.f32 %v805_v21, %v4222_v39  ;;  %v4396_v38 = vadd.f32 %v804_v51, %v4224_v46  ;;  %v4399_v45 = vadd.f32 %v808_v34, %v4226_v47  ;;  %v4402_v52 = vadd.f32 %v810_v17, %v4231_v49  ;;  %v6000_v51 = vld [vmem:[#allocation23_spill] sm:$0xff]  ;;  %v6006_v16 = vld [vmem:[#allocation30_spill] sm:$0xff] }
  0xbf   : >> { %v4405_v59 = vadd.f32 %v809_v50, %v4233_v53  ;;  %v4408_v23 = vadd.f32 %v813_v22, %v4235_v54  ;;  %v4411_v39 = vadd.f32 %v815_v24, %v4237_v55  ;;  %v4415_v46 = vadd.f32 %v814_v2, %v4242_v60  ;;  %v875_v54 = vld [vmem:[%s4094_s25 + $0x14] sm:$0x3]  ;;  %v6003_v2 = vld [vmem:[#allocation37_spill] sm:$0xff]  ;;  %v6008_v21 = vld [vmem:[#allocation31_spill] sm:$0xff] }
  0xc0   : >> { %v4418_v47 = vadd.f32 %v818_v3, %v4244_v61  ;;  %v4421_v49 = vadd.f32 %v820_v25, %v4246_v62  ;;  %v4424_v53 = vadd.f32 %v819_v8, %v4248_v63  ;;  %v4429_v55 = vadd.f32 %v823_v4, %v4253_v1  ;;  %v877_v61 = vld [vmem:[%s4094_s25 + $0x2c] sm:$0x3]  ;;  %v878_v62 = vld [vmem:[%s4094_s25 + $0x38] sm:$0x3]  ;;  %v6002_v50 = vld [vmem:[#allocation24_spill] sm:$0xff] }
  0xc1   : >> { %v4432_v58 = vadd.f32 %v825_v12, %v4255_v14  ;;  %v4435_v60 = vadd.f32 %v824_v15, %v4257_v11  ;;  %v893_v18 = vmul.bf16 %v5999_v13, %v5998_v44  ;;  %v894_v63 = vmul.bf16 %v5999_v13, %v6000_v51  ;;  %v880_v11 = vld [vmem:[%s4094_s25 + $0x50] sm:$0x3]  ;;  %v6007_v15 = vld [vmem:[#allocation39_spill] sm:$0xff]  ;;  %v6011_v12 = vld [vmem:[#allocation41_spill] sm:$0xff] }
  0xc2   : >> { %v895_v43 = vmul.bf16 %v5999_v13, %v874_v6  ;;  %v896_v1 = vmul.bf16 %v5999_v13, %v6001_v20  ;;  %v897_v14 = vmul.bf16 %v5999_v13, %v6002_v50  ;;  %v898_v36 = vmul.bf16 %v5999_v13, %v875_v54  ;;  %v6009_v22 = vld [vmem:[#allocation40_spill] sm:$0xff]  ;;  %v6012_v54 = vld [vmem:[#allocation33_spill] sm:$0xff]  ;;  %v6013_v44 = vld [vmem:[#allocation42_spill] sm:$0xff] }
  0xc3   : >> { %v899_v10 = vmul.bf16 %v5999_v13, %v6003_v2  ;;  %v900_v31 = vmul.bf16 %v5999_v13, %v6004_v48  ;;  %v901_v8 = vmul.bf16 %v5999_v13, %v876_v32  ;;  %v902_v0 = vmul.bf16 %v5999_v13, %v6005_v56  ;;  %v6010_v3 = vld [vmem:[#allocation32_spill] sm:$0xff] }
  0xc4   : >> { %v903_v28 = vmul.bf16 %v5999_v13, %v6006_v16  ;;  %v904_v35 = vmul.bf16 %v5999_v13, %v877_v61  ;;  %v905_v9 = vmul.bf16 %v5999_v13, %v6007_v15  ;;  %v906_v34 = vmul.bf16 %v5999_v13, %v6008_v21 }
  0xc5   : >> { %v907_v17 = vmul.bf16 %v5999_v13, %v878_v62  ;;  %v908_v24 = vmul.bf16 %v5999_v13, %v6009_v22  ;;  %v909_v25 = vmul.bf16 %v5999_v13, %v6010_v3  ;;  %v910_v4 = vmul.bf16 %v5999_v13, %v879_v57  ;;  %v6014_v62 = vld [vmem:[#allocation34_spill] sm:$0xff] }
  0xc6   : >> { %v911_v6 = vmul.bf16 %v5999_v13, %v6011_v12  ;;  %v912_v32 = vmul.bf16 %v5999_v13, %v6012_v54  ;;  %v913_v61 = vmul.bf16 %v5999_v13, %v880_v11  ;;  %v914_v51 = vmul.bf16 %v5999_v13, %v6013_v44 }
  0xc7   : >> { %v915_v20 = vmul.bf16 %v5999_v13, %v6014_v62  ;;  %v917_v50 = vunpack.c.l.bf16 %v893_v18  ;;  %v918_v2 = vunpack.c.l.bf16 %v894_v63  ;;  %v916_v48 = vmul.bf16 %v5999_v13, %v881_v19 }
  0xc8   : >> { %v4482_v56 = vunpack.c.l.bf16 %v895_v43  ;;  %v920_v57 = vunpack.c.l.bf16 %v896_v1  ;;  %v921_v16 = vunpack.c.l.bf16 %v897_v14  ;;  %v4484_v15 = vunpack.c.l.bf16 %v898_v36 }
  0xc9   : >> { %v923_v21 = vunpack.c.l.bf16 %v899_v10  ;;  %v924_v22 = vunpack.c.l.bf16 %v900_v31  ;;  %v4486_v3 = vunpack.c.l.bf16 %v901_v8  ;;  %v926_v11 = vunpack.c.l.bf16 %v902_v0 }
  0xca   : >> { %v927_v12 = vunpack.c.l.bf16 %v903_v28  ;;  %v4488_v54 = vunpack.c.l.bf16 %v904_v35  ;;  %v929_v44 = vunpack.c.l.bf16 %v905_v9  ;;  %v930_v62 = vunpack.c.l.bf16 %v906_v34 }
  0xcb   : >> { %v4490_v18 = vunpack.c.l.bf16 %v907_v17  ;;  %v966_v63 = vrot.slane %v917_v50, 2  ;;  %v967_v13 = vrot.slane %v918_v2, 2  ;;  %v932_v43 = vunpack.c.l.bf16 %v908_v24 }
  0xcc   : >> { %v933_v19 = vunpack.c.l.bf16 %v909_v25  ;;  %v4492_v1 = vunpack.c.l.bf16 %v910_v4  ;;  %v935_v14 = vunpack.c.l.bf16 %v911_v6  ;;  %v936_v36 = vunpack.c.l.bf16 %v912_v32 }
  0xcd   : >> { %v4494_v10 = vunpack.c.l.bf16 %v913_v61  ;;  %v938_v31 = vunpack.c.l.bf16 %v914_v51  ;;  %v939_v8 = vunpack.c.l.bf16 %v915_v20  ;;  %v4496_v0 = vunpack.c.l.bf16 %v916_v48 }
  0xce   : >> { %v969_v28 = vrot.slane %v4482_v56, 2  ;;  %v971_v35 = vrot.slane %v920_v57, 2  ;;  %v972_v9 = vrot.slane %v921_v16, 2  ;;  %v968_v34 = vsel %vm965_vm4, %v966_v63, %v967_v13 }
  0xcf   : >> { %v974_v17 = vrot.slane %v4484_v15, 2  ;;  %v976_v24 = vrot.slane %v923_v21, 2  ;;  %v977_v25 = vrot.slane %v924_v22, 2  ;;  %v979_v4 = vrot.slane %v4486_v3, 2 }
  0xd0   : >> { %v981_v6 = vrot.slane %v926_v11, 2  ;;  %v982_v32 = vrot.slane %v927_v12, 2  ;;  %v984_v61 = vrot.slane %v4488_v54, 2  ;;  %v986_v51 = vrot.slane %v929_v44, 2 }
  0xd1   : >> { %v987_v20 = vrot.slane %v930_v62, 2  ;;  %v989_v50 = vrot.slane %v4490_v18, 2  ;;  %v991_v2 = vrot.slane %v932_v43, 2  ;;  %v992_v48 = vrot.slane %v933_v19, 2 }
  0xd2   : >> { %v994_v56 = vrot.slane %v4492_v1, 2  ;;  %v996_v57 = vrot.slane %v935_v14, 2  ;;  %v997_v16 = vrot.slane %v936_v36, 2  ;;  %v970_v15 = vsel %vm965_vm4, %v967_v13, %v969_v28 }
  0xd3   : >> { %v999_v21 = vrot.slane %v4494_v10, 2  ;;  %v1001_v22 = vrot.slane %v938_v31, 2  ;;  %v1002_v3 = vrot.slane %v939_v8, 2  ;;  %v973_v11 = vsel %vm965_vm4, %v971_v35, %v972_v9 }
  0xd4   : >> { %v975_v12 = vsel %vm965_vm4, %v972_v9, %v974_v17  ;;  %v978_v54 = vsel %vm965_vm4, %v976_v24, %v977_v25  ;;  %v1004_v44 = vrot.slane %v4496_v0, 2  ;;  %v980_v62 = vsel %vm965_vm4, %v977_v25, %v979_v4 }
  0xd5   : >> { %v983_v18 = vsel %vm965_vm4, %v981_v6, %v982_v32  ;;  %v985_v63 = vsel %vm965_vm4, %v982_v32, %v984_v61  ;;  %v988_v13 = vsel %vm965_vm4, %v986_v51, %v987_v20  ;;  %v990_v43 = vsel %vm965_vm4, %v987_v20, %v989_v50  ;;  %v3080_v6 = vld [vmem:[%s4094_s25 + $0x24] sm:$0xf]  ;;  %v4601_v32 = vld [vmem:[%s4094_s25 + $0x28] sm:$0xf]  ;;  %v4617_v51 = vld [vmem:[%s4094_s25 + $0x34] sm:$0xf] }
  0xd6   : >> { %v993_v19 = vsel %vm965_vm4, %v991_v2, %v992_v48  ;;  %v995_v1 = vsel %vm965_vm4, %v992_v48, %v994_v56  ;;  %v998_v14 = vsel %vm965_vm4, %v996_v57, %v997_v16  ;;  %v1000_v36 = vsel %vm965_vm4, %v997_v16, %v999_v21  ;;  %6021 = vst [vmem:[#allocation26_spill] sm:$0xff] %v4601_v32  ;;  %v3086_v20 = vld [vmem:[%s4094_s25 + $0x3c] sm:$0xf]  ;;  %v4622_v48 = vld [vmem:[%s4094_s25 + $0x40] sm:$0xf] }
  0xd7   : >> { %v1003_v10 = vsel %vm965_vm4, %v1001_v22, %v1002_v3  ;;  %v4522_v31 = vadd.f32 %v968_v34, %v4362_v7  ;;  %v4525_v8 = vadd.f32 %v970_v15, %v4365_v29  ;;  %v1005_v0 = vsel %vm965_vm4, %v1002_v3, %v1004_v44  ;;  %v3077_v34 = vld [vmem:[%s4094_s25 + $0x18] sm:$0xf]  ;;  %6026 = vst [vmem:[#allocation40_spill] sm:$0xff] %v4617_v51 }
  0xd8   : >> { %v4529_v35 = vadd.f32 %v969_v28, %v4369_v5  ;;  %v4532_v9 = vadd.f32 %v973_v11, %v4372_v42  ;;  %v4535_v24 = vadd.f32 %v975_v12, %v4375_v41  ;;  %v4538_v25 = vadd.f32 %v974_v17, %v4378_v40  ;;  %v4563_v28 = vld [vmem:[%s4094_s25 + $0x10] sm:$0xf]  ;;  %v4582_v17 = vld [vmem:[%s4094_s25 + $0x1c] sm:$0xf]  ;;  %6028 = vst [vmem:[#allocation32_spill] sm:$0xff] %v4622_v48 }
  0xd9   : >> { %v4541_v7 = vadd.f32 %v978_v54, %v4381_v26  ;;  %v4544_v29 = vadd.f32 %v980_v62, %v4384_v27  ;;  %v4547_v5 = vadd.f32 %v979_v4, %v4387_v30  ;;  %v4550_v42 = vadd.f32 %v983_v18, %v4390_v33  ;;  %v3074_v27 = vld [vmem:[%s4094_s25 + $0xc] sm:$0xf]  ;;  %6015 = vst [vmem:[#allocation35_spill] sm:$0xff] %v4563_v28  ;;  %v4597_v4 = vld [vmem:[%s4094_s25 + $0x20] sm:$0x1] }
  0xda   : >> { %v4553_v41 = vadd.f32 %v985_v63, %v4393_v37  ;;  %v4556_v40 = vadd.f32 %v984_v61, %v4396_v38  ;;  %v4559_v26 = vadd.f32 %v988_v13, %v4399_v45  ;;  %v4566_v30 = vadd.f32 %v990_v43, %v4402_v52  ;;  %v4578_v45 = vld [vmem:[%s4094_s25 + $0x14] sm:$0x1]  ;;  %6017 = vst [vmem:[#allocation23_spill] sm:$0xff] %v4582_v17  ;;  %v4604_v61 = vld [vmem:[%s4094_s25 + $0x2c] sm:$0x1] }
  0xdb   : >> { %v4569_v33 = vadd.f32 %v989_v50, %v4405_v59  ;;  %v4572_v37 = vadd.f32 %v993_v19, %v4408_v23  ;;  %v4575_v38 = vadd.f32 %v995_v1, %v4411_v39  ;;  %6016 = vst [vmem:[#allocation25_spill] sm:$0xff] %v4578_v45  ;;  %v4585_v52 = vadd.f32 %v994_v56, %v4415_v46  ;;  %v6027_v50 = vld [vmem:[#allocation27_spill] sm:$0xff]  ;;  %v4636_v15 = vld [vmem:[%s4094_s25 + $0x38] sm:$0x1]  ;;  %v3095_v62 = vld [vmem:[%s4094_s25 + $0x60] sm:$0xf] }
  0xdc   : >> { %v4588_v59 = vadd.f32 %v998_v14, %v4418_v47  ;;  %v4591_v23 = vadd.f32 %v1000_v36, %v4421_v49  ;;  %v4594_v39 = vadd.f32 %v999_v21, %v4424_v53  ;;  %6020 = vst [vmem:[#allocation37_spill] sm:$0xff] %v4597_v4  ;;  %6022 = vst [vmem:[#allocation38_spill] sm:$0xff] %v4604_v61  ;;  %v3083_v53 = vld [vmem:[%s4094_s25 + $0x30] sm:$0xf]  ;;  %v4626_v56 = vld [vmem:[%s4094_s25 + $0x4c] sm:$0xf] }
  0xdd   : >> { %v4607_v46 = vadd.f32 %v1003_v10, %v4429_v55  ;;  %v4610_v47 = vadd.f32 %v1005_v0, %v4432_v58  ;;  %v4613_v49 = vadd.f32 %v1004_v44, %v4435_v60  ;;  %v1093_v2 = vmul.bf16 %v6027_v50, %v3074_v27  ;;  %v3089_v55 = vld [vmem:[%s4094_s25 + $0x48] sm:$0xf]  ;;  %6029 = vst [vmem:[#allocation41_spill] sm:$0xff] %v4626_v56  ;;  %v3092_v21 = vld [vmem:[%s4094_s25 + $0x54] sm:$0xf] }
  0xde   : >> { %6018 = vst [vmem:[#allocation36_spill] sm:$0xff] %v4591_v23  ;;  %6019 = vst [vmem:[#allocation24_spill] sm:$0xff] %v4594_v39  ;;  %v1094_v58 = vmul.bf16 %v6027_v50, %v4563_v28  ;;  %v1095_v60 = vmul.bf16 %v6027_v50, %v4578_v45  ;;  %v1096_v57 = vmul.bf16 %v6027_v50, %v3077_v34  ;;  %v4640_v22 = vld [vmem:[%s4094_s25 + $0x58] sm:$0xf]  ;;  %v4650_v44 = vld [vmem:[%s4094_s25 + $0x44] sm:$0x1] }
  0xdf   : >> { %6023 = vst [vmem:[#allocation30_spill] sm:$0xff] %v4607_v46  ;;  %6024 = vst [vmem:[#allocation39_spill] sm:$0xff] %v4610_v47  ;;  %v1097_v16 = vmul.bf16 %v6027_v50, %v4582_v17  ;;  %v1098_v3 = vmul.bf16 %v6027_v50, %v4597_v4  ;;  %v1099_v11 = vmul.bf16 %v6027_v50, %v3080_v6  ;;  %v4654_v18 = vld [vmem:[%s4094_s25 + $0x64] sm:$0xf]  ;;  %v4663_v1 = vld [vmem:[%s4094_s25 + $0x50] sm:$0x1] }
  0xe0   : >> { %6025 = vst [vmem:[#allocation31_spill] sm:$0xff] %v4613_v49  ;;  %6030 = vst [vmem:[#allocation33_spill] sm:$0xff] %v4636_v15  ;;  %v1100_v12 = vmul.bf16 %v6027_v50, %v4601_v32  ;;  %v1101_v54 = vmul.bf16 %v6027_v50, %v4604_v61  ;;  %v1102_v63 = vmul.bf16 %v6027_v50, %v3083_v53  ;;  %v4666_v14 = vld [vmem:[%s4094_s25 + $0x5c] sm:$0x1]  ;;  %v4676_v34 = vld [vmem:[%s4094_s25 + $0x68] sm:$0x1]  ;;  %v1119_v61 = vunpack.c.l.bf16 %v1095_v60 }
  0xe1   : >> { %6031 = vst [vmem:[#allocation42_spill] sm:$0xff] %v4640_v22  ;;  %6032 = vst [vmem:[#allocation34_spill] sm:$0xff] %v4650_v44  ;;  %v1103_v13 = vmul.bf16 %v6027_v50, %v4617_v51  ;;  %v1104_v43 = vmul.bf16 %v6027_v50, %v4636_v15  ;;  %v1105_v19 = vmul.bf16 %v6027_v50, %v3086_v20  ;;  %v1117_v15 = vunpack.c.l.bf16 %v1093_v2 }
  0xe2   : >> { %6033 = vst [vmem:[#allocation27_spill] sm:$0xff] %v4654_v18  ;;  %6034 = vst [vmem:[#allocation43_spill] sm:$0xff] %v4663_v1  ;;  %v1106_v36 = vmul.bf16 %v6027_v50, %v4622_v48  ;;  %v1107_v10 = vmul.bf16 %v6027_v50, %v4650_v44  ;;  %v1108_v0 = vmul.bf16 %v6027_v50, %v3089_v55  ;;  %v1118_v51 = vunpack.c.l.bf16 %v1094_v58 }
  0xe3   : >> { %6035 = vst [vmem:[#allocation44_spill] sm:$0xff] %v4666_v14  ;;  %v1109_v27 = vmul.bf16 %v6027_v50, %v4626_v56  ;;  %v1110_v6 = vmul.bf16 %v6027_v50, %v4663_v1  ;;  %v1111_v53 = vmul.bf16 %v6027_v50, %v3092_v21  ;;  %v1112_v20 = vmul.bf16 %v6027_v50, %v4640_v22 }
  0xe4   : >> { %v1113_v48 = vmul.bf16 %v6027_v50, %v4666_v14  ;;  %v1114_v44 = vmul.bf16 %v6027_v50, %v3095_v62  ;;  %v1115_v55 = vmul.bf16 %v6027_v50, %v4654_v18  ;;  %v1116_v56 = vmul.bf16 %v6027_v50, %v4676_v34 }
  0xe5   : >> { %v1120_v1 = vunpack.c.l.bf16 %v1096_v57  ;;  %v1121_v32 = vunpack.c.l.bf16 %v1097_v16  ;;  %v1122_v21 = vunpack.c.l.bf16 %v1098_v3  ;;  %v1123_v4 = vunpack.c.l.bf16 %v1099_v11 }
  0xe6   : >> { %v1124_v17 = vunpack.c.l.bf16 %v1100_v12  ;;  %v1125_v22 = vunpack.c.l.bf16 %v1101_v54  ;;  %v1126_v45 = vunpack.c.l.bf16 %v1102_v63  ;;  %v1127_v28 = vunpack.c.l.bf16 %v1103_v13  ;;  %v6050_v63 = vld [vmem:[#allocation23_spill] sm:$0xff] }
  0xe7   : >> { %v1128_v14 = vunpack.c.l.bf16 %v1104_v43  ;;  %v1129_v49 = vunpack.c.l.bf16 %v1105_v19  ;;  %v1130_v62 = vunpack.c.l.bf16 %v1106_v36  ;;  %v1131_v47 = vunpack.c.l.bf16 %v1107_v10  ;;  %v4791_v43 = vld [vmem:[%s4094_s25 + $0x54] sm:$0xe]  ;;  %v6053_v36 = vld [vmem:[#allocation26_spill] sm:$0xff] }
  0xe8   : >> { %v1132_v46 = vunpack.c.l.bf16 %v1108_v0  ;;  %v1133_v18 = vunpack.c.l.bf16 %v1109_v27  ;;  %v1134_v39 = vunpack.c.l.bf16 %v1110_v6  ;;  %v1135_v23 = vunpack.c.l.bf16 %v1111_v53  ;;  %v6052_v19 = vld [vmem:[#allocation37_spill] sm:$0xff]  ;;  %v6054_v0 = vld [vmem:[#allocation38_spill] sm:$0xff] }
  0xe9   : >> { %v1136_v50 = vunpack.c.l.bf16 %v1112_v20  ;;  %v1137_v2 = vunpack.c.l.bf16 %v1113_v48  ;;  %v1138_v58 = vunpack.c.l.bf16 %v1114_v44  ;;  %v1139_v60 = vunpack.c.l.bf16 %v1115_v55  ;;  %v4802_v6 = vld [vmem:[%s4094_s25 + $0x60] sm:$0xe]  ;;  %v6056_v20 = vld [vmem:[#allocation40_spill] sm:$0xff] }
  0xea   : >> { %v1140_v57 = vunpack.c.l.bf16 %v1116_v56  ;;  %v4691_v16 = vadd.f32 %v1117_v15, %v4522_v31  ;;  %v4694_v3 = vadd.f32 %v1118_v51, %v4525_v8  ;;  %v4697_v11 = vadd.f32 %v1119_v61, %v4529_v35  ;;  %v6048_v51 = vld [vmem:[#allocation35_spill] sm:$0xff] }
  0xeb   : >> { %v4700_v12 = vadd.f32 %v1120_v1, %v4532_v9  ;;  %v4703_v54 = vadd.f32 %v1121_v32, %v4535_v24  ;;  %v4706_v48 = vadd.f32 %v1122_v21, %v4538_v25  ;;  %v4709_v56 = vadd.f32 %v1123_v4, %v4541_v7  ;;  %v4730_v7 = vld [vmem:[%s4094_s25 + $0xc] sm:$0xe]  ;;  %v6041_v4 = vld [vmem:[#allocation30_spill] sm:$0xff]  ;;  %v6057_v21 = vld [vmem:[#allocation33_spill] sm:$0xff] }
  0xec   : >> { %v4712_v31 = vadd.f32 %v1124_v17, %v4544_v29  ;;  %v4715_v8 = vadd.f32 %v1125_v22, %v4547_v5  ;;  %v4718_v35 = vadd.f32 %v1126_v45, %v4550_v42  ;;  %v4721_v9 = vadd.f32 %v1127_v28, %v4553_v41  ;;  %6036 = vst [vmem:[#allocation45_spill] sm:$0xff] %v4730_v7  ;;  %v6042_v32 = vld [vmem:[#allocation39_spill] sm:$0xff]  ;;  %v6049_v22 = vld [vmem:[#allocation25_spill] sm:$0xff] }
  0xed   : >> { %v4724_v24 = vadd.f32 %v1128_v14, %v4556_v40  ;;  %v4727_v25 = vadd.f32 %v1129_v49, %v4559_v26  ;;  %v4733_v29 = vadd.f32 %v1130_v62, %v4566_v30  ;;  %v4736_v5 = vadd.f32 %v1131_v47, %v4569_v33  ;;  %v4745_v40 = vld [vmem:[%s4094_s25 + $0x18] sm:$0xe]  ;;  %v6038_v30 = vld [vmem:[#allocation36_spill] sm:$0xff]  ;;  %v4780_v49 = vld [vmem:[%s4094_s25 + $0x48] sm:$0xe] }
  0xee   : >> { %v4739_v42 = vadd.f32 %v1132_v46, %v4572_v37  ;;  %v4742_v41 = vadd.f32 %v1133_v18, %v4575_v38  ;;  %6037 = vst [vmem:[#allocation46_spill] sm:$0xff] %v4745_v40  ;;  %v4748_v26 = vadd.f32 %v1134_v39, %v4585_v52  ;;  %v4751_v28 = vadd.f32 %v1135_v23, %v4588_v59  ;;  %v6039_v33 = vld [vmem:[#allocation24_spill] sm:$0xff]  ;;  %v4760_v37 = vld [vmem:[%s4094_s25 + $0x24] sm:$0xe]  ;;  %v4775_v23 = vld [vmem:[%s4094_s25 + $0x3c] sm:$0xe] }
  0xef   : >> { %v4754_v45 = vadd.f32 %v1136_v50, %v6038_v30  ;;  %v4757_v17 = vadd.f32 %v1137_v2, %v6039_v33  ;;  %6040 = vst [vmem:[#allocation36_spill] sm:$0xff] %v4760_v37  ;;  %v4763_v38 = vadd.f32 %v1138_v58, %v6041_v4  ;;  %v4766_v61 = vadd.f32 %v1139_v60, %v6042_v32  ;;  %v6043_v52 = vld [vmem:[#allocation31_spill] sm:$0xff]  ;;  %v4772_v59 = vld [vmem:[%s4094_s25 + $0x30] sm:$0xe]  ;;  %v6059_v60 = vld [vmem:[#allocation34_spill] sm:$0xff] }
  0xf0   : >> { %v4769_v39 = vadd.f32 %v1140_v57, %v6043_v52  ;;  %6044 = vst [vmem:[#allocation24_spill] sm:$0xff] %v4772_v59  ;;  %6045 = vst [vmem:[#allocation30_spill] sm:$0xff] %v4775_v23  ;;  %v6046_v46 = vld [vmem:[#allocation28_spill] sm:$0xff]  ;;  %v6060_v33 = vld [vmem:[#allocation41_spill] sm:$0xff] }
  0xf1   : >> { %v1184_v47 = vmul.bf16 %v6046_v46, %v4730_v7  ;;  %6047 = vst [vmem:[#allocation39_spill] sm:$0xff] %v4780_v49  ;;  %v1185_v15 = vmul.bf16 %v6046_v46, %v6048_v51  ;;  %v1186_v44 = vmul.bf16 %v6046_v46, %v6049_v22  ;;  %v1187_v18 = vmul.bf16 %v6046_v46, %v4745_v40  ;;  %v6058_v2 = vld [vmem:[#allocation32_spill] sm:$0xff]  ;;  %v6061_v32 = vld [vmem:[#allocation43_spill] sm:$0xff] }
  0xf2   : >> { %v1188_v13 = vmul.bf16 %v6046_v46, %v6050_v63  ;;  %6051 = vst [vmem:[#allocation31_spill] sm:$0xff] %v4791_v43  ;;  %v1189_v1 = vmul.bf16 %v6046_v46, %v6052_v19  ;;  %v1190_v14 = vmul.bf16 %v6046_v46, %v4760_v37  ;;  %v1191_v10 = vmul.bf16 %v6046_v46, %v6053_v36  ;;  %v6062_v19 = vld [vmem:[#allocation42_spill] sm:$0xff] }
  0xf3   : >> { %v1192_v27 = vmul.bf16 %v6046_v46, %v6054_v0  ;;  %6055 = vst [vmem:[#allocation28_spill] sm:$0xff] %v4802_v6  ;;  %v1193_v53 = vmul.bf16 %v6046_v46, %v4772_v59  ;;  %v1194_v55 = vmul.bf16 %v6046_v46, %v6056_v20  ;;  %v1195_v62 = vmul.bf16 %v6046_v46, %v6057_v21  ;;  %v6063_v21 = vld [vmem:[#allocation44_spill] sm:$0xff] }
  0xf4   : >> { %v1196_v50 = vmul.bf16 %v6046_v46, %v4775_v23  ;;  %v1197_v58 = vmul.bf16 %v6046_v46, %v6058_v2  ;;  %v1198_v57 = vmul.bf16 %v6046_v46, %v6059_v60  ;;  %v1199_v30 = vmul.bf16 %v6046_v46, %v4780_v49  ;;  %v6064_v23 = vld [vmem:[#allocation27_spill] sm:$0xff] }
  0xf5   : >> { %v1200_v4 = vmul.bf16 %v6046_v46, %v6060_v33  ;;  %v1201_v52 = vmul.bf16 %v6046_v46, %v6061_v32  ;;  %v1202_v22 = vmul.bf16 %v6046_v46, %v4791_v43  ;;  %v1203_v0 = vmul.bf16 %v6046_v46, %v6062_v19 }
  0xf6   : >> { %v1204_v2 = vmul.bf16 %v6046_v46, %v6063_v21  ;;  %v1205_v60 = vmul.bf16 %v6046_v46, %v4802_v6  ;;  %v1206_v49 = vmul.bf16 %v6046_v46, %v6064_v23  ;;  %v1208_v20 = vunpack.c.l.bf16 %v1184_v47 }
  0xf7   : >> { %v1209_v33 = vunpack.c.l.bf16 %v1185_v15  ;;  %v1207_v32 = vmul.bf16 %v6046_v46, %v4676_v34  ;;  %v4834_v59 = vunpack.c.l.bf16 %v1186_v44  ;;  %v1211_v43 = vunpack.c.l.bf16 %v1187_v18 }
  0xf8   : >> { %v1212_v36 = vunpack.c.l.bf16 %v1188_v13  ;;  %v4836_v37 = vunpack.c.l.bf16 %v1189_v1  ;;  %v1214_v19 = vunpack.c.l.bf16 %v1190_v14  ;;  %v1215_v63 = vunpack.c.l.bf16 %v1191_v10 }
  0xf9   : >> { %v4838_v21 = vunpack.c.l.bf16 %v1192_v27  ;;  %v1217_v40 = vunpack.c.l.bf16 %v1193_v53  ;;  %v1218_v6 = vunpack.c.l.bf16 %v1194_v55  ;;  %v4840_v51 = vunpack.c.l.bf16 %v1195_v62 }
  0xfa   : >> { %v1220_v23 = vunpack.c.l.bf16 %v1196_v50  ;;  %v1221_v47 = vunpack.c.l.bf16 %v1197_v58  ;;  %v4842_v15 = vunpack.c.l.bf16 %v1198_v57  ;;  %v1256_v7 = vrot.slane %v1208_v20, 1 }
  0xfb   : >> { %v1257_v34 = vrot.slane %v1209_v33, 1  ;;  %v1223_v46 = vunpack.c.l.bf16 %v1199_v30  ;;  %v1224_v44 = vunpack.c.l.bf16 %v1200_v4  ;;  %v4844_v18 = vunpack.c.l.bf16 %v1201_v52 }
  0xfc   : >> { %v1226_v13 = vunpack.c.l.bf16 %v1202_v22  ;;  %v1227_v1 = vunpack.c.l.bf16 %v1203_v0  ;;  %v4846_v14 = vunpack.c.l.bf16 %v1204_v2  ;;  %v1229_v10 = vunpack.c.l.bf16 %v1205_v60 }
  0xfd   : >> { %v1230_v27 = vunpack.c.l.bf16 %v1206_v49  ;;  %v4848_v53 = vunpack.c.l.bf16 %v1207_v32  ;;  %v1259_v55 = vrot.slane %v4834_v59, 1  ;;  %v1261_v62 = vrot.slane %v1211_v43, 1 }
  0xfe   : >> { %v1262_v50 = vrot.slane %v1212_v36, 1  ;;  %v1258_v58 = vsel %vm785_vm3, %v1256_v7, %v1257_v34  ;;  %v1264_v20 = vrot.slane %v4836_v37, 1  ;;  %v1266_v57 = vrot.slane %v1214_v19, 1 }
  0xff   : >> { %v1267_v30 = vrot.slane %v1215_v63, 1  ;;  %v1269_v33 = vrot.slane %v4838_v21, 1  ;;  %v1271_v4 = vrot.slane %v1217_v40, 1  ;;  %v1272_v52 = vrot.slane %v1218_v6, 1 }
 0x100   : >> { %v1274_v2 = vrot.slane %v4840_v51, 1  ;;  %v1276_v22 = vrot.slane %v1220_v23, 1  ;;  %v1277_v49 = vrot.slane %v1221_v47, 1  ;;  %v1279_v0 = vrot.slane %v4842_v15, 1 }
 0x101   : >> { %v1281_v60 = vrot.slane %v1223_v46, 1  ;;  %v1282_v59 = vrot.slane %v1224_v44, 1  ;;  %v1284_v43 = vrot.slane %v4844_v18, 1  ;;  %v1286_v36 = vrot.slane %v1226_v13, 1 }
 0x102   : >> { %v1287_v7 = vrot.slane %v1227_v1, 1  ;;  %v1260_v37 = vsel %vm785_vm3, %v1257_v34, %v1259_v55  ;;  %v1289_v63 = vrot.slane %v4846_v14, 1  ;;  %v1291_v19 = vrot.slane %v1229_v10, 1 }
 0x103   : >> { %v1292_v32 = vrot.slane %v1230_v27, 1  ;;  %v1263_v40 = vsel %vm785_vm3, %v1261_v62, %v1262_v50  ;;  %v1265_v51 = vsel %vm785_vm3, %v1262_v50, %v1264_v20  ;;  %v1268_v23 = vsel %vm785_vm3, %v1266_v57, %v1267_v30 }
 0x104   : >> { %v1294_v6 = vrot.slane %v4848_v53, 1  ;;  %v1270_v21 = vsel %vm785_vm3, %v1267_v30, %v1269_v33  ;;  %v1273_v47 = vsel %vm785_vm3, %v1271_v4, %v1272_v52  ;;  %v1275_v15 = vsel %vm785_vm3, %v1272_v52, %v1274_v2  ;;  %v6066_v4 = vld [vmem:[#allocation29_spill] sm:$0xff] }
 0x105   : >> { %v1278_v34 = vsel %vm785_vm3, %v1276_v22, %v1277_v49  ;;  %v1280_v46 = vsel %vm785_vm3, %v1277_v49, %v1279_v0  ;;  %v1283_v44 = vsel %vm785_vm3, %v1281_v60, %v1282_v59  ;;  %v1285_v18 = vsel %vm785_vm3, %v1282_v59, %v1284_v43  ;;  %v6068_v49 = vld [vmem:[#allocation46_spill] sm:$0xff]  ;;  %v3113_v60 = vld [vmem:[%s4094_s25 + $0x50] sm:$0x3] }
 0x106   : >> { %v1288_v13 = vsel %vm785_vm3, %v1286_v36, %v1287_v7  ;;  %v1290_v1 = vsel %vm785_vm3, %v1287_v7, %v1289_v63  ;;  %v1293_v14 = vsel %vm785_vm3, %v1291_v19, %v1292_v32  ;;  %v4874_v10 = vadd.f32 %v1258_v58, %v4691_v16  ;;  %v3110_v58 = vld [vmem:[%s4094_s25 + $0x2c] sm:$0x3]  ;;  %v6071_v7 = vld [vmem:[#allocation26_spill] sm:$0xff]  ;;  %v6072_v19 = vld [vmem:[#allocation24_spill] sm:$0xff] }
 0x107   : >> { %v4877_v27 = vadd.f32 %v1260_v37, %v4694_v3  ;;  %v1295_v53 = vsel %vm785_vm3, %v1292_v32, %v1294_v6  ;;  %v4881_v62 = vadd.f32 %v1259_v55, %v4697_v11  ;;  %v4884_v50 = vadd.f32 %v1263_v40, %v4700_v12  ;;  %v3108_v55 = vld [vmem:[%s4094_s25 + $0x14] sm:$0x3] }
 0x108   : >> { %v4887_v57 = vadd.f32 %v1265_v51, %v4703_v54  ;;  %v4890_v30 = vadd.f32 %v1264_v20, %v4706_v48  ;;  %v4893_v16 = vadd.f32 %v1268_v23, %v4709_v56  ;;  %v4896_v3 = vadd.f32 %v1270_v21, %v4712_v31  ;;  %v6073_v40 = vld [vmem:[#allocation40_spill] sm:$0xff] }
 0x109   : >> { %v4899_v11 = vadd.f32 %v1269_v33, %v4715_v8  ;;  %v4902_v12 = vadd.f32 %v1273_v47, %v4718_v35  ;;  %v4905_v54 = vadd.f32 %v1275_v15, %v4721_v9  ;;  %v4908_v48 = vadd.f32 %v1274_v2, %v4724_v24  ;;  %v6065_v33 = vld [vmem:[#allocation45_spill] sm:$0xff]  ;;  %v6067_v2 = vld [vmem:[#allocation35_spill] sm:$0xff]  ;;  %v6075_v15 = vld [vmem:[#allocation32_spill] sm:$0xff] }
 0x10a   : >> { %v4911_v56 = vadd.f32 %v1278_v34, %v4727_v25  ;;  %v4914_v31 = vadd.f32 %v1280_v46, %v4733_v29  ;;  %v4917_v8 = vadd.f32 %v1279_v0, %v4736_v5  ;;  %v4920_v35 = vadd.f32 %v1283_v44, %v4739_v42  ;;  %v3109_v42 = vld [vmem:[%s4094_s25 + $0x20] sm:$0x3]  ;;  %v6069_v0 = vld [vmem:[#allocation23_spill] sm:$0xff] }
 0x10b   : >> { %v4923_v9 = vadd.f32 %v1285_v18, %v4742_v41  ;;  %v4927_v24 = vadd.f32 %v1284_v43, %v4748_v26  ;;  %v4930_v25 = vadd.f32 %v1288_v13, %v4751_v28  ;;  %v4933_v29 = vadd.f32 %v1290_v1, %v4754_v45  ;;  %v3111_v28 = vld [vmem:[%s4094_s25 + $0x38] sm:$0x3]  ;;  %v3112_v45 = vld [vmem:[%s4094_s25 + $0x44] sm:$0x3]  ;;  %v6070_v43 = vld [vmem:[#allocation36_spill] sm:$0xff] }
 0x10c   : >> { %v4936_v5 = vadd.f32 %v1289_v63, %v4757_v17  ;;  %v4941_v41 = vadd.f32 %v1293_v14, %v4763_v38  ;;  %v4944_v20 = vadd.f32 %v1295_v53, %v4766_v61  ;;  %v4947_v26 = vadd.f32 %v1294_v6, %v4769_v39  ;;  %v3114_v39 = vld [vmem:[%s4094_s25 + $0x5c] sm:$0x3]  ;;  %v6074_v6 = vld [vmem:[#allocation30_spill] sm:$0xff]  ;;  %v3115_v47 = vld [vmem:[%s4094_s25 + $0x68] sm:$0x3] }
 0x10d   : >> { %v1363_v52 = vmul.bf16 %v6066_v4, %v6065_v33  ;;  %v1364_v17 = vmul.bf16 %v6066_v4, %v6067_v2  ;;  %v1365_v22 = vmul.bf16 %v6066_v4, %v3108_v55  ;;  %v1366_v38 = vmul.bf16 %v6066_v4, %v6068_v49  ;;  %v6076_v44 = vld [vmem:[#allocation39_spill] sm:$0xff]  ;;  %v6077_v13 = vld [vmem:[#allocation41_spill] sm:$0xff]  ;;  %v6080_v33 = vld [vmem:[#allocation28_spill] sm:$0xff] }
 0x10e   : >> { %v1367_v61 = vmul.bf16 %v6066_v4, %v6069_v0  ;;  %v1368_v59 = vmul.bf16 %v6066_v4, %v3109_v42  ;;  %v1369_v36 = vmul.bf16 %v6066_v4, %v6070_v43  ;;  %v1370_v37 = vmul.bf16 %v6066_v4, %v6071_v7  ;;  %v6078_v53 = vld [vmem:[#allocation31_spill] sm:$0xff]  ;;  %v6079_v42 = vld [vmem:[#allocation42_spill] sm:$0xff] }
 0x10f   : >> { %v1371_v63 = vmul.bf16 %v6066_v4, %v3110_v58  ;;  %v1372_v32 = vmul.bf16 %v6066_v4, %v6072_v19  ;;  %v1373_v51 = vmul.bf16 %v6066_v4, %v6073_v40  ;;  %v1374_v23 = vmul.bf16 %v6066_v4, %v3111_v28 }
 0x110   : >> { %v1375_v21 = vmul.bf16 %v6066_v4, %v6074_v6  ;;  %v1376_v34 = vmul.bf16 %v6066_v4, %v6075_v15  ;;  %v1377_v46 = vmul.bf16 %v6066_v4, %v3112_v45  ;;  %v1378_v18 = vmul.bf16 %v6066_v4, %v6076_v44  ;;  %v6081_v45 = vld [vmem:[#allocation27_spill] sm:$0xff] }
 0x111   : >> { %v1379_v1 = vmul.bf16 %v6066_v4, %v6077_v13  ;;  %v1380_v14 = vmul.bf16 %v6066_v4, %v3113_v60  ;;  %v1381_v55 = vmul.bf16 %v6066_v4, %v6078_v53  ;;  %v1382_v58 = vmul.bf16 %v6066_v4, %v6079_v42 }
 0x112   : >> { %v1383_v28 = vmul.bf16 %v6066_v4, %v3114_v39  ;;  %v1384_v2 = vmul.bf16 %v6066_v4, %v6080_v33  ;;  %v1385_v49 = vmul.bf16 %v6066_v4, %v6081_v45  ;;  %v1387_v0 = vunpack.c.l.bf16 %v1363_v52 }
 0x113   : >> { %v1388_v43 = vunpack.c.l.bf16 %v1364_v17  ;;  %v1386_v7 = vmul.bf16 %v6066_v4, %v3115_v47  ;;  %v4994_v19 = vunpack.c.l.bf16 %v1365_v22  ;;  %v1390_v60 = vunpack.c.l.bf16 %v1366_v38 }
 0x114   : >> { %v1391_v40 = vunpack.c.l.bf16 %v1367_v61  ;;  %v4996_v6 = vunpack.c.l.bf16 %v1368_v59  ;;  %v1393_v15 = vunpack.c.l.bf16 %v1369_v36  ;;  %v1394_v44 = vunpack.c.l.bf16 %v1370_v37 }
 0x115   : >> { %v4998_v13 = vunpack.c.l.bf16 %v1371_v63  ;;  %v1396_v39 = vunpack.c.l.bf16 %v1372_v32  ;;  %v1397_v53 = vunpack.c.l.bf16 %v1373_v51  ;;  %v5000_v42 = vunpack.c.l.bf16 %v1374_v23 }
 0x116   : >> { %v1399_v33 = vunpack.c.l.bf16 %v1375_v21  ;;  %v1400_v45 = vunpack.c.l.bf16 %v1376_v34  ;;  %v5002_v52 = vunpack.c.l.bf16 %v1377_v46  ;;  %v1435_v17 = vrot.slane %v1387_v0, 2 }
 0x117   : >> { %v1436_v4 = vrot.slane %v1388_v43, 2  ;;  %v1402_v22 = vunpack.c.l.bf16 %v1378_v18  ;;  %v1403_v47 = vunpack.c.l.bf16 %v1379_v1  ;;  %v5004_v38 = vunpack.c.l.bf16 %v1380_v14 }
 0x118   : >> { %v1405_v61 = vunpack.c.l.bf16 %v1381_v55  ;;  %v1406_v59 = vunpack.c.l.bf16 %v1382_v58  ;;  %v5006_v36 = vunpack.c.l.bf16 %v1383_v28  ;;  %v1408_v37 = vunpack.c.l.bf16 %v1384_v2 }
 0x119   : >> { %v1409_v63 = vunpack.c.l.bf16 %v1385_v49  ;;  %v5008_v32 = vunpack.c.l.bf16 %v1386_v7  ;;  %v1438_v51 = vrot.slane %v4994_v19, 2  ;;  %v1440_v23 = vrot.slane %v1390_v60, 2 }
 0x11a   : >> { %v1441_v21 = vrot.slane %v1391_v40, 2  ;;  %v1437_v34 = vsel %vm965_vm4, %v1435_v17, %v1436_v4  ;;  %v1443_v46 = vrot.slane %v4996_v6, 2  ;;  %v1445_v18 = vrot.slane %v1393_v15, 2 }
 0x11b   : >> { %v1446_v1 = vrot.slane %v1394_v44, 2  ;;  %v1448_v14 = vrot.slane %v4998_v13, 2  ;;  %v1450_v55 = vrot.slane %v1396_v39, 2  ;;  %v1451_v58 = vrot.slane %v1397_v53, 2 }
 0x11c   : >> { %v1453_v28 = vrot.slane %v5000_v42, 2  ;;  %v1455_v2 = vrot.slane %v1399_v33, 2  ;;  %v1456_v49 = vrot.slane %v1400_v45, 2  ;;  %v1458_v0 = vrot.slane %v5002_v52, 2 }
 0x11d   : >> { %v1460_v43 = vrot.slane %v1402_v22, 2  ;;  %v1461_v7 = vrot.slane %v1403_v47, 2  ;;  %v1463_v19 = vrot.slane %v5004_v38, 2  ;;  %v1465_v60 = vrot.slane %v1405_v61, 2 }
 0x11e   : >> { %v1466_v40 = vrot.slane %v1406_v59, 2  ;;  %v1439_v6 = vsel %vm965_vm4, %v1436_v4, %v1438_v51  ;;  %v1468_v15 = vrot.slane %v5006_v36, 2  ;;  %v1470_v44 = vrot.slane %v1408_v37, 2 }
 0x11f   : >> { %v1471_v13 = vrot.slane %v1409_v63, 2  ;;  %v1442_v39 = vsel %vm965_vm4, %v1440_v23, %v1441_v21  ;;  %v1444_v53 = vsel %vm965_vm4, %v1441_v21, %v1443_v46  ;;  %v1447_v42 = vsel %vm965_vm4, %v1445_v18, %v1446_v1 }
 0x120   : >> { %v1473_v33 = vrot.slane %v5008_v32, 2  ;;  %v1449_v45 = vsel %vm965_vm4, %v1446_v1, %v1448_v14  ;;  %v1452_v52 = vsel %vm965_vm4, %v1450_v55, %v1451_v58  ;;  %v1454_v17 = vsel %vm965_vm4, %v1451_v58, %v1453_v28  ;;  %v6083_v55 = vld [vmem:[#allocation19_spill] sm:$0xff]  ;;  %v5088_v58 = vld [vmem:[%s4094_s25 + $0x1c] sm:$0xf] }
 0x121   : >> { %v1457_v4 = vsel %vm965_vm4, %v1455_v2, %v1456_v49  ;;  %v1459_v22 = vsel %vm965_vm4, %v1456_v49, %v1458_v0  ;;  %v1462_v47 = vsel %vm965_vm4, %v1460_v43, %v1461_v7  ;;  %v1464_v38 = vsel %vm965_vm4, %v1461_v7, %v1463_v19  ;;  %6084 = vst [vmem:[#allocation25_spill] sm:$0xff] %v5088_v58  ;;  %v5105_v43 = vld [vmem:[%s4094_s25 + $0x20] sm:$0x1]  ;;  %v3122_v7 = vld [vmem:[%s4094_s25 + $0x24] sm:$0xf] }
 0x122   : >> { %v1467_v61 = vsel %vm965_vm4, %v1465_v60, %v1466_v40  ;;  %v1469_v59 = vsel %vm965_vm4, %v1466_v40, %v1468_v15  ;;  %v1472_v36 = vsel %vm965_vm4, %v1470_v44, %v1471_v13  ;;  %v5034_v37 = vadd.f32 %v1437_v34, %v4874_v10  ;;  %6087 = vst [vmem:[#allocation37_spill] sm:$0xff] %v5105_v43  ;;  %v5109_v60 = vld [vmem:[%s4094_s25 + $0x28] sm:$0xf]  ;;  %v5125_v40 = vld [vmem:[%s4094_s25 + $0x34] sm:$0xf] }
 0x123   : >> { %v5037_v63 = vadd.f32 %v1439_v6, %v4877_v27  ;;  %v1474_v32 = vsel %vm965_vm4, %v1471_v13, %v1473_v33  ;;  %v5041_v23 = vadd.f32 %v1438_v51, %v4881_v62  ;;  %v5044_v21 = vadd.f32 %v1442_v39, %v4884_v50  ;;  %v6082_v50 = vld [vmem:[#allocation18_spill] sm:$0xff]  ;;  %6088 = vst [vmem:[#allocation38_spill] sm:$0xff] %v5109_v60 }
 0x124   : >> { %v5047_v18 = vadd.f32 %v1444_v53, %v4887_v57  ;;  %v5050_v1 = vadd.f32 %v1443_v46, %v4890_v30  ;;  %v5053_v10 = vadd.f32 %v1447_v42, %v4893_v16  ;;  %v5056_v27 = vadd.f32 %v1449_v45, %v4896_v3  ;;  %6093 = vst [vmem:[#allocation45_spill] sm:$0xff] %v5125_v40  ;;  %v5143_v13 = vld [vmem:[%s4094_s25 + $0x44] sm:$0x1]  ;;  %v5152_v42 = vld [vmem:[%s4094_s25 + $0x4c] sm:$0xf] }
 0x125   : >> { %v5059_v62 = vadd.f32 %v1448_v14, %v4899_v11  ;;  %v5062_v51 = vadd.f32 %v1452_v52, %v4902_v12  ;;  %v1552_v34 = vpack.i.b16 %v6082_v50, %v6082_v50  ;;  %v1642_v57 = vshrl.u32 %v6082_v50, 16  ;;  %v5085_v14 = vld [vmem:[%s4094_s25 + $0x18] sm:$0xf]  ;;  %6098 = vst [vmem:[#allocation36_spill] sm:$0xff] %v5143_v13  ;;  %6101 = vst [vmem:[#allocation40_spill] sm:$0xff] %v5152_v42 }
 0x126   : >> { %v1822_v30 = vpack.i.b16 %v6083_v55, %v6083_v55  ;;  %v5070_v16 = vadd.f32 %v1454_v17, %v4905_v54  ;;  %v5073_v3 = vadd.f32 %v1453_v28, %v4908_v48  ;;  %v5076_v11 = vadd.f32 %v1457_v4, %v4911_v56  ;;  %v6085_v54 = vld [vmem:[#allocation21_spill] sm:$0xff]  ;;  %v6086_v28 = vld [vmem:[#allocation22_spill] sm:$0xff] }
 0x127   : >> { %v5079_v12 = vadd.f32 %v1459_v22, %v4914_v31  ;;  %v5082_v46 = vadd.f32 %v1458_v0, %v4917_v8  ;;  %v1557_v2 = vrot.slane %v1552_v34, %v6085_v54  ;;  %v1643_v48 = vpack.i.b16 %v1642_v57, %v1642_v57  ;;  %v5163_v4 = vld [vmem:[%s4094_s25 + $0x58] sm:$0xf]  ;;  %v3137_v22 = vld [vmem:[%s4094_s25 + $0x60] sm:$0xf]  ;;  %v3140_v34 = vld [vmem:[%s4094_s25 + $0x6c] sm:$0xf] }
 0x128   : >> { %v1827_v49 = vrot.slane %v1822_v30, %v6086_v28  ;;  %v5093_v56 = vadd.f32 %v1462_v47, %v4920_v35  ;;  %v5096_v31 = vadd.f32 %v1464_v38, %v4923_v9  ;;  %v5099_v8 = vadd.f32 %v1463_v19, %v4927_v24  ;;  %v3125_v19 = vld [vmem:[%s4094_s25 + $0x30] sm:$0xf]  ;;  %6102 = vst [vmem:[#allocation30_spill] sm:$0xff] %v5163_v4  ;;  %v5167_v47 = vld [vmem:[%s4094_s25 + $0x64] sm:$0xf] }
 0x129   : >> { %v5102_v0 = vadd.f32 %v1467_v61, %v4930_v25  ;;  %v5112_v35 = vadd.f32 %v1469_v59, %v4933_v29  ;;  %v5115_v9 = vadd.f32 %v1468_v15, %v4936_v5  ;;  %v5118_v24 = vadd.f32 %v1472_v36, %v4941_v41  ;;  %v5121_v25 = vld [vmem:[%s4094_s25 + $0x2c] sm:$0x1]  ;;  %v5136_v5 = vld [vmem:[%s4094_s25 + $0x38] sm:$0x1]  ;;  %v3128_v41 = vld [vmem:[%s4094_s25 + $0x3c] sm:$0xf] }
 0x12a   : >> { %6092 = vst [vmem:[#allocation44_spill] sm:$0xff] %v5121_v25  ;;  %v5127_v6 = vcombine.low %v1557_v2, %v1557_v2  ;;  %v5130_v44 = vadd.f32 %v1474_v32, %v4944_v20  ;;  %v5133_v29 = vadd.f32 %v1473_v33, %v4947_v26  ;;  %6096 = vst [vmem:[#allocation46_spill] sm:$0xff] %v5136_v5  ;;  %v5140_v15 = vld [vmem:[%s4094_s25 + $0x40] sm:$0xf]  ;;  %v3131_v20 = vld [vmem:[%s4094_s25 + $0x48] sm:$0xf] }
 0x12b   : >> { %6089 = vst [vmem:[#allocation33_spill] sm:$0xff] %v5112_v35  ;;  %6090 = vst [vmem:[#allocation34_spill] sm:$0xff] %v5115_v9  ;;  %v5146_v39 = vrot.slane %v1643_v48, %v6085_v54  ;;  %v5148_v53 = vcombine.low %v1827_v49, %v1827_v49  ;;  %v3134_v26 = vld [vmem:[%s4094_s25 + $0x54] sm:$0xf]  ;;  %v5177_v32 = vld [vmem:[%s4094_s25 + $0x50] sm:$0x1] }
 0x12c   : >> { %6091 = vst [vmem:[#allocation43_spill] sm:$0xff] %v5118_v24  ;;  %6094 = vst [vmem:[#allocation29_spill] sm:$0xff] %v5130_v44  ;;  %v1562_v33 = vmul.bf16 %v5127_v6, %v5085_v14  ;;  %v1563_v45 = vmul.bf16 %v5127_v6, %v5088_v58  ;;  %v1564_v52 = vmul.bf16 %v5127_v6, %v5105_v43  ;;  %v5181_v57 = vld [vmem:[%s4094_s25 + $0x70] sm:$0xf]  ;;  %v5191_v2 = vld [vmem:[%s4094_s25 + $0x5c] sm:$0x1] }
 0x12d   : >> { %6095 = vst [vmem:[#allocation35_spill] sm:$0xff] %v5133_v29  ;;  %6097 = vst [vmem:[#allocation23_spill] sm:$0xff] %v5140_v15  ;;  %v1565_v17 = vmul.bf16 %v5127_v6, %v3122_v7  ;;  %v1566_v38 = vmul.bf16 %v5127_v6, %v5109_v60  ;;  %v1567_v61 = vmul.bf16 %v5127_v6, %v5121_v25 }
 0x12e   : >> { %6099 = vst [vmem:[#allocation26_spill] sm:$0xff] %v5146_v39  ;;  %6100 = vst [vmem:[#allocation24_spill] sm:$0xff] %v5148_v53  ;;  %v1568_v59 = vmul.bf16 %v5127_v6, %v3125_v19  ;;  %v1569_v36 = vmul.bf16 %v5127_v6, %v5125_v40  ;;  %v1570_v55 = vmul.bf16 %v5127_v6, %v5136_v5  ;;  %v5200_v19 = vld [vmem:[%s4094_s25 + $0x68] sm:$0x1]  ;;  %v1587_v40 = vunpack.c.l.bf16 %v1563_v45 }
 0x12f   : >> { %6103 = vst [vmem:[#allocation32_spill] sm:$0xff] %v5167_v47  ;;  %6104 = vst [vmem:[#allocation39_spill] sm:$0xff] %v5177_v32  ;;  %v1571_v30 = vmul.bf16 %v5127_v6, %v3128_v41  ;;  %v1572_v14 = vmul.bf16 %v5127_v6, %v5140_v15  ;;  %v1573_v54 = vmul.bf16 %v5127_v6, %v5143_v13  ;;  %v5203_v41 = vld [vmem:[%s4094_s25 + $0x74] sm:$0x1]  ;;  %v1588_v25 = vunpack.c.l.bf16 %v1564_v52 }
 0x130   : >> { %6105 = vst [vmem:[#allocation41_spill] sm:$0xff] %v5181_v57  ;;  %6106 = vst [vmem:[#allocation31_spill] sm:$0xff] %v5191_v2  ;;  %v1574_v48 = vmul.bf16 %v5127_v6, %v3131_v20  ;;  %v1575_v28 = vmul.bf16 %v5127_v6, %v5152_v42  ;;  %v1576_v49 = vmul.bf16 %v5127_v6, %v5177_v32  ;;  %v1590_v43 = vunpack.c.l.bf16 %v1566_v38 }
 0x131   : >> { %v1577_v7 = vmul.bf16 %v5127_v6, %v3134_v26  ;;  %6107 = vst [vmem:[#allocation42_spill] sm:$0xff] %v5200_v19  ;;  %v1578_v50 = vmul.bf16 %v5127_v6, %v5163_v4  ;;  %v1579_v13 = vmul.bf16 %v5127_v6, %v5191_v2  ;;  %v1580_v20 = vmul.bf16 %v5127_v6, %v3137_v22 }
 0x132   : >> { %v1581_v42 = vmul.bf16 %v5127_v6, %v5167_v47  ;;  %v1582_v32 = vmul.bf16 %v5127_v6, %v5200_v19  ;;  %v1583_v26 = vmul.bf16 %v5127_v6, %v3140_v34  ;;  %v1584_v15 = vmul.bf16 %v5127_v6, %v5181_v57 }
 0x133   : >> { %v1585_v5 = vmul.bf16 %v5127_v6, %v5203_v41  ;;  %v1586_v4 = vunpack.c.l.bf16 %v1562_v33  ;;  %v1589_v2 = vunpack.c.l.bf16 %v1565_v17  ;;  %v1591_v22 = vunpack.c.l.bf16 %v1567_v61 }
 0x134   : >> { %v1592_v60 = vunpack.c.l.bf16 %v1568_v59  ;;  %v1593_v58 = vunpack.c.l.bf16 %v1569_v36  ;;  %v1594_v47 = vunpack.c.l.bf16 %v1570_v55  ;;  %v1595_v53 = vunpack.c.l.bf16 %v1571_v30 }
 0x135   : >> { %v1596_v39 = vunpack.c.l.bf16 %v1572_v14  ;;  %v1597_v19 = vunpack.c.l.bf16 %v1573_v54  ;;  %v1598_v29 = vunpack.c.l.bf16 %v1574_v48  ;;  %v1599_v34 = vunpack.c.l.bf16 %v1575_v28  ;;  %v5326_v54 = vld [vmem:[%s4094_s25 + $0x48] sm:$0xe]  ;;  %v6134_v14 = vld [vmem:[#allocation40_spill] sm:$0xff] }
 0x136   : >> { %v1600_v44 = vunpack.c.l.bf16 %v1576_v49  ;;  %v1601_v24 = vunpack.c.l.bf16 %v1577_v7  ;;  %v1602_v57 = vunpack.c.l.bf16 %v1578_v50  ;;  %v1603_v9 = vunpack.c.l.bf16 %v1579_v13  ;;  %v6126_v49 = vld [vmem:[#allocation37_spill] sm:$0xff]  ;;  %v6135_v55 = vld [vmem:[#allocation39_spill] sm:$0xff] }
 0x137   : >> { %v1604_v35 = vunpack.c.l.bf16 %v1580_v20  ;;  %v1605_v6 = vunpack.c.l.bf16 %v1581_v42  ;;  %v1606_v33 = vunpack.c.l.bf16 %v1582_v32  ;;  %v1607_v45 = vunpack.c.l.bf16 %v1583_v26  ;;  %v5336_v20 = vld [vmem:[%s4094_s25 + $0x60] sm:$0xe] }
 0x138   : >> { %v1608_v52 = vunpack.c.l.bf16 %v1584_v15  ;;  %v1609_v17 = vunpack.c.l.bf16 %v1585_v5  ;;  %v5220_v38 = vadd.f32 %v1586_v4, %v5034_v37  ;;  %v5223_v61 = vadd.f32 %v1587_v40, %v5037_v63  ;;  %v5304_v40 = vld [vmem:[%s4094_s25 + $0x30] sm:$0xe]  ;;  %v6136_v4 = vld [vmem:[#allocation30_spill] sm:$0xff] }
 0x139   : >> { %v5226_v59 = vadd.f32 %v1588_v25, %v5041_v23  ;;  %v5229_v36 = vadd.f32 %v1589_v2, %v5044_v21  ;;  %v5232_v50 = vadd.f32 %v1590_v43, %v5047_v18  ;;  %v5235_v13 = vadd.f32 %v1591_v22, %v5050_v1  ;;  %v6111_v43 = vld [vmem:[#allocation34_spill] sm:$0xff]  ;;  %v5329_v2 = vld [vmem:[%s4094_s25 + $0x54] sm:$0xe] }
 0x13a   : >> { %v5238_v37 = vadd.f32 %v1592_v60, %v5053_v10  ;;  %v5241_v5 = vadd.f32 %v1593_v58, %v5056_v27  ;;  %v5244_v63 = vadd.f32 %v1594_v47, %v5059_v62  ;;  %v5247_v23 = vadd.f32 %v1595_v53, %v5062_v51  ;;  %v5268_v51 = vld [vmem:[%s4094_s25 + $0x20] sm:$0x3]  ;;  %v6112_v60 = vld [vmem:[#allocation43_spill] sm:$0xff]  ;;  %6118 = vst [vmem:[#allocation34_spill] sm:$0xff] %v5304_v40  ;;  %v6121_v53 = vld [vmem:[#allocation25_spill] sm:$0xff] }
 0x13b   : >> { %v5250_v21 = vadd.f32 %v1596_v39, %v5070_v16  ;;  %v5253_v18 = vadd.f32 %v1597_v19, %v5073_v3  ;;  %v5256_v1 = vadd.f32 %v1598_v29, %v5076_v11  ;;  %v5259_v10 = vadd.f32 %v1599_v34, %v5079_v12  ;;  %6108 = vst [vmem:[#allocation28_spill] sm:$0xff] %v5268_v51  ;;  %v6109_v12 = vld [vmem:[#allocation33_spill] sm:$0xff]  ;;  %v6128_v22 = vld [vmem:[#allocation44_spill] sm:$0xff]  ;;  %v6137_v39 = vld [vmem:[#allocation31_spill] sm:$0xff] }
 0x13c   : >> { %v5262_v27 = vadd.f32 %v1600_v44, %v5082_v46  ;;  %v5265_v62 = vadd.f32 %v1601_v24, %v5093_v56  ;;  %v5271_v16 = vadd.f32 %v1602_v57, %v5096_v31  ;;  %v5274_v3 = vadd.f32 %v1603_v9, %v5099_v8  ;;  %v5283_v46 = vld [vmem:[%s4094_s25 + $0x2c] sm:$0x3]  ;;  %v6113_v31 = vld [vmem:[#allocation29_spill] sm:$0xff]  ;;  %v6119_v44 = vld [vmem:[#allocation26_spill] sm:$0xff] }
 0x13d   : >> { %v5277_v11 = vadd.f32 %v1604_v35, %v5102_v0  ;;  %v5280_v58 = vadd.f32 %v1605_v6, %v6109_v12  ;;  %6110 = vst [vmem:[#allocation27_spill] sm:$0xff] %v5283_v46  ;;  %v5286_v56 = vadd.f32 %v1606_v33, %v6111_v43  ;;  %v5289_v24 = vadd.f32 %v1607_v45, %v6112_v60  ;;  %v6114_v8 = vld [vmem:[#allocation35_spill] sm:$0xff]  ;;  %v5298_v0 = vld [vmem:[%s4094_s25 + $0x18] sm:$0xe]  ;;  %v5315_v47 = vld [vmem:[%s4094_s25 + $0x3c] sm:$0xe] }
 0x13e   : >> { %v5292_v25 = vadd.f32 %v1608_v52, %v6113_v31  ;;  %v5295_v9 = vadd.f32 %v1609_v17, %v6114_v8  ;;  %6116 = vst [vmem:[#allocation22_spill] sm:$0xff] %v5298_v0  ;;  %v5301_v35 = vld [vmem:[%s4094_s25 + $0x24] sm:$0xe]  ;;  %v3152_v29 = vcombine.low %v6119_v44, %v6119_v44  ;;  %6122 = vst [vmem:[#allocation43_spill] sm:$0xff] %v5315_v47  ;;  %v6129_v33 = vld [vmem:[#allocation45_spill] sm:$0xff] }
 0x13f   : >> { %6117 = vst [vmem:[#allocation33_spill] sm:$0xff] %v5301_v35  ;;  %v6123_v57 = vld [vmem:[#allocation38_spill] sm:$0xff]  ;;  %6124 = vst [vmem:[#allocation29_spill] sm:$0xff] %v5326_v54  ;;  %v5343_v52 = vld [vmem:[%s4094_s25 + $0x6c] sm:$0xe] }
 0x140   : >> { %6115 = vst [vmem:[#allocation21_spill] sm:$0xff] %v5295_v9  ;;  %6125 = vst [vmem:[#allocation35_spill] sm:$0xff] %v5329_v2  ;;  %v1653_v48 = vmul.bf16 %v3152_v29, %v5298_v0  ;;  %v1654_v28 = vmul.bf16 %v3152_v29, %v6121_v53  ;;  %v1655_v7 = vmul.bf16 %v3152_v29, %v6126_v49  ;;  %v6131_v17 = vld [vmem:[#allocation46_spill] sm:$0xff]  ;;  %v6132_v60 = vld [vmem:[#allocation23_spill] sm:$0xff] }
 0x141   : >> { %v1656_v19 = vmul.bf16 %v3152_v29, %v5301_v35  ;;  %6127 = vst [vmem:[#allocation26_spill] sm:$0xff] %v5336_v20  ;;  %v1657_v26 = vmul.bf16 %v3152_v29, %v6123_v57  ;;  %v1658_v34 = vmul.bf16 %v3152_v29, %v6128_v22  ;;  %v1659_v6 = vmul.bf16 %v3152_v29, %v5304_v40  ;;  %v6133_v8 = vld [vmem:[#allocation36_spill] sm:$0xff]  ;;  %v6139_v35 = vld [vmem:[#allocation42_spill] sm:$0xff]  ;;  %v6140_v53 = vld [vmem:[#allocation41_spill] sm:$0xff] }
 0x142   : >> { %v1660_v45 = vmul.bf16 %v3152_v29, %v6129_v33  ;;  %6130 = vst [vmem:[#allocation37_spill] sm:$0xff] %v5343_v52  ;;  %v1661_v12 = vmul.bf16 %v3152_v29, %v6131_v17  ;;  %v1662_v43 = vmul.bf16 %v3152_v29, %v5315_v47  ;;  %v1663_v31 = vmul.bf16 %v3152_v29, %v6132_v60  ;;  %v6138_v46 = vld [vmem:[#allocation32_spill] sm:$0xff] }
 0x143   : >> { %v1664_v44 = vmul.bf16 %v3152_v29, %v6133_v8  ;;  %v1665_v49 = vmul.bf16 %v3152_v29, %v5326_v54  ;;  %v1666_v30 = vmul.bf16 %v3152_v29, %v6134_v14  ;;  %v1667_v22 = vmul.bf16 %v3152_v29, %v6135_v55 }
 0x144   : >> { %v1668_v32 = vmul.bf16 %v3152_v29, %v5329_v2  ;;  %v1669_v42 = vmul.bf16 %v3152_v29, %v6136_v4  ;;  %v1670_v40 = vmul.bf16 %v3152_v29, %v6137_v39  ;;  %v1671_v17 = vmul.bf16 %v3152_v29, %v5336_v20 }
 0x145   : >> { %v1672_v57 = vmul.bf16 %v3152_v29, %v6138_v46  ;;  %v1673_v51 = vmul.bf16 %v3152_v29, %v6139_v35  ;;  %v1674_v8 = vmul.bf16 %v3152_v29, %v5343_v52  ;;  %v1675_v0 = vmul.bf16 %v3152_v29, %v6140_v53 }
 0x146   : >> { %v1676_v14 = vmul.bf16 %v3152_v29, %v5203_v41  ;;  %v1677_v54 = vunpack.c.l.bf16 %v1653_v48  ;;  %v1678_v55 = vunpack.c.l.bf16 %v1654_v28  ;;  %v5361_v60 = vunpack.c.l.bf16 %v1655_v7 }
 0x147   : >> { %v1680_v2 = vunpack.c.l.bf16 %v1656_v19  ;;  %v1681_v4 = vunpack.c.l.bf16 %v1657_v26  ;;  %v5363_v47 = vunpack.c.l.bf16 %v1658_v34  ;;  %v1683_v39 = vunpack.c.l.bf16 %v1659_v6 }
 0x148   : >> { %v1684_v20 = vunpack.c.l.bf16 %v1660_v45  ;;  %v5365_v15 = vunpack.c.l.bf16 %v1661_v12  ;;  %v1686_v46 = vunpack.c.l.bf16 %v1662_v43  ;;  %v1687_v35 = vunpack.c.l.bf16 %v1663_v31 }
 0x149   : >> { %v5367_v33 = vunpack.c.l.bf16 %v1664_v44  ;;  %v1689_v52 = vunpack.c.l.bf16 %v1665_v49  ;;  %v1690_v53 = vunpack.c.l.bf16 %v1666_v30  ;;  %v5369_v9 = vunpack.c.l.bf16 %v1667_v22 }
 0x14a   : >> { %v1692_v41 = vunpack.c.l.bf16 %v1668_v32  ;;  %v1693_v29 = vunpack.c.l.bf16 %v1669_v42  ;;  %v5371_v48 = vunpack.c.l.bf16 %v1670_v40  ;;  %v1695_v28 = vunpack.c.l.bf16 %v1671_v17 }
 0x14b   : >> { %v1696_v7 = vunpack.c.l.bf16 %v1672_v57  ;;  %v5373_v19 = vunpack.c.l.bf16 %v1673_v51  ;;  %v1698_v26 = vunpack.c.l.bf16 %v1674_v8  ;;  %v1699_v34 = vunpack.c.l.bf16 %v1675_v0 }
 0x14c   : >> { %v5375_v6 = vunpack.c.l.bf16 %v1676_v14  ;;  %v1725_v45 = vrot.slane %v1677_v54, 1  ;;  %v1726_v12 = vrot.slane %v1678_v55, 1  ;;  %v1728_v43 = vrot.slane %v5361_v60, 1 }
 0x14d   : >> { %v1730_v31 = vrot.slane %v1680_v2, 1  ;;  %v1731_v30 = vrot.slane %v1681_v4, 1  ;;  %v1733_v44 = vrot.slane %v5363_v47, 1  ;;  %v1735_v32 = vrot.slane %v1683_v39, 1 }
 0x14e   : >> { %v1736_v42 = vrot.slane %v1684_v20, 1  ;;  %v1727_v40 = vsel %vm785_vm3, %v1725_v45, %v1726_v12  ;;  %v1729_v57 = vsel %vm785_vm3, %v1726_v12, %v1728_v43  ;;  %v1738_v51 = vrot.slane %v5365_v15, 1 }
 0x14f   : >> { %v1740_v49 = vrot.slane %v1686_v46, 1  ;;  %v1732_v0 = vsel %vm785_vm3, %v1730_v31, %v1731_v30  ;;  %v1734_v14 = vsel %vm785_vm3, %v1731_v30, %v1733_v44  ;;  %v1741_v60 = vrot.slane %v1687_v35, 1 }
 0x150   : >> { %v1737_v54 = vsel %vm785_vm3, %v1735_v32, %v1736_v42  ;;  %v1739_v4 = vsel %vm785_vm3, %v1736_v42, %v1738_v51  ;;  %v1743_v47 = vrot.slane %v5367_v33, 1  ;;  %v1745_v2 = vrot.slane %v1689_v52, 1 }
 0x151   : >> { %v1746_v20 = vrot.slane %v1690_v53, 1  ;;  %v1742_v22 = vsel %vm785_vm3, %v1740_v49, %v1741_v60  ;;  %v1748_v17 = vrot.slane %v5369_v9, 1  ;;  %v1750_v8 = vrot.slane %v1692_v41, 1  ;;  %v6144_v49 = vld [vmem:[#allocation24_spill] sm:$0xff] }
 0x152   : >> { %v1751_v15 = vrot.slane %v1693_v29, 1  ;;  %v1744_v46 = vsel %vm785_vm3, %v1741_v60, %v1743_v47  ;;  %v1753_v39 = vrot.slane %v5371_v48, 1  ;;  %v1755_v45 = vrot.slane %v1695_v28, 1  ;;  %v3160_v60 = vld [vmem:[%s4094_s25 + $0x74] sm:$0x3] }
 0x153   : >> { %v1747_v55 = vsel %vm785_vm3, %v1745_v2, %v1746_v20  ;;  %v1749_v35 = vsel %vm785_vm3, %v1746_v20, %v1748_v17  ;;  %v1756_v33 = vrot.slane %v1696_v7, 1  ;;  %v1758_v53 = vrot.slane %v5373_v19, 1  ;;  %v6148_v2 = vld [vmem:[#allocation40_spill] sm:$0xff] }
 0x154   : >> { %v1752_v12 = vsel %vm785_vm3, %v1750_v8, %v1751_v15  ;;  %v1754_v52 = vsel %vm785_vm3, %v1751_v15, %v1753_v39  ;;  %v1760_v31 = vrot.slane %v1698_v26, 1  ;;  %v1761_v9 = vrot.slane %v1699_v34, 1  ;;  %v6150_v15 = vld [vmem:[#allocation30_spill] sm:$0xff] }
 0x155   : >> { %v1763_v41 = vrot.slane %v5375_v6, 1  ;;  %v1757_v29 = vsel %vm785_vm3, %v1755_v45, %v1756_v33  ;;  %v1759_v30 = vsel %vm785_vm3, %v1756_v33, %v1758_v53  ;;  %v5400_v48 = vadd.f32 %v1727_v40, %v5220_v38  ;;  %v6141_v40 = vld [vmem:[#allocation21_spill] sm:$0xff] }
 0x156   : >> { %v5403_v28 = vadd.f32 %v1729_v57, %v5223_v61  ;;  %v1762_v7 = vsel %vm785_vm3, %v1760_v31, %v1761_v9  ;;  %v5408_v26 = vadd.f32 %v1728_v43, %v5226_v59  ;;  %v5411_v34 = vadd.f32 %v1732_v0, %v5229_v36  ;;  %v3155_v43 = vld [vmem:[%s4094_s25 + $0x38] sm:$0x3]  ;;  %v3158_v57 = vld [vmem:[%s4094_s25 + $0x5c] sm:$0x3] }
 0x157   : >> { %v1764_v19 = vsel %vm785_vm3, %v1761_v9, %v1763_v41  ;;  %v5414_v6 = vadd.f32 %v1734_v14, %v5232_v50  ;;  %v5417_v38 = vadd.f32 %v1733_v44, %v5235_v13  ;;  %v5420_v61 = vadd.f32 %v1737_v54, %v5238_v37  ;;  %v3156_v44 = vld [vmem:[%s4094_s25 + $0x44] sm:$0x3]  ;;  %v6145_v14 = vld [vmem:[#allocation43_spill] sm:$0xff]  ;;  %v6154_v31 = vld [vmem:[#allocation41_spill] sm:$0xff] }
 0x158   : >> { %v5423_v32 = vadd.f32 %v1739_v4, %v5241_v5  ;;  %v5426_v59 = vadd.f32 %v1738_v51, %v5244_v63  ;;  %v5429_v36 = vadd.f32 %v1742_v22, %v5247_v23  ;;  %v5432_v50 = vadd.f32 %v1744_v46, %v5250_v21  ;;  %v6143_v51 = vld [vmem:[#allocation45_spill] sm:$0xff]  ;;  %v6146_v54 = vld [vmem:[#allocation23_spill] sm:$0xff] }
 0x159   : >> { %v5435_v13 = vadd.f32 %v1743_v47, %v5253_v18  ;;  %v5438_v37 = vadd.f32 %v1747_v55, %v5256_v1  ;;  %v5441_v5 = vadd.f32 %v1749_v35, %v5259_v10  ;;  %v5444_v63 = vadd.f32 %v1748_v17, %v5262_v27  ;;  %v3157_v27 = vld [vmem:[%s4094_s25 + $0x50] sm:$0x3]  ;;  %v6147_v4 = vld [vmem:[#allocation29_spill] sm:$0xff]  ;;  %v6149_v17 = vld [vmem:[#allocation35_spill] sm:$0xff] }
 0x15a   : >> { %v5447_v23 = vadd.f32 %v1752_v12, %v5265_v62  ;;  %v5451_v21 = vadd.f32 %v1754_v52, %v5271_v16  ;;  %v5454_v18 = vadd.f32 %v1753_v39, %v5274_v3  ;;  %v5457_v1 = vadd.f32 %v1757_v29, %v5277_v11  ;;  %v3159_v11 = vld [vmem:[%s4094_s25 + $0x68] sm:$0x3]  ;;  %v6151_v39 = vld [vmem:[#allocation26_spill] sm:$0xff]  ;;  %v6152_v35 = vld [vmem:[#allocation32_spill] sm:$0xff] }
 0x15b   : >> { %v5460_v10 = vadd.f32 %v1759_v30, %v5280_v58  ;;  %v5465_v42 = vadd.f32 %v1758_v53, %v5286_v56  ;;  %v5468_v62 = vadd.f32 %v1762_v7, %v5289_v24  ;;  %v5471_v16 = vadd.f32 %v1764_v19, %v5292_v25  ;;  %v6153_v53 = vld [vmem:[#allocation37_spill] sm:$0xff]  ;;  %v6155_v29 = vld [vmem:[#allocation22_spill] sm:$0xff] }
 0x15c   : >> { %v5474_v3 = vadd.f32 %v1763_v41, %v6141_v40  ;;  %v1839_v58 = vmul.bf16 %v6144_v49, %v6143_v51  ;;  %v1840_v0 = vmul.bf16 %v6144_v49, %v3155_v43  ;;  %v1841_v56 = vmul.bf16 %v6144_v49, %v6145_v14  ;;  %v6157_v19 = vld [vmem:[#allocation25_spill] sm:$0xff] }
 0x15d   : >> { %v1842_v24 = vmul.bf16 %v6144_v49, %v6146_v54  ;;  %v1843_v25 = vmul.bf16 %v6144_v49, %v3156_v44  ;;  %v1844_v47 = vmul.bf16 %v6144_v49, %v6147_v4  ;;  %v1845_v20 = vmul.bf16 %v6144_v49, %v6148_v2  ;;  %v6163_v54 = vld [vmem:[#allocation38_spill] sm:$0xff]  ;;  %v6165_v2 = vld [vmem:[#allocation27_spill] sm:$0xff] }
 0x15e   : >> { %6142 = vst [vmem:[#allocation44_spill] sm:$0xff] %v5474_v3  ;;  %v1846_v22 = vmul.bf16 %v6144_v49, %v3157_v27  ;;  %v1847_v8 = vmul.bf16 %v6144_v49, %v6149_v17  ;;  %v1848_v46 = vmul.bf16 %v6144_v49, %v6150_v15  ;;  %v1849_v55 = vmul.bf16 %v6144_v49, %v3158_v57  ;;  %v6159_v27 = vld [vmem:[#allocation28_spill] sm:$0xff] }
 0x15f   : >> { %v1850_v45 = vmul.bf16 %v6144_v49, %v6151_v39  ;;  %v1851_v12 = vmul.bf16 %v6144_v49, %v6152_v35  ;;  %v1852_v33 = vmul.bf16 %v6144_v49, %v3159_v11  ;;  %v1853_v52 = vmul.bf16 %v6144_v49, %v6153_v53  ;;  %v6161_v11 = vld [vmem:[#allocation33_spill] sm:$0xff]  ;;  %v6167_v39 = vld [vmem:[#allocation34_spill] sm:$0xff] }
 0x160   : >> { %v1854_v9 = vmul.bf16 %v6144_v49, %v6154_v31  ;;  %v1855_v41 = vmul.bf16 %v6144_v49, %v3160_v60  ;;  %v6156_v30 = vmul.bf16 %v6144_v49, %v6155_v29  ;;  %v6158_v43 = vmul.bf16 %v6144_v49, %v6157_v19 }
 0x161   : >> { %v6160_v40 = vmul.bf16 %v6144_v49, %v6159_v27  ;;  %v6162_v51 = vmul.bf16 %v6144_v49, %v6161_v11  ;;  %v6164_v60 = vmul.bf16 %v6144_v49, %v6163_v54  ;;  %v6166_v17 = vmul.bf16 %v6144_v49, %v6165_v2 }
 0x162   : >> { %v1856_v7 = vunpack.c.l.bf16 %v6156_v30  ;;  %v1857_v44 = vunpack.c.l.bf16 %v6158_v43  ;;  %v6168_v35 = vmul.bf16 %v6144_v49, %v6167_v39  ;;  %v1863_v31 = vunpack.c.l.bf16 %v1839_v58 }
 0x163   : >> { %v5516_v57 = vunpack.c.l.bf16 %v6160_v40  ;;  %v1859_v14 = vunpack.c.l.bf16 %v6162_v51  ;;  %v1860_v4 = vunpack.c.l.bf16 %v6164_v60  ;;  %v5527_v15 = vunpack.c.l.bf16 %v6166_v17 }
 0x164   : >> { %v1862_v53 = vunpack.c.l.bf16 %v6168_v35  ;;  %v5532_v29 = vunpack.c.l.bf16 %v1840_v0  ;;  %v1865_v30 = vunpack.c.l.bf16 %v1841_v56  ;;  %v1866_v19 = vunpack.c.l.bf16 %v1842_v24 }
 0x165   : >> { %v5534_v43 = vunpack.c.l.bf16 %v1843_v25  ;;  %v1868_v27 = vunpack.c.l.bf16 %v1844_v47  ;;  %v1869_v40 = vunpack.c.l.bf16 %v1845_v20  ;;  %v5536_v11 = vunpack.c.l.bf16 %v1846_v22 }
 0x166   : >> { %v1871_v51 = vunpack.c.l.bf16 %v1847_v8  ;;  %v1872_v54 = vunpack.c.l.bf16 %v1848_v46  ;;  %v5538_v60 = vunpack.c.l.bf16 %v1849_v55  ;;  %v1874_v2 = vunpack.c.l.bf16 %v1850_v45 }
 0x167   : >> { %v1875_v17 = vunpack.c.l.bf16 %v1851_v12  ;;  %v5540_v3 = vunpack.c.l.bf16 %v1852_v33  ;;  %v1877_v49 = vunpack.c.l.bf16 %v1853_v52  ;;  %v1878_v58 = vunpack.c.l.bf16 %v1854_v9 }
 0x168   : >> { %v5542_v0 = vunpack.c.l.bf16 %v1855_v41  ;;  %v1904_v56 = vrot.slane %v1856_v7, 2  ;;  %v1905_v24 = vrot.slane %v1857_v44, 2  ;;  %v1907_v25 = vrot.slane %v5516_v57, 2 }
 0x169   : >> { %v1909_v47 = vrot.slane %v1859_v14, 2  ;;  %v1910_v20 = vrot.slane %v1860_v4, 2  ;;  %v1912_v22 = vrot.slane %v5527_v15, 2  ;;  %v1914_v8 = vrot.slane %v1862_v53, 2 }
 0x16a   : >> { %v1906_v46 = vsel %vm965_vm4, %v1904_v56, %v1905_v24  ;;  %v1908_v55 = vsel %vm965_vm4, %v1905_v24, %v1907_v25  ;;  %v1915_v45 = vrot.slane %v1863_v31, 2  ;;  %v1917_v12 = vrot.slane %v5532_v29, 2 }
 0x16b   : >> { %v1911_v33 = vsel %vm965_vm4, %v1909_v47, %v1910_v20  ;;  %v1913_v52 = vsel %vm965_vm4, %v1910_v20, %v1912_v22  ;;  %v1919_v9 = vrot.slane %v1865_v30, 2  ;;  %v1920_v41 = vrot.slane %v1866_v19, 2 }
 0x16c   : >> { %v1916_v7 = vsel %vm965_vm4, %v1914_v8, %v1915_v45  ;;  %v1918_v44 = vsel %vm965_vm4, %v1915_v45, %v1917_v12  ;;  %v1922_v57 = vrot.slane %v5534_v43, 2  ;;  %v1924_v14 = vrot.slane %v1868_v27, 2 }
 0x16d   : >> { %v1921_v4 = vsel %vm965_vm4, %v1919_v9, %v1920_v41  ;;  %v1925_v15 = vrot.slane %v1869_v40, 2  ;;  %v1927_v39 = vrot.slane %v5536_v11, 2  ;;  %v1929_v35 = vrot.slane %v1871_v51, 2 }
 0x16e   : >> { %v1923_v53 = vsel %vm965_vm4, %v1920_v41, %v1922_v57  ;;  %v1930_v31 = vrot.slane %v1872_v54, 2  ;;  %v1932_v29 = vrot.slane %v5538_v60, 2  ;;  %v1934_v30 = vrot.slane %v1874_v2, 2 }
 0x16f   : >> { %v1926_v19 = vsel %vm965_vm4, %v1924_v14, %v1925_v15  ;;  %v1928_v56 = vsel %vm965_vm4, %v1925_v15, %v1927_v39  ;;  %v1935_v24 = vrot.slane %v1875_v17, 2  ;;  %v1937_v43 = vrot.slane %v5540_v3, 2 }
 0x170   : >> { %v1931_v27 = vsel %vm965_vm4, %v1929_v35, %v1930_v31  ;;  %v1933_v40 = vsel %vm965_vm4, %v1930_v31, %v1932_v29  ;;  %v1939_v47 = vrot.slane %v1877_v49, 2  ;;  %v1940_v11 = vrot.slane %v1878_v58, 2 }
 0x171   : >> { %v1936_v51 = vsel %vm965_vm4, %v1934_v30, %v1935_v24  ;;  %v1938_v54 = vsel %vm965_vm4, %v1935_v24, %v1937_v43  ;;  %v1942_v60 = vrot.slane %v5542_v0, 2  ;;  %v1968_v2 = vadd.f32 %v1906_v46, %v5400_v48 }
 0x172   : >> { %v1941_v20 = vsel %vm965_vm4, %v1939_v47, %v1940_v11  ;;  %v1969_v17 = vadd.f32 %v1908_v55, %v5403_v28  ;;  %v1970_v3 = vadd.f32 %v1907_v25, %v5408_v26  ;;  %v1971_v8 = vadd.f32 %v1911_v33, %v5411_v34  ;;  %v6170_v55 = vld [vmem:[#allocation20_spill] sm:$0xff] }
 0x173   : >> { %v1943_v45 = vsel %vm965_vm4, %v1940_v11, %v1942_v60  ;;  %v1972_v49 = vadd.f32 %v1913_v52, %v5414_v6  ;;  %v1973_v58 = vadd.f32 %v1912_v22, %v5417_v38  ;;  %v1974_v9 = vadd.f32 %v1916_v7, %v5420_v61  ;;  %v6169_v22 = vld [vmem:[#allocation44_spill] sm:$0xff] }
 0x174   : >> { %v1975_v0 = vadd.f32 %v1918_v44, %v5423_v32  ;;  %v1976_v48 = vadd.f32 %v1917_v12, %v5426_v59  ;;  %v1977_v46 = vadd.f32 %v1921_v4, %v5429_v36  ;;  %v1978_v28 = vadd.f32 %v1923_v53, %v5432_v50 }
 0x175   : >> { %v1979_v26 = vadd.f32 %v1922_v57, %v5435_v13  ;;  %v1980_v34 = vadd.f32 %v1926_v19, %v5438_v37  ;;  %v1981_v25 = vadd.f32 %v1928_v56, %v5441_v5  ;;  %v1982_v6 = vadd.f32 %v1927_v39, %v5444_v63 }
 0x176   : >> { %v1983_v38 = vadd.f32 %v1931_v27, %v5447_v23  ;;  %v1984_v61 = vadd.f32 %v1933_v40, %v5451_v21  ;;  %v1985_v32 = vadd.f32 %v1932_v29, %v5454_v18  ;;  %v1986_v59 = vadd.f32 %v1936_v51, %v5457_v1 }
 0x177   : >> { %v1987_v36 = vadd.f32 %v1938_v54, %v5460_v10  ;;  %v1988_v50 = vadd.f32 %v1937_v43, %v5465_v42  ;;  %v1989_v13 = vadd.f32 %v1941_v20, %v5468_v62  ;;  %v1990_v37 = vadd.f32 %v1943_v45, %v5471_v16 }
 0x178   : >> { %v1991_v5 = vadd.f32 %v1942_v60, %v6169_v22  ;;  %v1998_v63 = vadd.f32 %v6170_v55, %v1968_v2  ;;  %v1999_v23 = vadd.f32 %v6170_v55, %v1969_v17  ;;  %v2000_v21 = vadd.f32 %v6170_v55, %v1970_v3 }
 0x179   : >> { %v2001_v18 = vadd.f32 %v6170_v55, %v1971_v8  ;;  %v2002_v1 = vadd.f32 %v6170_v55, %v1972_v49  ;;  %v2003_v10 = vadd.f32 %v6170_v55, %v1973_v58  ;;  %v2004_v42 = vadd.f32 %v6170_v55, %v1974_v9 }
 0x17a   : >> { %v2005_v62 = vadd.f32 %v6170_v55, %v1975_v0  ;;  %v2006_v16 = vadd.f32 %v6170_v55, %v1976_v48  ;;  %v2007_v12 = vadd.f32 %v6170_v55, %v1977_v46  ;;  %v2008_v33 = vadd.f32 %v6170_v55, %v1978_v28 }
 0x17b   : >> { %v2009_v52 = vadd.f32 %v6170_v55, %v1979_v26  ;;  %v2010_v41 = vadd.f32 %v6170_v55, %v1980_v34  ;;  %v2011_v7 = vadd.f32 %v6170_v55, %v1981_v25  ;;  %v2012_v44 = vadd.f32 %v6170_v55, %v1982_v6 }
 0x17c   : >> { %v2013_v57 = vadd.f32 %v6170_v55, %v1983_v38  ;;  %v2014_v14 = vadd.f32 %v6170_v55, %v1984_v61  ;;  %v2015_v4 = vadd.f32 %v6170_v55, %v1985_v32  ;;  %v2016_v15 = vadd.f32 %v6170_v55, %v1986_v59 }
 0x17d   : >> { %v2017_v39 = vadd.f32 %v6170_v55, %v1987_v36  ;;  %v2018_v35 = vadd.f32 %v6170_v55, %v1988_v50  ;;  %v2019_v53 = vadd.f32 %v6170_v55, %v1989_v13  ;;  %v2020_v31 = vadd.f32 %v6170_v55, %v1990_v37 }
 0x17e   : >> { %v2021_v29 = vadd.f32 %v6170_v55, %v1991_v5  ;;  %v2022_v30 = vmax.f32 %v1998_v63, 0.0  ;;  %v2023_v19 = vmax.f32 %v1999_v23, 0.0  ;;  %v2024_v56 = vmax.f32 %v2000_v21, 0.0  ;;  %v3597_v55 = vld [vmem:[#allocation9 + $0x18] sm:$0xff] (%p602_p8)  }
 0x17f   : >> { %v2025_v24 = vmax.f32 %v2001_v18, 0.0  ;;  %v2026_v43 = vmax.f32 %v2002_v1, 0.0  ;;  %v2027_v27 = vmax.f32 %v2003_v10, 0.0  ;;  %v2028_v40 = vmax.f32 %v2004_v42, 0.0 }
 0x180   : >> { %v2029_v47 = vmax.f32 %v2005_v62, 0.0  ;;  %v2030_v11 = vmax.f32 %v2006_v16, 0.0  ;;  %v2031_v51 = vmax.f32 %v2007_v12, 0.0  ;;  %v2032_v54 = vmax.f32 %v2008_v33, 0.0 }
 0x181   : >> { %v2033_v60 = vmax.f32 %v2009_v52, 0.0  ;;  %v2034_v2 = vmax.f32 %v2010_v41, 0.0  ;;  %v2035_v20 = vmax.f32 %v2011_v7, 0.0  ;;  %v2036_v17 = vmax.f32 %v2012_v44, 0.0 }
 0x182   : >> { %v2037_v3 = vmax.f32 %v2013_v57, 0.0  ;;  %v2038_v8 = vmax.f32 %v2014_v14, 0.0  ;;  %v2039_v45 = vmax.f32 %v2015_v4, 0.0  ;;  %v2040_v49 = vmax.f32 %v2016_v15, 0.0 }
 0x183   : >> { %v2041_v58 = vmax.f32 %v2017_v39, 0.0  ;;  %v2042_v9 = vmax.f32 %v2018_v35, 0.0  ;;  %v2043_v0 = vmax.f32 %v2019_v53, 0.0  ;;  %v2044_v48 = vmax.f32 %v2020_v31, 0.0 }
 0x184   : >> { %v2045_v46 = vmax.f32 %v2021_v29, 0.0  ;;  %v3253_v28 = vpack.c.bf16 %v2022_v30, %v2022_v30  ;;  %v3254_v26 = vpack.c.bf16 %v2023_v19, %v2023_v19  ;;  %v3255_v34 = vpack.c.bf16 %v2024_v56, %v2024_v56 }
 0x185   : >> { %v3256_v25 = vpack.c.bf16 %v2025_v24, %v2025_v24  ;;  %v3257_v6 = vpack.c.bf16 %v2026_v43, %v2026_v43  ;;  %v3258_v38 = vpack.c.bf16 %v2027_v27, %v2027_v27  ;;  %v3259_v61 = vpack.c.bf16 %v2028_v40, %v2028_v40  ;;  %v3596_v43 = vld [vmem:[#allocation9 + $0x20] sm:$0xff] (%p602_p8)  }
 0x186   : >> { %v3260_v32 = vpack.c.bf16 %v2029_v47, %v2029_v47  ;;  %v5616_v59 = vpack.c.bf16 %v2030_v11, %v2030_v11  ;;  %v5618_v36 = vpack.c.bf16 %v2031_v51, %v2031_v51  ;;  %v5620_v50 = vpack.c.bf16 %v2032_v54, %v2032_v54 }
 0x187   : >> { %v5622_v13 = vpack.c.bf16 %v2033_v60, %v2033_v60  ;;  %v5624_v37 = vpack.c.bf16 %v2034_v2, %v2034_v2  ;;  %v5626_v22 = vpack.c.bf16 %v2035_v20, %v2035_v20  ;;  %v5628_v5 = vpack.c.bf16 %v2036_v17, %v2036_v17 }
 0x188   : >> { %v5630_v63 = vpack.c.bf16 %v2037_v3, %v2037_v3  ;;  %v5632_v23 = vpack.c.bf16 %v2038_v8, %v2038_v8  ;;  %v5634_v21 = vpack.c.bf16 %v2039_v45, %v2039_v45  ;;  %v5636_v18 = vpack.c.bf16 %v2040_v49, %v2040_v49 }
 0x189   : >> { %v5638_v1 = vpack.c.bf16 %v2041_v58, %v2041_v58  ;;  %v5640_v10 = vpack.c.bf16 %v2042_v9, %v2042_v9  ;;  %v5642_v42 = vpack.c.bf16 %v2043_v0, %v2043_v0  ;;  %v5644_v62 = vpack.c.bf16 %v2044_v48, %v2044_v48 }
 0x18a   : >> { %v5646_v16 = vpack.c.bf16 %v2045_v46, %v2045_v46  ;;  %v2130_v12 = vshrl.u32 %v3253_v28, 16  ;;  %v2133_v33 = vshll.u32 %v3253_v28, 16  ;;  %v2139_v52 = vshll.u32 %v3254_v26, 16 }
 0x18b   : >> { %v2143_v41 = vshrl.u32 %v3254_v26, 16  ;;  %v2149_v7 = vshll.u32 %v3255_v34, 16  ;;  %v2154_v44 = vshrl.u32 %v3256_v25, 16  ;;  %v2157_v57 = vshll.u32 %v3256_v25, 16 }
 0x18c   : >> { %v2132_v14 = vrot.slane %v2130_v12, 4  ;;  %v2135_v4 = vrot.slane %v2133_v33, 5  ;;  %v2141_v15 = vrot.slane %v2139_v52, 5  ;;  %v2163_v39 = vshll.u32 %v3257_v6, 16 }
 0x18d   : >> { %v2145_v35 = vrot.slane %v2143_v41, 4  ;;  %v2151_v53 = vrot.slane %v2149_v7, 5  ;;  %v2156_v31 = vrot.slane %v2154_v44, 4  ;;  %v2159_v29 = vrot.slane %v2157_v57, 5 }
 0x18e   : >> { %v2136_v30 = vor.u32 %v2135_v4, %v2132_v14  ;;  %v2165_v19 = vrot.slane %v2163_v39, 5  ;;  %v2167_v56 = vshrl.u32 %v3257_v6, 16  ;;  %v2173_v24 = vshll.u32 %v3258_v38, 16 }
 0x18f   : >> { %v2146_v27 = vor.u32 %v2145_v35, %v2141_v15  ;;  %v2160_v40 = vor.u32 %v2159_v29, %v2156_v31  ;;  %v2178_v47 = vshrl.u32 %v3259_v61, 16  ;;  %v2181_v11 = vshll.u32 %v3259_v61, 16 }
 0x190   : >> { %v2137_v51 = vrot.slane %v2136_v30, 4  ;;  %v2169_v54 = vrot.slane %v2167_v56, 4  ;;  %v2175_v60 = vrot.slane %v2173_v24, 5  ;;  %v2187_v2 = vshll.u32 %v3260_v32, 16 }
 0x191   : >> { %v2147_v20 = vrot.slane %v2146_v27, 4  ;;  %v2161_v17 = vrot.slane %v2160_v40, 4  ;;  %v2180_v3 = vrot.slane %v2178_v47, 4  ;;  %v2183_v8 = vrot.slane %v2181_v11, 5 }
 0x192   : >> { %v2142_v45 = vsel %vm5651_vm7, %v2137_v51, %v2141_v15  ;;  %v2170_v49 = vor.u32 %v2169_v54, %v2165_v19  ;;  %v2189_v58 = vrot.slane %v2187_v2, 5  ;;  %v2191_v9 = vshrl.u32 %v3260_v32, 16 }
 0x193   : >> { %v2152_v0 = vsel %vm5651_vm7, %v2147_v20, %v2151_v53  ;;  %v2166_v48 = vsel %vm5651_vm7, %v2161_v17, %v2165_v19  ;;  %v2184_v46 = vor.u32 %v2183_v8, %v2180_v3  ;;  %v2197_v28 = vshll.u32 %v5616_v59, 16  ;;  %2340 = vst [vmem:[%s5662_s11] sm:$0xf] %v2142_v45 }
 0x194   : >> { %v2171_v26 = vrot.slane %v2170_v49, 4  ;;  %v2193_v34 = vrot.slane %v2191_v9, 4  ;;  %v2202_v25 = vshrl.u32 %v5618_v36, 16  ;;  %v2205_v6 = vshll.u32 %v5618_v36, 16  ;;  %2341 = vst [vmem:[%s5662_s11 + $0x4] sm:$0xf] %v2152_v0 }
 0x195   : >> { %2342 = vst [vmem:[%s5662_s11 + $0x8] sm:$0xf] %v2166_v48  ;;  %v2185_v38 = vrot.slane %v2184_v46, 4  ;;  %v2199_v61 = vrot.slane %v2197_v28, 5  ;;  %v2211_v32 = vshll.u32 %v5620_v50, 16  ;;  %v2215_v59 = vshrl.u32 %v5620_v50, 16 }
 0x196   : >> { %v2176_v12 = vsel %vm5651_vm7, %v2171_v26, %v2175_v60  ;;  %v2194_v33 = vor.u32 %v2193_v34, %v2189_v58  ;;  %v2204_v52 = vrot.slane %v2202_v25, 4  ;;  %v2207_v41 = vrot.slane %v2205_v6, 5 }
 0x197   : >> { %v2190_v7 = vsel %vm5651_vm7, %v2185_v38, %v2189_v58  ;;  %v2213_v44 = vrot.slane %v2211_v32, 5  ;;  %v2217_v36 = vrot.slane %v2215_v59, 4  ;;  %v2221_v57 = vshll.u32 %v5622_v13, 16  ;;  %2343 = vst [vmem:[%s5662_s11 + $0xc] sm:$0xf] %v2176_v12 }
 0x198   : >> { %v2195_v14 = vrot.slane %v2194_v33, 4  ;;  %v2208_v4 = vor.u32 %v2207_v41, %v2204_v52  ;;  %v2226_v15 = vshrl.u32 %v5624_v37, 16  ;;  %v2229_v50 = vshll.u32 %v5624_v37, 16  ;;  %2344 = vst [vmem:[%s5662_s11 + $0x10] sm:$0xf] %v2190_v7 }
 0x199   : >> { %v2218_v39 = vor.u32 %v2217_v36, %v2213_v44  ;;  %v2223_v35 = vrot.slane %v2221_v57, 5  ;;  %v2235_v53 = vshll.u32 %v5626_v22, 16  ;;  %v2239_v31 = vshrl.u32 %v5626_v22, 16 }
 0x19a   : >> { %v2200_v29 = vsel %vm5651_vm7, %v2195_v14, %v2199_v61  ;;  %v2209_v30 = vrot.slane %v2208_v4, 4  ;;  %v2228_v13 = vrot.slane %v2226_v15, 4  ;;  %v2231_v19 = vrot.slane %v2229_v50, 5 }
 0x19b   : >> { %v2219_v56 = vrot.slane %v2218_v39, 4  ;;  %v2237_v24 = vrot.slane %v2235_v53, 5  ;;  %v2241_v27 = vrot.slane %v2239_v31, 4  ;;  %v2245_v37 = vshll.u32 %v5628_v5, 16  ;;  %2345 = vst [vmem:[%s5662_s11 + $0x14] sm:$0xf] %v2200_v29 }
 0x19c   : >> { %v2214_v40 = vsel %vm5651_vm7, %v2209_v30, %v2213_v44  ;;  %v2232_v47 = vor.u32 %v2231_v19, %v2228_v13  ;;  %v2250_v22 = vshrl.u32 %v5630_v63, 16  ;;  %v2253_v11 = vshll.u32 %v5630_v63, 16  ;;  %v3593_v19 = vld [vmem:[#allocation9 + $0x38] sm:$0xff] (%p602_p8)  }
 0x19d   : >> { %v2224_v51 = vsel %vm5651_vm7, %v2219_v56, %v2223_v35  ;;  %v2242_v54 = vor.u32 %v2241_v27, %v2237_v24  ;;  %v2247_v60 = vrot.slane %v2245_v37, 5  ;;  %v2259_v2 = vshll.u32 %v5632_v23, 16  ;;  %2346 = vst [vmem:[%s5662_s11 + $0x18] sm:$0xf] %v2214_v40  ;;  %v3594_v56 = vld [vmem:[#allocation9 + $0x30] sm:$0xff] (%p602_p8)   ;;  %3431 = vmatprep.subr.bf16.mxu0 (%p602_p8), %v3593_v19  ;;  %3479 = vmatprep.subr.bf16.mxu1 (%p602_p8), %v3593_v19 }
 0x19e   : >> { %v2233_v20 = vrot.slane %v2232_v47, 4  ;;  %v2252_v17 = vrot.slane %v2250_v22, 4  ;;  %v2255_v5 = vrot.slane %v2253_v11, 5  ;;  %v2263_v3 = vshrl.u32 %v5632_v23, 16  ;;  %2347 = vst [vmem:[%s5662_s11 + $0x1c] sm:$0xf] %v2224_v51  ;;  %3432 = vmatpush3.bf16.msra.mxu0 (%p602_p8), %v3593_v19  ;;  %3487 = vmatpush3.bf16.msra.mxu1 (%p602_p8), %v3593_v19 }
 0x19f   : >> { %v2243_v8 = vrot.slane %v2242_v54, 4  ;;  %v2261_v45 = vrot.slane %v2259_v2, 5  ;;  %v2269_v63 = vshll.u32 %v5634_v21, 16  ;;  %v2274_v49 = vshrl.u32 %v5636_v18, 16  ;;  %3433 = vmatprep.subr.bf16.mxu0 (%p602_p8), %v3594_v56  ;;  %3480 = vmatprep.subr.bf16.mxu1 (%p602_p8), %v3594_v56  ;;  %v3598_v40 = vld [vmem:[#allocation9 + $0x10] sm:$0xff] (%p602_p8)   ;;  %v3599_v47 = vld [vmem:[#allocation9 + $0x8] sm:$0xff] (%p602_p8)  }
 0x1a0   : >> { %v2238_v58 = vsel %vm5651_vm7, %v2233_v20, %v2237_v24  ;;  %v2256_v9 = vor.u32 %v2255_v5, %v2252_v17  ;;  %v2265_v0 = vrot.slane %v2263_v3, 4  ;;  %v2277_v48 = vshll.u32 %v5636_v18, 16  ;;  %v3595_v24 = vld [vmem:[#allocation9 + $0x28] sm:$0xff] (%p602_p8)   ;;  %v3600_v22 = vld [vmem:[#allocation9] sm:$0xff] (%p602_p8)  }
 0x1a1   : >> { %v2248_v46 = vsel %vm5651_vm7, %v2243_v8, %v2247_v60  ;;  %v2271_v28 = vrot.slane %v2269_v63, 5  ;;  %v2276_v23 = vrot.slane %v2274_v49, 4  ;;  %v2283_v26 = vshll.u32 %v5638_v1, 16  ;;  %2348 = vst [vmem:[%s5662_s11 + $0x20] sm:$0xf] %v2238_v58 }
 0x1a2   : >> { %v2257_v34 = vrot.slane %v2256_v9, 4  ;;  %v2266_v25 = vor.u32 %v2265_v0, %v2261_v45  ;;  %v2279_v21 = vrot.slane %v2277_v48, 5  ;;  %v2287_v6 = vshrl.u32 %v5638_v1, 16  ;;  %2349 = vst [vmem:[%s5662_s11 + $0x24] sm:$0xf] %v2248_v46  ;;  %3434 = vmatpush3.bf16.msra.mxu0 (%p602_p8), %v3594_v56  ;;  %3488 = vmatpush3.bf16.msra.mxu1 (%p602_p8), %v3594_v56 }
 0x1a3   : >> { %v2285_v38 = vrot.slane %v2283_v26, 5  ;;  %v2293_v61 = vshll.u32 %v5640_v10, 16  ;;  %v2298_v18 = vshrl.u32 %v5642_v42, 16  ;;  %v2301_v32 = vshll.u32 %v5642_v42, 16  ;;  %3435 = vmatprep.subr.bf16.mxu0 (%p602_p8), %v3595_v24  ;;  %3481 = vmatprep.subr.bf16.mxu1 (%p602_p8), %v3595_v24  ;;  %v5737_v9 = vld [vmem:[%s5846_s4] ss:$0 sm:$0xff] (%p602_p8) }
 0x1a4   : >> { %v2262_v59 = vsel %vm5651_vm7, %v2257_v34, %v2261_v45  ;;  %v2267_v12 = vrot.slane %v2266_v25, 4  ;;  %v2280_v33 = vor.u32 %v2279_v21, %v2276_v23  ;;  %v2289_v52 = vrot.slane %v2287_v6, 4 }
 0x1a5   : >> { %v2295_v41 = vrot.slane %v2293_v61, 5  ;;  %v2300_v7 = vrot.slane %v2298_v18, 4  ;;  %v2303_v44 = vrot.slane %v2301_v32, 5  ;;  %v2307_v1 = vshll.u32 %v5644_v62, 16  ;;  %2350 = vst [vmem:[%s5662_s11 + $0x28] sm:$0xf] %v2262_v59 }
 0x1a6   : >> { %v2272_v10 = vsel %vm5651_vm7, %v2267_v12, %v2271_v28  ;;  %v2281_v36 = vrot.slane %v2280_v33, 4  ;;  %v2290_v42 = vor.u32 %v2289_v52, %v2285_v38  ;;  %v2311_v57 = vshrl.u32 %v5644_v62, 16  ;;  %3436 = vmatpush3.bf16.msra.mxu0 (%p602_p8), %v3595_v24  ;;  %3489 = vmatpush3.bf16.msra.mxu1 (%p602_p8), %v3595_v24 }
 0x1a7   : >> { %v2304_v14 = vor.u32 %v2303_v44, %v2300_v7  ;;  %v2309_v4 = vrot.slane %v2307_v1, 5  ;;  %v2317_v15 = vshll.u32 %v5646_v16, 16  ;;  %2351 = vst [vmem:[%s5662_s11 + $0x2c] sm:$0xf] %v2272_v10  ;;  %3437 = vmatprep.subr.bf16.mxu0 (%p602_p8), %v3596_v43  ;;  %3482 = vmatprep.subr.bf16.mxu1 (%p602_p8), %v3596_v43 }
 0x1a8   : >> { %v2286_v50 = vsel %vm5651_vm7, %v2281_v36, %v2285_v38  ;;  %v2291_v39 = vrot.slane %v2290_v42, 4  ;;  %v2313_v35 = vrot.slane %v2311_v57, 4 }
 0x1a9   : >> { %v2305_v53 = vrot.slane %v2304_v14, 4  ;;  %2352 = vst [vmem:[%s5662_s11 + $0x30] sm:$0xf] %v2286_v50  ;;  %v2319_v30 = vrot.slane %v2317_v15, 5 }
 0x1aa   : >> { %v2296_v31 = vsel %vm5651_vm7, %v2291_v39, %v2295_v41  ;;  %v2314_v29 = vor.u32 %v2313_v35, %v2309_v4  ;;  %3438 = vmatpush3.bf16.msra.mxu0 (%p602_p8), %v3596_v43  ;;  %3490 = vmatpush3.bf16.msra.mxu1 (%p602_p8), %v3596_v43 }
 0x1ab   : >> { %v2310_v62 = vsel %vm5651_vm7, %v2305_v53, %v2309_v4  ;;  %2353 = vst [vmem:[%s5662_s11 + $0x34] sm:$0xf] %v2296_v31  ;;  %604 = sbr.rel (!%p602_p8) target bundleno = 143 (0x8f), region = 111  ;;  %3439 = vmatprep.subr.bf16.mxu0 (%p602_p8), %v3597_v55  ;;  %3483 = vmatprep.subr.bf16.mxu1 (%p602_p8), %v3597_v55 }
 0x1ac   : >> { %v2315_v13 = vrot.slane %v2314_v29, 4  ;;  %2354 = vst [vmem:[%s5662_s11 + $0x38] sm:$0xf] %v2310_v62 }
 0x1ae   : >> { %v2320_v16 = vsel %vm5651_vm7, %v2315_v13, %v2319_v30  ;;  %3440 = vmatpush3.bf16.msra.mxu0 (%p602_p8), %v3597_v55  ;;  %3491 = vmatpush3.bf16.msra.mxu1 (%p602_p8), %v3597_v55 }
 0x1af   : >> { %2355 = vst [vmem:[%s5662_s11 + $0x3c] sm:$0xf] %v2320_v16  ;;  %3441 = vmatprep.subr.bf16.mxu0 (%p602_p8), %v3598_v40  ;;  %3484 = vmatprep.subr.bf16.mxu1 (%p602_p8), %v3598_v40 }
 0x1b2   : > { %3442 = vmatpush3.bf16.msra.mxu0 %v3598_v40  ;;  %3492 = vmatpush3.bf16.msra.mxu1 %v3598_v40 }
 0x1b3   : > { %3443 = vmatprep.subr.bf16.mxu0 %v3599_v47  ;;  %3485 = vmatprep.subr.bf16.mxu1 %v3599_v47 }
 0x1b6   : > { %v3601_v27 = vld [vmem:[#allocation3] sm:$0xff]   ;;  %3444 = vmatpush3.bf16.msra.mxu0 %v3599_v47  ;;  %3493 = vmatpush3.bf16.msra.mxu1 %v3599_v47  ;;  %v3603_v11 = vld [vmem:[#allocation3 + $0x8] sm:$0xff]   ;;  %v3605_v54 = vld [vmem:[#allocation3 + $0x10] sm:$0xff]  }
 0x1b7   : > { %v3602_v37 = vld [vmem:[#allocation3 + $0x40] sm:$0xff]   ;;  %3447 = vmatprep.mubr.bf16.mxu0 %v3601_v27  ;;  %3445 = vmatprep.subr.bf16.mxu0 %v3600_v22  ;;  %v3604_v51 = vld [vmem:[#allocation3 + $0x48] sm:$0xff]   ;;  %v3606_v60 = vld [vmem:[#allocation3 + $0x50] sm:$0xff]  }
 0x1b8   : > { %3463 = vmatprep.mubr.bf16.mxu1 %v3602_v37  ;;  %3486 = vmatprep.subr.bf16.mxu1 %v3600_v22  ;;  %v3607_v2 = vld [vmem:[#allocation3 + $0x18] sm:$0xff]   ;;  %v3609_v17 = vld [vmem:[#allocation3 + $0x20] sm:$0xff]   ;;  %v3611_v3 = vld [vmem:[#allocation3 + $0x28] sm:$0xff]  }
 0x1b9   : > { %v3608_v20 = vld [vmem:[#allocation3 + $0x58] sm:$0xff]   ;;  %v3610_v5 = vld [vmem:[#allocation3 + $0x60] sm:$0xff]   ;;  %v3612_v8 = vld [vmem:[#allocation3 + $0x68] sm:$0xff]  }
 0x1ba   : > { %3446 = vmatpush3.bf16.msra.mxu0 %v3600_v22  ;;  %3494 = vmatpush3.bf16.msra.mxu1 %v3600_v22  ;;  %v3613_v45 = vld [vmem:[#allocation3 + $0x30] sm:$0xff]   ;;  %v3615_v49 = vld [vmem:[#allocation3 + $0x38] sm:$0xff]  }
 0x1bb   : > { %v3614_v63 = vld [vmem:[#allocation3 + $0x70] sm:$0xff]   ;;  %v3616_v58 = vld [vmem:[#allocation3 + $0x78] sm:$0xff]  }
 0x1bd   : > { %3448 = vmatmul.mubr.bf16.vlgmr.msra.gmra.mxu0 %v3603_v11  ;;  %3464 = vmatmul.mubr.bf16.vlgmr.msra.gmra.mxu1 %v3604_v51 }
 0x1be   : > { %3451 = vmatprep.mubr.bf16.mxu0 %v3605_v54  ;;  %3467 = vmatprep.mubr.bf16.mxu1 %v3606_v60 }
 0x1c5   : > { %3452 = vmatmul.mubr.bf16.gmra.mxu0 %v3607_v2  ;;  %3468 = vmatmul.mubr.bf16.gmra.mxu1 %v3608_v20 }
 0x1c6   : > { %3455 = vmatprep.mubr.bf16.mxu0 %v3609_v17  ;;  %3471 = vmatprep.mubr.bf16.mxu1 %v3610_v5 }
 0x1cd   : > { %3456 = vmatmul.mubr.bf16.gmra.mxu0 %v3611_v3  ;;  %3472 = vmatmul.mubr.bf16.gmra.mxu1 %v3612_v8 }
 0x1ce   : > { %3459 = vmatprep.mubr.bf16.mxu0 %v3613_v45  ;;  %3475 = vmatprep.mubr.bf16.mxu1 %v3614_v63 }
 0x1d5   : > { %3460 = vmatmul.mubr.bf16.gmra.mxu0 %v3615_v49  ;;  %3476 = vmatmul.mubr.bf16.gmra.mxu1 %v3616_v58 }
 0x27d   : > { %v3449_v0 = vpop.f32.mrf.mxu0  ;;  %v3465_v48 = vpop.f32.mrf.mxu1 }
 0x27e   : > { %v2598_v46 = vadd.f32 %v3449_v0, %v5737_v9  ;;  %v2662_v28 = vadd.f32 %v3465_v48, %v5737_v9 }
 0x27f   : > { %v2589_v23 = vpop.f32.mrf.mxu0  ;;  %v2653_v26 = vpop.f32.mrf.mxu1 }
 0x280   : > { %v2590_v34 = vadd.f32 %v5737_v9, %v2589_v23  ;;  %v2654_v25 = vadd.f32 %v5737_v9, %v2653_v26  ;;  %v2718_v18 = vmax.f32 %v2598_v46, 0.0  ;;  %v2734_v32 = vmax.f32 %v2662_v28, 0.0 }
 0x281   : > { %v3450_v21 = vpop.f32.mrf.mxu0  ;;  %v3466_v6 = vpop.f32.mrf.mxu1 }
 0x282   : > { %v2601_v38 = vadd.f32 %v3450_v21, %v5737_v9  ;;  %v2665_v61 = vadd.f32 %v3466_v6, %v5737_v9  ;;  %v2716_v44 = vmax.f32 %v2590_v34, 0.0  ;;  %v2732_v1 = vmax.f32 %v2654_v25, 0.0 }
 0x283   : > { %v2592_v59 = vpop.f32.mrf.mxu0  ;;  %v2656_v12 = vpop.f32.mrf.mxu1 }
 0x284   : > { %v2719_v33 = vmax.f32 %v2601_v38, 0.0  ;;  %v2735_v52 = vmax.f32 %v2665_v61, 0.0  ;;  %v2593_v41 = vadd.f32 %v5737_v9, %v2592_v59  ;;  %v2657_v7 = vadd.f32 %v5737_v9, %v2656_v12 }
 0x285   : > { %v3453_v10 = vpop.f32.mrf.mxu0  ;;  %v3469_v36 = vpop.f32.mrf.mxu1 }
 0x286   : > { %v3320_v42 = vpack.c.bf16 %v2719_v33, %v2718_v18  ;;  %v3360_v57 = vpack.c.bf16 %v2735_v52, %v2734_v32  ;;  %v2717_v14 = vmax.f32 %v2593_v41, 0.0  ;;  %v2733_v4 = vmax.f32 %v2657_v7, 0.0 }
 0x287   : > { %v2614_v15 = vadd.f32 %v3453_v10, %v5737_v9  ;;  %v2678_v50 = vadd.f32 %v3469_v36, %v5737_v9  ;;  %v2605_v39 = vpop.f32.mrf.mxu0  ;;  %v2669_v35 = vpop.f32.mrf.mxu1 }
 0x288   : > { %3392 = vst [vmem:[%s4064_s30 + $0x8] sm:$0xff] %v3320_v42   ;;  %3400 = vst [vmem:[%s4064_s30 + $0x48] sm:$0xff] %v3360_v57   ;;  %v3315_v53 = vpack.c.bf16 %v2717_v14, %v2716_v44  ;;  %v3355_v31 = vpack.c.bf16 %v2733_v4, %v2732_v1  ;;  %v2606_v29 = vadd.f32 %v5737_v9, %v2605_v39 }
 0x289   : > { %v2670_v30 = vadd.f32 %v5737_v9, %v2669_v35  ;;  %v3454_v62 = vpop.f32.mrf.mxu0  ;;  %v3470_v13 = vpop.f32.mrf.mxu1  ;;  %v2722_v56 = vmax.f32 %v2614_v15, 0.0  ;;  %v2738_v24 = vmax.f32 %v2678_v50, 0.0 }
 0x28a   : > { %3316 = vst [vmem:[%s4064_s30] sm:$0xff] %v3315_v53   ;;  %3399 = vst [vmem:[%s4064_s30 + $0x40] sm:$0xff] %v3355_v31   ;;  %v2617_v16 = vadd.f32 %v3454_v62, %v5737_v9  ;;  %v2681_v19 = vadd.f32 %v3470_v13, %v5737_v9  ;;  %v2720_v22 = vmax.f32 %v2606_v29, 0.0 }
 0x28b   : > { %v2608_v43 = vpop.f32.mrf.mxu0  ;;  %v2672_v27 = vpop.f32.mrf.mxu1  ;;  %v2736_v11 = vmax.f32 %v2670_v30, 0.0 }
 0x28c   : > { %v2723_v37 = vmax.f32 %v2617_v16, 0.0  ;;  %v2739_v55 = vmax.f32 %v2681_v19, 0.0  ;;  %v2609_v40 = vadd.f32 %v5737_v9, %v2608_v43  ;;  %v2673_v47 = vadd.f32 %v5737_v9, %v2672_v27 }
 0x28d   : > { %v3457_v51 = vpop.f32.mrf.mxu0  ;;  %v3473_v54 = vpop.f32.mrf.mxu1 }
 0x28e   : > { %v3330_v60 = vpack.c.bf16 %v2723_v37, %v2722_v56  ;;  %v3370_v2 = vpack.c.bf16 %v2739_v55, %v2738_v24  ;;  %v2721_v20 = vmax.f32 %v2609_v40, 0.0  ;;  %v2737_v17 = vmax.f32 %v2673_v47, 0.0 }
 0x28f   : > { %v2630_v5 = vadd.f32 %v3457_v51, %v5737_v9  ;;  %v2694_v3 = vadd.f32 %v3473_v54, %v5737_v9  ;;  %v2621_v8 = vpop.f32.mrf.mxu0  ;;  %v2685_v45 = vpop.f32.mrf.mxu1 }
 0x290   : > { %3394 = vst [vmem:[%s4064_s30 + $0x18] sm:$0xff] %v3330_v60   ;;  %3402 = vst [vmem:[%s4064_s30 + $0x58] sm:$0xff] %v3370_v2   ;;  %v3325_v63 = vpack.c.bf16 %v2721_v20, %v2720_v22  ;;  %v3365_v49 = vpack.c.bf16 %v2737_v17, %v2736_v11  ;;  %v2622_v58 = vadd.f32 %v5737_v9, %v2621_v8 }
 0x291   : > { %v2686_v0 = vadd.f32 %v5737_v9, %v2685_v45  ;;  %v3458_v48 = vpop.f32.mrf.mxu0  ;;  %v3474_v46 = vpop.f32.mrf.mxu1  ;;  %v2726_v26 = vmax.f32 %v2630_v5, 0.0  ;;  %v2742_v34 = vmax.f32 %v2694_v3, 0.0 }
 0x292   : > { %3393 = vst [vmem:[%s4064_s30 + $0x10] sm:$0xff] %v3325_v63   ;;  %3401 = vst [vmem:[%s4064_s30 + $0x50] sm:$0xff] %v3365_v49   ;;  %v2633_v28 = vadd.f32 %v3458_v48, %v5737_v9  ;;  %v2697_v23 = vadd.f32 %v3474_v46, %v5737_v9  ;;  %v2724_v32 = vmax.f32 %v2622_v58, 0.0 }
 0x293   : > { %v2624_v25 = vpop.f32.mrf.mxu0  ;;  %v2688_v21 = vpop.f32.mrf.mxu1  ;;  %v2740_v59 = vmax.f32 %v2686_v0, 0.0 }
 0x294   : > { %v2727_v6 = vmax.f32 %v2633_v28, 0.0  ;;  %v2743_v38 = vmax.f32 %v2697_v23, 0.0  ;;  %v2625_v61 = vadd.f32 %v5737_v9, %v2624_v25  ;;  %v2689_v18 = vadd.f32 %v5737_v9, %v2688_v21 }
 0x295   : > { %v3461_v12 = vpop.f32.mrf.mxu0  ;;  %v3477_v33 = vpop.f32.mrf.mxu1 }
 0x296   : > { %v3340_v52 = vpack.c.bf16 %v2727_v6, %v2726_v26  ;;  %v3380_v41 = vpack.c.bf16 %v2743_v38, %v2742_v34  ;;  %v2725_v7 = vmax.f32 %v2625_v61, 0.0  ;;  %v2741_v44 = vmax.f32 %v2689_v18, 0.0 }
 0x297   : > { %v2646_v1 = vadd.f32 %v3461_v12, %v5737_v9  ;;  %v2710_v10 = vadd.f32 %v3477_v33, %v5737_v9  ;;  %v2637_v36 = vpop.f32.mrf.mxu0  ;;  %v2701_v42 = vpop.f32.mrf.mxu1 }
 0x298   : > { %3396 = vst [vmem:[%s4064_s30 + $0x28] sm:$0xff] %v3340_v52   ;;  %3404 = vst [vmem:[%s4064_s30 + $0x68] sm:$0xff] %v3380_v41   ;;  %v3335_v57 = vpack.c.bf16 %v2725_v7, %v2724_v32  ;;  %v3375_v14 = vpack.c.bf16 %v2741_v44, %v2740_v59  ;;  %v2638_v4 = vadd.f32 %v5737_v9, %v2637_v36 }
 0x299   : > { %v2702_v15 = vadd.f32 %v5737_v9, %v2701_v42  ;;  %v3462_v50 = vpop.f32.mrf.mxu0  ;;  %v3478_v39 = vpop.f32.mrf.mxu1  ;;  %v2730_v31 = vmax.f32 %v2646_v1, 0.0  ;;  %v2746_v29 = vmax.f32 %v2710_v10, 0.0 }
 0x29a   : > { %3395 = vst [vmem:[%s4064_s30 + $0x20] sm:$0xff] %v3335_v57   ;;  %3403 = vst [vmem:[%s4064_s30 + $0x60] sm:$0xff] %v3375_v14   ;;  %v2649_v35 = vadd.f32 %v3462_v50, %v5737_v9  ;;  %v2713_v53 = vadd.f32 %v3478_v39, %v5737_v9  ;;  %v2728_v24 = vmax.f32 %v2638_v4, 0.0 }
 0x29b   : > { %v2640_v30 = vpop.f32.mrf.mxu0  ;;  %v2704_v62 = vpop.f32.mrf.mxu1  ;;  %v2744_v43 = vmax.f32 %v2702_v15, 0.0 }
 0x29c   : > { %v2731_v13 = vmax.f32 %v2649_v35, 0.0  ;;  %v2747_v16 = vmax.f32 %v2713_v53, 0.0  ;;  %v2641_v19 = vadd.f32 %v5737_v9, %v2640_v30  ;;  %v2705_v56 = vadd.f32 %v5737_v9, %v2704_v62 }
 0x29e   : > { %v3350_v27 = vpack.c.bf16 %v2731_v13, %v2730_v31  ;;  %v3390_v37 = vpack.c.bf16 %v2747_v16, %v2746_v29  ;;  %v2729_v55 = vmax.f32 %v2641_v19, 0.0  ;;  %v2745_v40 = vmax.f32 %v2705_v56, 0.0 }
 0x2a0   : > { %3398 = vst [vmem:[%s4064_s30 + $0x38] sm:$0xff] %v3350_v27   ;;  %3406 = vst [vmem:[%s4064_s30 + $0x78] sm:$0xff] %v3390_v37   ;;  %v3345_v9 = vpack.c.bf16 %v2729_v55, %v2728_v24  ;;  %v3385_v47 = vpack.c.bf16 %v2745_v40, %v2744_v43 }
 0x2a2   : > { %3397 = vst [vmem:[%s4064_s30 + $0x30] sm:$0xff] %v3345_v9   ;;  %3405 = vst [vmem:[%s4064_s30 + $0x70] sm:$0xff] %v3385_v47  }
 0x2a3   : > { %3710 = shalt.err (!%p3707_p10)
}
 0x2a4   : > { %s3711_s30 = scalar_lea.hbm %s5788_s6, 2048  ;;  %s3715_s11 = scalar_lea.hbm %s5847_s5, 4096 }
 0x2a5   : > { %p3712_p1 = scmp.ne.s32.totalorder %s5788_s6, %s3711_s30  ;;  %p3716_p12 = scmp.lt.s32.totalorder %s5788_s6, %s5847_s5 }
 0x2a6   : > { %p3717_p3 = scmp.lt.s32.totalorder %s3715_s11, %s3711_s30 }
 0x2a7   : > { %p3713_p4 = pnand %p3712_p1, %p3930_p7 }
 0x2a8   : > { %p3718_p8 = por %p3717_p3, %p3716_p12 }
 0x2a9   : > { %p3714_p6 = pneg %p3713_p4 }
 0x2ab   : > { %p3719_p9 = pnand %p3718_p8, %p3714_p6 }
 0x2ad   : > { %3722 = shalt.err (!%p3719_p9)
}
 0x2ae   : > { %s3800_s10 = smov 64   ;;  %s3801_s1 = smov 4  }
 0x2af   : > { %3505 = dma.vmem_to_hbm [thread:$0]  (%p3930_p7), %s5790_s15, 2048, %s5788_s6, %s2909_s21, %s3800_s10, %s3800_s10, %s3801_s1  }
 0x2b0 PF: > { %s2940_s16 = sand.u32 1, %s3765_s18   ;;  %p6173_p11 = scmp.ne.s32.totalorder %s5953_s29, 0 }
 0x2b1   : > { %p6174_p2 = scmp.ge.s32.totalorder %s3785_s23, 2  ;;  %s2941_s26 = scalar_lea.sflag [#allocation6], %s2940_s16 }
 0x2b3   : > { %p3519_p13 = pnand %p6174_p2, %p6173_p11 }
 0x2b5   : > { %p3520_p0 = pneg %p3519_p13 }
 0x2b7   : > { %3760 = dma.done.wait (%p3520_p0), %s2941_s26, 2048  }
 0x2b8   : > { %3762 = vsyncadd (%p3520_p0), %s2941_s26, 4294965248  ;;  %s22_s23 = sadd.s32 1, %s3785_s23   ;;  %s6175_s18 = smov %s3769_s19 }
 0x2b9   : > { %p19_p5 = scmp.ge.s32.totalorder %s22_s23, 4   ;;  %s6176_s19 = smov %s3773_s20 }
 0x2ba   : > { %s6177_s20 = smov %s3939_s14  ;;  %s6178_s21 = smov %s3781_s22 }
 0x2bb   : > { %s6179_s22 = smov %s6181_s7  ;;  %21 = sbr.rel (!%p19_p5) target bundleno = 9 (0x9), region = 122 }
 0x2c0   :  { %2946 = vsyncpa [#allocation5], 1 }
 0x2c1   :  { %2948 = vsyncpa [#allocation5 + $0x1], 1 }
 0x2c2   :  { %2949 = vsyncpa [#allocation8], 1 }
 0x2c3   :  { %2950 = vsyncpa [#allocation6], 1 }
 0x2c4   :  { %2952 = vsyncpa [#allocation6 + $0x1], 1 }

</bundles_post_ra>
